<compile_context>
chip_gen: v5e
topology: v5e:2x2
jax: 0.10.0
libtpu: 0.0.40
codegen_flags: <defaults>
</compile_context>

<pallas_src>
import math

import jax
import jax.numpy as jnp
from jax import lax
from jax.experimental import pallas as pl
from jax.experimental.pallas import tpu as pltpu

# ----- small-but-consistent model config -----
BATCH = 2
IN_H, IN_W = 10, 11          # input_sz
CNN_CHN = 8                  # cnn_chn
KN = 3                       # cnn_kn_sz
PAD = 1                      # cnn_padding
FC_SZ = 128                  # fc_sz
RNN_WIN = 4                  # rnn_win_sz
RNN_HID = 32                 # rnn_hidden_sz
NUM_CLASS = (5, 2)
N_OUT = sum(NUM_CLASS)

# derived layout constants (lane-aligned)
HP, WP = IN_H + 2 * PAD, IN_W + 2 * PAD      # 12, 13 (zero-padded spatial grid)
NPOS = HP * WP                               # 156 real padded positions per image
NPOS_P = 256                                 # per-image lane block (multiple of 128)
N_IMG = BATCH * RNN_WIN                      # 8 images per forward pass
FLAT = N_IMG * NPOS_P                        # 2048 (multiple of 128)
MARGIN = 128                                 # lane margin so 3x3 taps never read OOB
FLATM = FLAT + 2 * MARGIN                    # 2304
C2 = 2 * CNN_CHN                             # 16 conv2 channels
FC3_IN = IN_H * IN_W * C2                    # 1760 (torch fc3 input size)
K1 = 16                                      # conv1 patch rows (9 taps zero-padded)
K2 = KN * KN * CNN_CHN                       # 72 conv2 patch rows
PM = 16                                      # wrapper-side margin for conv1 patches

# tap (dy, dx) -> shift in padded-flat coordinates (dy*WP + dx around the center)
SHIFTS = tuple((dy - PAD) * WP + (dx - PAD) for dy in range(KN) for dx in range(KN))


# -------------------- the single fused Pallas kernel --------------------
def _fused_kernel(p1_ref, mask_ref, w1_ref, w2_ref, w3_ref, wfh_ref, wnh_ref,
                  wx_ref, w5_ref, o_ref, a1_ref, p2_ref, fc3in_ref):
    # Layout: flat positions (256-lane block per image, t-major image order) on lanes,
    #         channels on sublanes.
    #   p1_ref   : (16, FLAT)            conv1 tap patches (rows 9..15 zero)
    #   mask_ref : (CNN_CHN, FLAT)       1.0 at interior positions, 0.0 elsewhere
    #   w1_ref   : (CNN_CHN, 16)         conv1 weights, tap-major (cols 9..15 zero)
    #   w2_ref   : (C2, 72)              conv2 weights, (tap, cin)-major
    #   w3_ref   : (C2*NPOS_P, FC_SZ)    fc3 weights, row = c*256 + padded_pos (zeros at
    #                                    non-interior rows)
    #   wfh_ref  : (RNN_HID, RNN_HID)    MGU forget-gate hidden part  (Wf[:, :H].T)
    #   wnh_ref  : (RNN_HID, RNN_HID)    MGU new-gate hidden part     (Wn[:, :H].T)
    #   wx_ref   : (FC_SZ, 2*RNN_HID)    [Wf_x.T | Wn_x.T]  (hoisted x-projection)
    #   w5_ref   : (RNN_HID, N_OUT)
    #   a1_ref   : (CNN_CHN, FLATM)      VMEM scratch: masked conv1 activation + margins
    #   p2_ref   : (72, FLAT)            VMEM scratch: conv2 im2col patches
    #   fc3in_ref: (N_IMG, C2*NPOS_P)    VMEM scratch: lane-dense fc3 input slab

    # ---- conv1 (3x3, pad 1) as one matmul over taps + ScaleReLU ---------------
    c1 = jnp.dot(w1_ref[...], p1_ref[...],
                 preferred_element_type=jnp.float32)                  # (8, FLAT)
    # clamp(0,1), then zero non-interior positions so conv2 sees true zero padding
    c1 = jnp.clip(c1, 0.0, 1.0) * mask_ref[...]
    a1_ref[:, :MARGIN] = jnp.zeros((CNN_CHN, MARGIN), jnp.float32)     # aligned 1-vreg
    a1_ref[:, MARGIN + FLAT:] = jnp.zeros((CNN_CHN, MARGIN), jnp.float32)
    a1_ref[:, MARGIN:MARGIN + FLAT] = c1                               # aligned store

    # ---- conv2 (3x3, pad 1): im2col into VMEM scratch, one matmul + ScaleReLU --
    for k, s in enumerate(SHIFTS):
        p2_ref[k * CNN_CHN:(k + 1) * CNN_CHN, :] = \
            a1_ref[:, MARGIN + s:MARGIN + s + FLAT]
    c2 = jnp.clip(
        jnp.dot(w2_ref[...], p2_ref[...], preferred_element_type=jnp.float32),
        0.0, 1.0)                                                      # (C2, FLAT)

    # ---- fc3 + ScaleReLU --------------------------------------------------------
    # Build the (N_IMG, C2*NPOS_P) lane-dense input slab: column c*256 + r holds
    # channel c at padded position r of each image.  Non-interior rows of w3 are zero,
    # so no interior gather / masked 16-lane copies are needed.
    # TODO(synk): nn.Dropout(p=0.5) is modeled as identity (inference mode).
    for c in range(C2):
        row = c2[c:c + 1, :]                                           # (1, FLAT)
        col = jnp.concatenate(
            [row[:, n * NPOS_P:(n + 1) * NPOS_P] for n in range(N_IMG)],
            axis=0)                                                    # (N_IMG, 256)
        fc3in_ref[:, c * NPOS_P:(c + 1) * NPOS_P] = col                # aligned store
    fc3_o = jnp.clip(
        jnp.dot(fc3in_ref[...], w3_ref[...], preferred_element_type=jnp.float32),
        0.0, 1.0)                                                      # (N_IMG, FC_SZ)

    # ---- HardMGU recurrence (hard=True, bias=False), x-projection hoisted -------
    xproj = jnp.dot(fc3_o, wx_ref[...],
                    preferred_element_type=jnp.float32)                # (N_IMG, 2H)
    hx = jnp.zeros((BATCH, RNN_HID), jnp.float32)
    for t in range(RNN_WIN):
        xf = xproj[t * BATCH:(t + 1) * BATCH, :RNN_HID]
        xn = xproj[t * BATCH:(t + 1) * BATCH, RNN_HID:]
        fg_in = jnp.dot(hx, wfh_ref[...], preferred_element_type=jnp.float32) + xf
        fg = jnp.clip(fg_in * 0.5 + 0.5, 0.0, 1.0)       # ScaleHardsigmoid(scale=3)
        fg_hx = fg * hx
        ng_in = jnp.dot(fg_hx, wnh_ref[...], preferred_element_type=jnp.float32) + xn
        ng = jnp.clip(ng_in, -1.0, 1.0)                  # Hardtanh
        hx = fg_hx + (0.0 - fg * ng) + ng                # == fg*hx + (1-fg)*ng

    # ---- fc5 + final Hardtanh ----------------------------------------------------
    out = jnp.dot(hx, w5_ref[...], preferred_element_type=jnp.float32)
    o_ref[...] = jnp.clip(out, -1.0, 1.0)


def _fused_call(p1, mask, w1m, w2m, w3p, wfh, wnh, wx, w5m):
    # Single invocation, no grid: all weights/activations stay VMEM-resident (~3 MiB).
    return pl.pallas_call(
        _fused_kernel,
        out_shape=jax.ShapeDtypeStruct((BATCH, N_OUT), jnp.float32),
        scratch_shapes=[
            pltpu.VMEM((CNN_CHN, FLATM), jnp.float32),       # masked conv1 activation
            pltpu.VMEM((K2, FLAT), jnp.float32),             # conv2 im2col patches
            pltpu.VMEM((N_IMG, C2 * NPOS_P), jnp.float32),   # fc3 input slab
        ],
    )(p1, mask, w1m, w2m, w3p, wfh, wnh, wx, w5m)


# -------------------- one-time parameter preparation --------------------
def prepare_params(p):
    """Hoisted weight layout transforms (done once, outside the forward)."""
    # conv1 (8,1,3,3) -> (8, 16): column = dy*3 + dx, columns 9..15 zero
    w1m = jnp.zeros((CNN_CHN, K1), jnp.float32)
    w1m = w1m.at[:, :KN * KN].set(p["w1"].reshape(CNN_CHN, KN * KN))
    # conv2 (16,8,3,3) -> (16, 72): column = (dy*3 + dx)*8 + cin
    w2m = jnp.transpose(p["w2"], (0, 2, 3, 1)).reshape(C2, K2)
    # fc3 (128, 1760), torch index j = c*110 + h*11 + w  ->  padded rows
    #   row = c*256 + (h+1)*13 + (w+1); all other rows (ring + lane padding) are zero.
    w3r = jnp.transpose(p["w3"].reshape(FC_SZ, C2, IN_H, IN_W), (1, 2, 3, 0))
    w3p = jnp.zeros((C2, HP, WP, FC_SZ), jnp.float32)
    w3p = w3p.at[:, PAD:PAD + IN_H, PAD:PAD + IN_W, :].set(w3r)
    w3p = jnp.pad(w3p.reshape(C2, NPOS, FC_SZ),
                  ((0, 0), (0, NPOS_P - NPOS), (0, 0))).reshape(C2 * NPOS_P, FC_SZ)
    # MGU gate weights, split into hidden and (hoisted) input projections
    wfh = p["wf"][:, :RNN_HID].T                       # (H, H)
    wnh = p["wn"][:, :RNN_HID].T                       # (H, H)
    wx = jnp.concatenate([p["wf"][:, RNN_HID:].T,
                          p["wn"][:, RNN_HID:].T], axis=1)   # (FC_SZ, 2H)
    w5m = p["w5"].T                                     # (H, N_OUT)
    # interior-position mask over the padded 256-lane image blocks, 8 sublanes wide
    m2 = jnp.zeros((HP, WP), jnp.float32).at[PAD:PAD + IN_H, PAD:PAD + IN_W].set(1.0)
    m_img = jnp.pad(m2.reshape(-1), (0, NPOS_P - NPOS))
    mask = jnp.tile(m_img, (CNN_CHN, N_IMG))            # (8, FLAT)
    return {"w1m": w1m, "w2m": w2m, "w3p": w3p, "wfh": wfh, "wnh": wnh,
            "wx": wx, "w5m": w5m, "mask": mask}


# -------------------- forward (thin wrapper: pads + builds conv1 tap patches) ----
def forward_pallas(x, pp):
    # t-major image order: image j = t*BATCH + b, so the MGU takes contiguous slices
    xi = jnp.transpose(x, (1, 0, 2, 3)).reshape(N_IMG, IN_H, IN_W)
    xg = jnp.pad(xi, ((0, 0), (PAD, PAD), (PAD, PAD))).reshape(N_IMG, NPOS)
    xg = jnp.pad(xg, ((0, 0), (0, NPOS_P - NPOS))).reshape(1, FLAT)
    xf = jnp.pad(xg, ((0, 0), (PM, PM)))                       # (1, FLAT + 2*PM)
    # conv1 tap patches (9 shifted copies + zero rows to 16); ~72 KB, built once in XLA
    p1 = jnp.concatenate(
        [xf[:, PM + s:PM + s + FLAT] for s in SHIFTS]
        + [jnp.zeros((K1 - KN * KN, FLAT), jnp.float32)], axis=0)   # (16, FLAT)
    return _fused_call(p1, pp["mask"], pp["w1m"], pp["w2m"], pp["w3p"],
                       pp["wfh"], pp["wnh"], pp["wx"], pp["w5m"])


# -------------------- pure-JAX reference (for correctness check) -------------
def forward_reference(x, p):
    batch, win, h, w = x.shape
    n = batch * win
    xi = x.reshape(n, 1, h, w)
    dn = ("NCHW", "OIHW", "NCHW")
    c1 = lax.conv_general_dilated(xi, p["w1"], (1, 1),
                                  ((PAD, PAD), (PAD, PAD)),
                                  dimension_numbers=dn)
    a1 = jnp.clip(c1, 0.0, 1.0)
    c2 = lax.conv_general_dilated(a1, p["w2"], (1, 1),
                                  ((PAD, PAD), (PAD, PAD)),
                                  dimension_numbers=dn)
    a2 = jnp.clip(c2, 0.0, 1.0)
    f3 = jnp.clip(a2.reshape(n, -1) @ p["w3"].T, 0.0, 1.0)
    seq = f3.reshape(batch, win, FC_SZ).transpose(1, 0, 2)
    hx = jnp.zeros((batch, RNN_HID), jnp.float32)
    for t in range(win):
        xt = seq[t]
        fg = jnp.clip(jnp.concatenate([hx, xt], 1) @ p["wf"].T * 0.5 + 0.5,
                      0.0, 1.0)
        fg_hx = fg * hx
        ng = jnp.clip(jnp.concatenate([fg_hx, xt], 1) @ p["wn"].T, -1.0, 1.0)
        hx = fg_hx + (0.0 - fg * ng) + ng
    return jnp.clip(hx @ p["w5"].T, -1.0, 1.0)


# -------------------- deterministic parameter init (PyTorch layouts) ---------
def init_params(seed=42):
    std = 0.05  # init_weight() for linear_act='scalerelu'
    ks = jax.random.split(jax.random.PRNGKey(seed), 6)

    def tn(k, shape, s):
        return s * jax.random.truncated_normal(k, -2.0, 2.0, shape, jnp.float32)

    return {
        "w1": tn(ks[0], (CNN_CHN, 1, KN, KN), std),
        "w2": tn(ks[1], (C2, CNN_CHN, KN, KN), std),
        "w3": tn(ks[2], (FC_SZ, FC3_IN), std),
        "w5": tn(ks[3], (N_OUT, RNN_HID), std),
        "wf": tn(ks[4], (RNN_HID, RNN_HID + FC_SZ), 1.0 / math.sqrt(RNN_HID)),
        "wn": tn(ks[5], (RNN_HID, RNN_HID + FC_SZ), 1.0 / math.sqrt(RNN_HID)),
    }


if __name__ == "__main__":
    params = init_params()
    prepped = prepare_params(params)          # one-time layout prep (hoisted)
    x = jax.random.normal(jax.random.PRNGKey(0),
                          (BATCH, RNN_WIN, IN_H, IN_W), jnp.float32)

    fwd = jax.jit(forward_pallas)
    out = jax.block_until_ready(fwd(x, prepped))

    ref = jax.block_until_ready(forward_reference(x, params))
    assert out.shape == (BATCH, N_OUT), out.shape
    assert jnp.allclose(out, ref, atol=2e-3, rtol=2e-3), (out, ref)

    print("KERNEL_OK")
</pallas_src>

<mosaic_0001>
module attributes {stable_mosaic.version = 11 : i64} {
  func.func @_fused_kernel(%arg0: memref<16x2048xf32, #tpu.memory_space<vmem>>, %arg1: memref<8x2048xf32, #tpu.memory_space<vmem>>, %arg2: memref<8x16xf32, #tpu.memory_space<vmem>>, %arg3: memref<16x72xf32, #tpu.memory_space<vmem>>, %arg4: memref<4096x128xf32, #tpu.memory_space<vmem>>, %arg5: memref<32x32xf32, #tpu.memory_space<vmem>>, %arg6: memref<32x32xf32, #tpu.memory_space<vmem>>, %arg7: memref<128x64xf32, #tpu.memory_space<vmem>>, %arg8: memref<32x7xf32, #tpu.memory_space<vmem>>, %arg9: memref<2x7xf32, #tpu.memory_space<vmem>>, %arg10: memref<8x2304xf32, #tpu.memory_space<vmem>>, %arg11: memref<72x2048xf32, #tpu.memory_space<vmem>>, %arg12: memref<8x4096xf32, #tpu.memory_space<vmem>>) attributes {dimension_semantics = [], scalar_prefetch = 0 : i64, scratch_operands = 3 : i64, tpu.core_type = #tpu.core_type<tc>} {
    %c0 = arith.constant 0 : index
    %c0_0 = arith.constant 0 : index
    %0 = vector.load %arg2[%c0, %c0_0] : memref<8x16xf32, #tpu.memory_space<vmem>>, vector<8x16xf32>
    %c0_1 = arith.constant 0 : index
    %c0_2 = arith.constant 0 : index
    %1 = vector.load %arg0[%c0_1, %c0_2] : memref<16x2048xf32, #tpu.memory_space<vmem>>, vector<16x2048xf32>
    %cst = arith.constant dense<0.000000e+00> : vector<8x2048xf32>
    %2 = tpu.matmul %0, %1, %cst {dimension_numbers = #tpu.dot_dimension_numbers<[1], [0], [0], [1], [0, 0, 1, 1], [], []>} : vector<8x16xf32>, vector<16x2048xf32>, vector<8x2048xf32> -> vector<8x2048xf32>
    %cst_3 = arith.constant 0.000000e+00 : f32
    %cst_4 = arith.constant 1.000000e+00 : f32
    %3 = vector.broadcast %cst_3 : f32 to vector<8x2048xf32>
    %4 = arith.maximumf %3, %2 : vector<8x2048xf32>
    %5 = vector.broadcast %cst_4 : f32 to vector<8x2048xf32>
    %6 = arith.minimumf %5, %4 : vector<8x2048xf32>
    %c0_5 = arith.constant 0 : index
    %c0_6 = arith.constant 0 : index
    %7 = vector.load %arg1[%c0_5, %c0_6] : memref<8x2048xf32, #tpu.memory_space<vmem>>, vector<8x2048xf32>
    %8 = arith.mulf %6, %7 : vector<8x2048xf32>
    %cst_7 = arith.constant 0.000000e+00 : f32
    %9 = vector.broadcast %cst_7 : f32 to vector<8x128xf32>
    %c0_8 = arith.constant 0 : index
    %c0_9 = arith.constant 0 : index
    %10 = vector.load %arg10[%c0_8, %c0_9] : memref<8x2304xf32, #tpu.memory_space<vmem>>, vector<8x128xf32>
    tpu.vector_store %arg10[%c0_8, %c0_9], %9 {strides = array<i32>} : memref<8x2304xf32, #tpu.memory_space<vmem>>, vector<8x128xf32>,
    %cst_10 = arith.constant 0.000000e+00 : f32
    %11 = vector.broadcast %cst_10 : f32 to vector<8x128xf32>
    %c0_11 = arith.constant 0 : index
    %c2176 = arith.constant 2176 : index
    %12 = vector.load %arg10[%c0_11, %c2176] : memref<8x2304xf32, #tpu.memory_space<vmem>>, vector<8x128xf32>
    tpu.vector_store %arg10[%c0_11, %c2176], %11 {strides = array<i32>} : memref<8x2304xf32, #tpu.memory_space<vmem>>, vector<8x128xf32>,
    %c0_12 = arith.constant 0 : index
    %c128 = arith.constant 128 : index
    %13 = vector.load %arg10[%c0_12, %c128] : memref<8x2304xf32, #tpu.memory_space<vmem>>, vector<8x2048xf32>
    tpu.vector_store %arg10[%c0_12, %c128], %8 {strides = array<i32>} : memref<8x2304xf32, #tpu.memory_space<vmem>>, vector<8x2048xf32>,
    %c0_13 = arith.constant 0 : index
    %c114 = arith.constant 114 : index
    %14 = vector.load %arg10[%c0_13, %c114] : memref<8x2304xf32, #tpu.memory_space<vmem>>, vector<8x2048xf32>
    %c0_14 = arith.constant 0 : index
    %c0_15 = arith.constant 0 : index
    %15 = vector.load %arg11[%c0_14, %c0_15] : memref<72x2048xf32, #tpu.memory_space<vmem>>, vector<8x2048xf32>
    tpu.vector_store %arg11[%c0_14, %c0_15], %14 {strides = array<i32>} : memref<72x2048xf32, #tpu.memory_space<vmem>>, vector<8x2048xf32>,
    %c0_16 = arith.constant 0 : index
    %c115 = arith.constant 115 : index
    %16 = vector.load %arg10[%c0_16, %c115] : memref<8x2304xf32, #tpu.memory_space<vmem>>, vector<8x2048xf32>
    %c8 = arith.constant 8 : index
    %c0_17 = arith.constant 0 : index
    %17 = vector.load %arg11[%c8, %c0_17] : memref<72x2048xf32, #tpu.memory_space<vmem>>, vector<8x2048xf32>
    tpu.vector_store %arg11[%c8, %c0_17], %16 {strides = array<i32>} : memref<72x2048xf32, #tpu.memory_space<vmem>>, vector<8x2048xf32>,
    %c0_18 = arith.constant 0 : index
    %c116 = arith.constant 116 : index
    %18 = vector.load %arg10[%c0_18, %c116] : memref<8x2304xf32, #tpu.memory_space<vmem>>, vector<8x2048xf32>
    %c16 = arith.constant 16 : index
    %c0_19 = arith.constant 0 : index
    %19 = vector.load %arg11[%c16, %c0_19] : memref<72x2048xf32, #tpu.memory_space<vmem>>, vector<8x2048xf32>
    tpu.vector_store %arg11[%c16, %c0_19], %18 {strides = array<i32>} : memref<72x2048xf32, #tpu.memory_space<vmem>>, vector<8x2048xf32>,
    %c0_20 = arith.constant 0 : index
    %c127 = arith.constant 127 : index
    %20 = vector.load %arg10[%c0_20, %c127] : memref<8x2304xf32, #tpu.memory_space<vmem>>, vector<8x2048xf32>
    %c24 = arith.constant 24 : index
    %c0_21 = arith.constant 0 : index
    %21 = vector.load %arg11[%c24, %c0_21] : memref<72x2048xf32, #tpu.memory_space<vmem>>, vector<8x2048xf32>
    tpu.vector_store %arg11[%c24, %c0_21], %20 {strides = array<i32>} : memref<72x2048xf32, #tpu.memory_space<vmem>>, vector<8x2048xf32>,
    %c0_22 = arith.constant 0 : index
    %c128_23 = arith.constant 128 : index
    %22 = vector.load %arg10[%c0_22, %c128_23] : memref<8x2304xf32, #tpu.memory_space<vmem>>, vector<8x2048xf32>
    %c32 = arith.constant 32 : index
    %c0_24 = arith.constant 0 : index
    %23 = vector.load %arg11[%c32, %c0_24] : memref<72x2048xf32, #tpu.memory_space<vmem>>, vector<8x2048xf32>
    tpu.vector_store %arg11[%c32, %c0_24], %22 {strides = array<i32>} : memref<72x2048xf32, #tpu.memory_space<vmem>>, vector<8x2048xf32>,
    %c0_25 = arith.constant 0 : index
    %c129 = arith.constant 129 : index
    %24 = vector.load %arg10[%c0_25, %c129] : memref<8x2304xf32, #tpu.memory_space<vmem>>, vector<8x2048xf32>
    %c40 = arith.constant 40 : index
    %c0_26 = arith.constant 0 : index
    %25 = vector.load %arg11[%c40, %c0_26] : memref<72x2048xf32, #tpu.memory_space<vmem>>, vector<8x2048xf32>
    tpu.vector_store %arg11[%c40, %c0_26], %24 {strides = array<i32>} : memref<72x2048xf32, #tpu.memory_space<vmem>>, vector<8x2048xf32>,
    %c0_27 = arith.constant 0 : index
    %c140 = arith.constant 140 : index
    %26 = vector.load %arg10[%c0_27, %c140] : memref<8x2304xf32, #tpu.memory_space<vmem>>, vector<8x2048xf32>
    %c48 = arith.constant 48 : index
    %c0_28 = arith.constant 0 : index
    %27 = vector.load %arg11[%c48, %c0_28] : memref<72x2048xf32, #tpu.memory_space<vmem>>, vector<8x2048xf32>
    tpu.vector_store %arg11[%c48, %c0_28], %26 {strides = array<i32>} : memref<72x2048xf32, #tpu.memory_space<vmem>>, vector<8x2048xf32>,
    %c0_29 = arith.constant 0 : index
    %c141 = arith.constant 141 : index
    %28 = vector.load %arg10[%c0_29, %c141] : memref<8x2304xf32, #tpu.memory_space<vmem>>, vector<8x2048xf32>
    %c56 = arith.constant 56 : index
    %c0_30 = arith.constant 0 : index
    %29 = vector.load %arg11[%c56, %c0_30] : memref<72x2048xf32, #tpu.memory_space<vmem>>, vector<8x2048xf32>
    tpu.vector_store %arg11[%c56, %c0_30], %28 {strides = array<i32>} : memref<72x2048xf32, #tpu.memory_space<vmem>>, vector<8x2048xf32>,
    %c0_31 = arith.constant 0 : index
    %c142 = arith.constant 142 : index
    %30 = vector.load %arg10[%c0_31, %c142] : memref<8x2304xf32, #tpu.memory_space<vmem>>, vector<8x2048xf32>
    %c64 = arith.constant 64 : index
    %c0_32 = arith.constant 0 : index
    %31 = vector.load %arg11[%c64, %c0_32] : memref<72x2048xf32, #tpu.memory_space<vmem>>, vector<8x2048xf32>
    tpu.vector_store %arg11[%c64, %c0_32], %30 {strides = array<i32>} : memref<72x2048xf32, #tpu.memory_space<vmem>>, vector<8x2048xf32>,
    %c0_33 = arith.constant 0 : index
    %c0_34 = arith.constant 0 : index
    %32 = vector.load %arg3[%c0_33, %c0_34] : memref<16x72xf32, #tpu.memory_space<vmem>>, vector<16x72xf32>
    %c0_35 = arith.constant 0 : index
    %c0_36 = arith.constant 0 : index
    %33 = vector.load %arg11[%c0_35, %c0_36] : memref<72x2048xf32, #tpu.memory_space<vmem>>, vector<72x2048xf32>
    %cst_37 = arith.constant dense<0.000000e+00> : vector<16x2048xf32>
    %34 = tpu.matmul %32, %33, %cst_37 {dimension_numbers = #tpu.dot_dimension_numbers<[1], [0], [0], [1], [0, 0, 1, 1], [], []>} : vector<16x72xf32>, vector<72x2048xf32>, vector<16x2048xf32> -> vector<16x2048xf32>
    %cst_38 = arith.constant 0.000000e+00 : f32
    %cst_39 = arith.constant 1.000000e+00 : f32
    %35 = vector.broadcast %cst_38 : f32 to vector<16x2048xf32>
    %36 = arith.maximumf %35, %34 : vector<16x2048xf32>
    %37 = vector.broadcast %cst_39 : f32 to vector<16x2048xf32>
    %38 = arith.minimumf %37, %36 : vector<16x2048xf32>
    %39 = vector.extract_strided_slice %38 {offsets = [0, 0], sizes = [1, 2048], strides = [1, 1]} : vector<16x2048xf32> to vector<1x2048xf32>
    %40 = vector.extract_strided_slice %39 {offsets = [0, 0], sizes = [1, 256], strides = [1, 1]} : vector<1x2048xf32> to vector<1x256xf32>
    %41 = vector.extract_strided_slice %39 {offsets = [0, 256], sizes = [1, 256], strides = [1, 1]} : vector<1x2048xf32> to vector<1x256xf32>
    %42 = vector.extract_strided_slice %39 {offsets = [0, 512], sizes = [1, 256], strides = [1, 1]} : vector<1x2048xf32> to vector<1x256xf32>
    %43 = vector.extract_strided_slice %39 {offsets = [0, 768], sizes = [1, 256], strides = [1, 1]} : vector<1x2048xf32> to vector<1x256xf32>
    %44 = vector.extract_strided_slice %39 {offsets = [0, 1024], sizes = [1, 256], strides = [1, 1]} : vector<1x2048xf32> to vector<1x256xf32>
    %45 = vector.extract_strided_slice %39 {offsets = [0, 1280], sizes = [1, 256], strides = [1, 1]} : vector<1x2048xf32> to vector<1x256xf32>
    %46 = vector.extract_strided_slice %39 {offsets = [0, 1536], sizes = [1, 256], strides = [1, 1]} : vector<1x2048xf32> to vector<1x256xf32>
    %47 = vector.extract_strided_slice %39 {offsets = [0, 1792], sizes = [1, 256], strides = [1, 1]} : vector<1x2048xf32> to vector<1x256xf32>
    %48 = tpu.concatenate %40, %41, %42, %43, %44, %45, %46, %47 in 0 : vector<1x256xf32>, vector<1x256xf32>, vector<1x256xf32>, vector<1x256xf32>, vector<1x256xf32>, vector<1x256xf32>, vector<1x256xf32>, vector<1x256xf32> -> vector<8x256xf32>
    %c0_40 = arith.constant 0 : index
    %c0_41 = arith.constant 0 : index
    %49 = vector.load %arg12[%c0_40, %c0_41] : memref<8x4096xf32, #tpu.memory_space<vmem>>, vector<8x256xf32>
    tpu.vector_store %arg12[%c0_40, %c0_41], %48 {strides = array<i32>} : memref<8x4096xf32, #tpu.memory_space<vmem>>, vector<8x256xf32>,
    %50 = vector.extract_strided_slice %38 {offsets = [1, 0], sizes = [1, 2048], strides = [1, 1]} : vector<16x2048xf32> to vector<1x2048xf32>
    %51 = vector.extract_strided_slice %50 {offsets = [0, 0], sizes = [1, 256], strides = [1, 1]} : vector<1x2048xf32> to vector<1x256xf32>
    %52 = vector.extract_strided_slice %50 {offsets = [0, 256], sizes = [1, 256], strides = [1, 1]} : vector<1x2048xf32> to vector<1x256xf32>
    %53 = vector.extract_strided_slice %50 {offsets = [0, 512], sizes = [1, 256], strides = [1, 1]} : vector<1x2048xf32> to vector<1x256xf32>
    %54 = vector.extract_strided_slice %50 {offsets = [0, 768], sizes = [1, 256], strides = [1, 1]} : vector<1x2048xf32> to vector<1x256xf32>
    %55 = vector.extract_strided_slice %50 {offsets = [0, 1024], sizes = [1, 256], strides = [1, 1]} : vector<1x2048xf32> to vector<1x256xf32>
    %56 = vector.extract_strided_slice %50 {offsets = [0, 1280], sizes = [1, 256], strides = [1, 1]} : vector<1x2048xf32> to vector<1x256xf32>
    %57 = vector.extract_strided_slice %50 {offsets = [0, 1536], sizes = [1, 256], strides = [1, 1]} : vector<1x2048xf32> to vector<1x256xf32>
    %58 = vector.extract_strided_slice %50 {offsets = [0, 1792], sizes = [1, 256], strides = [1, 1]} : vector<1x2048xf32> to vector<1x256xf32>
    %59 = tpu.concatenate %51, %52, %53, %54, %55, %56, %57, %58 in 0 : vector<1x256xf32>, vector<1x256xf32>, vector<1x256xf32>, vector<1x256xf32>, vector<1x256xf32>, vector<1x256xf32>, vector<1x256xf32>, vector<1x256xf32> -> vector<8x256xf32>
    %c0_42 = arith.constant 0 : index
    %c256 = arith.constant 256 : index
    %60 = vector.load %arg12[%c0_42, %c256] : memref<8x4096xf32, #tpu.memory_space<vmem>>, vector<8x256xf32>
    tpu.vector_store %arg12[%c0_42, %c256], %59 {strides = array<i32>} : memref<8x4096xf32, #tpu.memory_space<vmem>>, vector<8x256xf32>,
    %61 = vector.extract_strided_slice %38 {offsets = [2, 0], sizes = [1, 2048], strides = [1, 1]} : vector<16x2048xf32> to vector<1x2048xf32>
    %62 = vector.extract_strided_slice %61 {offsets = [0, 0], sizes = [1, 256], strides = [1, 1]} : vector<1x2048xf32> to vector<1x256xf32>
    %63 = vector.extract_strided_slice %61 {offsets = [0, 256], sizes = [1, 256], strides = [1, 1]} : vector<1x2048xf32> to vector<1x256xf32>
    %64 = vector.extract_strided_slice %61 {offsets = [0, 512], sizes = [1, 256], strides = [1, 1]} : vector<1x2048xf32> to vector<1x256xf32>
    %65 = vector.extract_strided_slice %61 {offsets = [0, 768], sizes = [1, 256], strides = [1, 1]} : vector<1x2048xf32> to vector<1x256xf32>
    %66 = vector.extract_strided_slice %61 {offsets = [0, 1024], sizes = [1, 256], strides = [1, 1]} : vector<1x2048xf32> to vector<1x256xf32>
    %67 = vector.extract_strided_slice %61 {offsets = [0, 1280], sizes = [1, 256], strides = [1, 1]} : vector<1x2048xf32> to vector<1x256xf32>
    %68 = vector.extract_strided_slice %61 {offsets = [0, 1536], sizes = [1, 256], strides = [1, 1]} : vector<1x2048xf32> to vector<1x256xf32>
    %69 = vector.extract_strided_slice %61 {offsets = [0, 1792], sizes = [1, 256], strides = [1, 1]} : vector<1x2048xf32> to vector<1x256xf32>
    %70 = tpu.concatenate %62, %63, %64, %65, %66, %67, %68, %69 in 0 : vector<1x256xf32>, vector<1x256xf32>, vector<1x256xf32>, vector<1x256xf32>, vector<1x256xf32>, vector<1x256xf32>, vector<1x256xf32>, vector<1x256xf32> -> vector<8x256xf32>
    %c0_43 = arith.constant 0 : index
    %c512 = arith.constant 512 : index
    %71 = vector.load %arg12[%c0_43, %c512] : memref<8x4096xf32, #tpu.memory_space<vmem>>, vector<8x256xf32>
    tpu.vector_store %arg12[%c0_43, %c512], %70 {strides = array<i32>} : memref<8x4096xf32, #tpu.memory_space<vmem>>, vector<8x256xf32>,
    %72 = vector.extract_strided_slice %38 {offsets = [3, 0], sizes = [1, 2048], strides = [1, 1]} : vector<16x2048xf32> to vector<1x2048xf32>
    %73 = vector.extract_strided_slice %72 {offsets = [0, 0], sizes = [1, 256], strides = [1, 1]} : vector<1x2048xf32> to vector<1x256xf32>
    %74 = vector.extract_strided_slice %72 {offsets = [0, 256], sizes = [1, 256], strides = [1, 1]} : vector<1x2048xf32> to vector<1x256xf32>
    %75 = vector.extract_strided_slice %72 {offsets = [0, 512], sizes = [1, 256], strides = [1, 1]} : vector<1x2048xf32> to vector<1x256xf32>
    %76 = vector.extract_strided_slice %72 {offsets = [0, 768], sizes = [1, 256], strides = [1, 1]} : vector<1x2048xf32> to vector<1x256xf32>
    %77 = vector.extract_strided_slice %72 {offsets = [0, 1024], sizes = [1, 256], strides = [1, 1]} : vector<1x2048xf32> to vector<1x256xf32>
    %78 = vector.extract_strided_slice %72 {offsets = [0, 1280], sizes = [1, 256], strides = [1, 1]} : vector<1x2048xf32> to vector<1x256xf32>
    %79 = vector.extract_strided_slice %72 {offsets = [0, 1536], sizes = [1, 256], strides = [1, 1]} : vector<1x2048xf32> to vector<1x256xf32>
    %80 = vector.extract_strided_slice %72 {offsets = [0, 1792], sizes = [1, 256], strides = [1, 1]} : vector<1x2048xf32> to vector<1x256xf32>
    %81 = tpu.concatenate %73, %74, %75, %76, %77, %78, %79, %80 in 0 : vector<1x256xf32>, vector<1x256xf32>, vector<1x256xf32>, vector<1x256xf32>, vector<1x256xf32>, vector<1x256xf32>, vector<1x256xf32>, vector<1x256xf32> -> vector<8x256xf32>
    %c0_44 = arith.constant 0 : index
    %c768 = arith.constant 768 : index
    %82 = vector.load %arg12[%c0_44, %c768] : memref<8x4096xf32, #tpu.memory_space<vmem>>, vector<8x256xf32>
    tpu.vector_store %arg12[%c0_44, %c768], %81 {strides = array<i32>} : memref<8x4096xf32, #tpu.memory_space<vmem>>, vector<8x256xf32>,
    %83 = vector.extract_strided_slice %38 {offsets = [4, 0], sizes = [1, 2048], strides = [1, 1]} : vector<16x2048xf32> to vector<1x2048xf32>
    %84 = vector.extract_strided_slice %83 {offsets = [0, 0], sizes = [1, 256], strides = [1, 1]} : vector<1x2048xf32> to vector<1x256xf32>
    %85 = vector.extract_strided_slice %83 {offsets = [0, 256], sizes = [1, 256], strides = [1, 1]} : vector<1x2048xf32> to vector<1x256xf32>
    %86 = vector.extract_strided_slice %83 {offsets = [0, 512], sizes = [1, 256], strides = [1, 1]} : vector<1x2048xf32> to vector<1x256xf32>
    %87 = vector.extract_strided_slice %83 {offsets = [0, 768], sizes = [1, 256], strides = [1, 1]} : vector<1x2048xf32> to vector<1x256xf32>
    %88 = vector.extract_strided_slice %83 {offsets = [0, 1024], sizes = [1, 256], strides = [1, 1]} : vector<1x2048xf32> to vector<1x256xf32>
    %89 = vector.extract_strided_slice %83 {offsets = [0, 1280], sizes = [1, 256], strides = [1, 1]} : vector<1x2048xf32> to vector<1x256xf32>
    %90 = vector.extract_strided_slice %83 {offsets = [0, 1536], sizes = [1, 256], strides = [1, 1]} : vector<1x2048xf32> to vector<1x256xf32>
    %91 = vector.extract_strided_slice %83 {offsets = [0, 1792], sizes = [1, 256], strides = [1, 1]} : vector<1x2048xf32> to vector<1x256xf32>
    %92 = tpu.concatenate %84, %85, %86, %87, %88, %89, %90, %91 in 0 : vector<1x256xf32>, vector<1x256xf32>, vector<1x256xf32>, vector<1x256xf32>, vector<1x256xf32>, vector<1x256xf32>, vector<1x256xf32>, vector<1x256xf32> -> vector<8x256xf32>
    %c0_45 = arith.constant 0 : index
    %c1024 = arith.constant 1024 : index
    %93 = vector.load %arg12[%c0_45, %c1024] : memref<8x4096xf32, #tpu.memory_space<vmem>>, vector<8x256xf32>
    tpu.vector_store %arg12[%c0_45, %c1024], %92 {strides = array<i32>} : memref<8x4096xf32, #tpu.memory_space<vmem>>, vector<8x256xf32>,
    %94 = vector.extract_strided_slice %38 {offsets = [5, 0], sizes = [1, 2048], strides = [1, 1]} : vector<16x2048xf32> to vector<1x2048xf32>
    %95 = vector.extract_strided_slice %94 {offsets = [0, 0], sizes = [1, 256], strides = [1, 1]} : vector<1x2048xf32> to vector<1x256xf32>
    %96 = vector.extract_strided_slice %94 {offsets = [0, 256], sizes = [1, 256], strides = [1, 1]} : vector<1x2048xf32> to vector<1x256xf32>
    %97 = vector.extract_strided_slice %94 {offsets = [0, 512], sizes = [1, 256], strides = [1, 1]} : vector<1x2048xf32> to vector<1x256xf32>
    %98 = vector.extract_strided_slice %94 {offsets = [0, 768], sizes = [1, 256], strides = [1, 1]} : vector<1x2048xf32> to vector<1x256xf32>
    %99 = vector.extract_strided_slice %94 {offsets = [0, 1024], sizes = [1, 256], strides = [1, 1]} : vector<1x2048xf32> to vector<1x256xf32>
    %100 = vector.extract_strided_slice %94 {offsets = [0, 1280], sizes = [1, 256], strides = [1, 1]} : vector<1x2048xf32> to vector<1x256xf32>
    %101 = vector.extract_strided_slice %94 {offsets = [0, 1536], sizes = [1, 256], strides = [1, 1]} : vector<1x2048xf32> to vector<1x256xf32>
    %102 = vector.extract_strided_slice %94 {offsets = [0, 1792], sizes = [1, 256], strides = [1, 1]} : vector<1x2048xf32> to vector<1x256xf32>
    %103 = tpu.concatenate %95, %96, %97, %98, %99, %100, %101, %102 in 0 : vector<1x256xf32>, vector<1x256xf32>, vector<1x256xf32>, vector<1x256xf32>, vector<1x256xf32>, vector<1x256xf32>, vector<1x256xf32>, vector<1x256xf32> -> vector<8x256xf32>
    %c0_46 = arith.constant 0 : index
    %c1280 = arith.constant 1280 : index
    %104 = vector.load %arg12[%c0_46, %c1280] : memref<8x4096xf32, #tpu.memory_space<vmem>>, vector<8x256xf32>
    tpu.vector_store %arg12[%c0_46, %c1280], %103 {strides = array<i32>} : memref<8x4096xf32, #tpu.memory_space<vmem>>, vector<8x256xf32>,
    %105 = vector.extract_strided_slice %38 {offsets = [6, 0], sizes = [1, 2048], strides = [1, 1]} : vector<16x2048xf32> to vector<1x2048xf32>
    %106 = vector.extract_strided_slice %105 {offsets = [0, 0], sizes = [1, 256], strides = [1, 1]} : vector<1x2048xf32> to vector<1x256xf32>
    %107 = vector.extract_strided_slice %105 {offsets = [0, 256], sizes = [1, 256], strides = [1, 1]} : vector<1x2048xf32> to vector<1x256xf32>
    %108 = vector.extract_strided_slice %105 {offsets = [0, 512], sizes = [1, 256], strides = [1, 1]} : vector<1x2048xf32> to vector<1x256xf32>
    %109 = vector.extract_strided_slice %105 {offsets = [0, 768], sizes = [1, 256], strides = [1, 1]} : vector<1x2048xf32> to vector<1x256xf32>
    %110 = vector.extract_strided_slice %105 {offsets = [0, 1024], sizes = [1, 256], strides = [1, 1]} : vector<1x2048xf32> to vector<1x256xf32>
    %111 = vector.extract_strided_slice %105 {offsets = [0, 1280], sizes = [1, 256], strides = [1, 1]} : vector<1x2048xf32> to vector<1x256xf32>
    %112 = vector.extract_strided_slice %105 {offsets = [0, 1536], sizes = [1, 256], strides = [1, 1]} : vector<1x2048xf32> to vector<1x256xf32>
    %113 = vector.extract_strided_slice %105 {offsets = [0, 1792], sizes = [1, 256], strides = [1, 1]} : vector<1x2048xf32> to vector<1x256xf32>
    %114 = tpu.concatenate %106, %107, %108, %109, %110, %111, %112, %113 in 0 : vector<1x256xf32>, vector<1x256xf32>, vector<1x256xf32>, vector<1x256xf32>, vector<1x256xf32>, vector<1x256xf32>, vector<1x256xf32>, vector<1x256xf32> -> vector<8x256xf32>
    %c0_47 = arith.constant 0 : index
    %c1536 = arith.constant 1536 : index
    %115 = vector.load %arg12[%c0_47, %c1536] : memref<8x4096xf32, #tpu.memory_space<vmem>>, vector<8x256xf32>
    tpu.vector_store %arg12[%c0_47, %c1536], %114 {strides = array<i32>} : memref<8x4096xf32, #tpu.memory_space<vmem>>, vector<8x256xf32>,
    %116 = vector.extract_strided_slice %38 {offsets = [7, 0], sizes = [1, 2048], strides = [1, 1]} : vector<16x2048xf32> to vector<1x2048xf32>
    %117 = vector.extract_strided_slice %116 {offsets = [0, 0], sizes = [1, 256], strides = [1, 1]} : vector<1x2048xf32> to vector<1x256xf32>
    %118 = vector.extract_strided_slice %116 {offsets = [0, 256], sizes = [1, 256], strides = [1, 1]} : vector<1x2048xf32> to vector<1x256xf32>
    %119 = vector.extract_strided_slice %116 {offsets = [0, 512], sizes = [1, 256], strides = [1, 1]} : vector<1x2048xf32> to vector<1x256xf32>
    %120 = vector.extract_strided_slice %116 {offsets = [0, 768], sizes = [1, 256], strides = [1, 1]} : vector<1x2048xf32> to vector<1x256xf32>
    %121 = vector.extract_strided_slice %116 {offsets = [0, 1024], sizes = [1, 256], strides = [1, 1]} : vector<1x2048xf32> to vector<1x256xf32>
    %122 = vector.extract_strided_slice %116 {offsets = [0, 1280], sizes = [1, 256], strides = [1, 1]} : vector<1x2048xf32> to vector<1x256xf32>
    %123 = vector.extract_strided_slice %116 {offsets = [0, 1536], sizes = [1, 256], strides = [1, 1]} : vector<1x2048xf32> to vector<1x256xf32>
    %124 = vector.extract_strided_slice %116 {offsets = [0, 1792], sizes = [1, 256], strides = [1, 1]} : vector<1x2048xf32> to vector<1x256xf32>
    %125 = tpu.concatenate %117, %118, %119, %120, %121, %122, %123, %124 in 0 : vector<1x256xf32>, vector<1x256xf32>, vector<1x256xf32>, vector<1x256xf32>, vector<1x256xf32>, vector<1x256xf32>, vector<1x256xf32>, vector<1x256xf32> -> vector<8x256xf32>
    %c0_48 = arith.constant 0 : index
    %c1792 = arith.constant 1792 : index
    %126 = vector.load %arg12[%c0_48, %c1792] : memref<8x4096xf32, #tpu.memory_space<vmem>>, vector<8x256xf32>
    tpu.vector_store %arg12[%c0_48, %c1792], %125 {strides = array<i32>} : memref<8x4096xf32, #tpu.memory_space<vmem>>, vector<8x256xf32>,
    %127 = vector.extract_strided_slice %38 {offsets = [8, 0], sizes = [1, 2048], strides = [1, 1]} : vector<16x2048xf32> to vector<1x2048xf32>
    %128 = vector.extract_strided_slice %127 {offsets = [0, 0], sizes = [1, 256], strides = [1, 1]} : vector<1x2048xf32> to vector<1x256xf32>
    %129 = vector.extract_strided_slice %127 {offsets = [0, 256], sizes = [1, 256], strides = [1, 1]} : vector<1x2048xf32> to vector<1x256xf32>
    %130 = vector.extract_strided_slice %127 {offsets = [0, 512], sizes = [1, 256], strides = [1, 1]} : vector<1x2048xf32> to vector<1x256xf32>
    %131 = vector.extract_strided_slice %127 {offsets = [0, 768], sizes = [1, 256], strides = [1, 1]} : vector<1x2048xf32> to vector<1x256xf32>
    %132 = vector.extract_strided_slice %127 {offsets = [0, 1024], sizes = [1, 256], strides = [1, 1]} : vector<1x2048xf32> to vector<1x256xf32>
    %133 = vector.extract_strided_slice %127 {offsets = [0, 1280], sizes = [1, 256], strides = [1, 1]} : vector<1x2048xf32> to vector<1x256xf32>
    %134 = vector.extract_strided_slice %127 {offsets = [0, 1536], sizes = [1, 256], strides = [1, 1]} : vector<1x2048xf32> to vector<1x256xf32>
    %135 = vector.extract_strided_slice %127 {offsets = [0, 1792], sizes = [1, 256], strides = [1, 1]} : vector<1x2048xf32> to vector<1x256xf32>
    %136 = tpu.concatenate %128, %129, %130, %131, %132, %133, %134, %135 in 0 : vector<1x256xf32>, vector<1x256xf32>, vector<1x256xf32>, vector<1x256xf32>, vector<1x256xf32>, vector<1x256xf32>, vector<1x256xf32>, vector<1x256xf32> -> vector<8x256xf32>
    %c0_49 = arith.constant 0 : index
    %c2048 = arith.constant 2048 : index
    %137 = vector.load %arg12[%c0_49, %c2048] : memref<8x4096xf32, #tpu.memory_space<vmem>>, vector<8x256xf32>
    tpu.vector_store %arg12[%c0_49, %c2048], %136 {strides = array<i32>} : memref<8x4096xf32, #tpu.memory_space<vmem>>, vector<8x256xf32>,
    %138 = vector.extract_strided_slice %38 {offsets = [9, 0], sizes = [1, 2048], strides = [1, 1]} : vector<16x2048xf32> to vector<1x2048xf32>
    %139 = vector.extract_strided_slice %138 {offsets = [0, 0], sizes = [1, 256], strides = [1, 1]} : vector<1x2048xf32> to vector<1x256xf32>
    %140 = vector.extract_strided_slice %138 {offsets = [0, 256], sizes = [1, 256], strides = [1, 1]} : vector<1x2048xf32> to vector<1x256xf32>
    %141 = vector.extract_strided_slice %138 {offsets = [0, 512], sizes = [1, 256], strides = [1, 1]} : vector<1x2048xf32> to vector<1x256xf32>
    %142 = vector.extract_strided_slice %138 {offsets = [0, 768], sizes = [1, 256], strides = [1, 1]} : vector<1x2048xf32> to vector<1x256xf32>
    %143 = vector.extract_strided_slice %138 {offsets = [0, 1024], sizes = [1, 256], strides = [1, 1]} : vector<1x2048xf32> to vector<1x256xf32>
    %144 = vector.extract_strided_slice %138 {offsets = [0, 1280], sizes = [1, 256], strides = [1, 1]} : vector<1x2048xf32> to vector<1x256xf32>
    %145 = vector.extract_strided_slice %138 {offsets = [0, 1536], sizes = [1, 256], strides = [1, 1]} : vector<1x2048xf32> to vector<1x256xf32>
    %146 = vector.extract_strided_slice %138 {offsets = [0, 1792], sizes = [1, 256], strides = [1, 1]} : vector<1x2048xf32> to vector<1x256xf32>
    %147 = tpu.concatenate %139, %140, %141, %142, %143, %144, %145, %146 in 0 : vector<1x256xf32>, vector<1x256xf32>, vector<1x256xf32>, vector<1x256xf32>, vector<1x256xf32>, vector<1x256xf32>, vector<1x256xf32>, vector<1x256xf32> -> vector<8x256xf32>
    %c0_50 = arith.constant 0 : index
    %c2304 = arith.constant 2304 : index
    %148 = vector.load %arg12[%c0_50, %c2304] : memref<8x4096xf32, #tpu.memory_space<vmem>>, vector<8x256xf32>
    tpu.vector_store %arg12[%c0_50, %c2304], %147 {strides = array<i32>} : memref<8x4096xf32, #tpu.memory_space<vmem>>, vector<8x256xf32>,
    %149 = vector.extract_strided_slice %38 {offsets = [10, 0], sizes = [1, 2048], strides = [1, 1]} : vector<16x2048xf32> to vector<1x2048xf32>
    %150 = vector.extract_strided_slice %149 {offsets = [0, 0], sizes = [1, 256], strides = [1, 1]} : vector<1x2048xf32> to vector<1x256xf32>
    %151 = vector.extract_strided_slice %149 {offsets = [0, 256], sizes = [1, 256], strides = [1, 1]} : vector<1x2048xf32> to vector<1x256xf32>
    %152 = vector.extract_strided_slice %149 {offsets = [0, 512], sizes = [1, 256], strides = [1, 1]} : vector<1x2048xf32> to vector<1x256xf32>
    %153 = vector.extract_strided_slice %149 {offsets = [0, 768], sizes = [1, 256], strides = [1, 1]} : vector<1x2048xf32> to vector<1x256xf32>
    %154 = vector.extract_strided_slice %149 {offsets = [0, 1024], sizes = [1, 256], strides = [1, 1]} : vector<1x2048xf32> to vector<1x256xf32>
    %155 = vector.extract_strided_slice %149 {offsets = [0, 1280], sizes = [1, 256], strides = [1, 1]} : vector<1x2048xf32> to vector<1x256xf32>
    %156 = vector.extract_strided_slice %149 {offsets = [0, 1536], sizes = [1, 256], strides = [1, 1]} : vector<1x2048xf32> to vector<1x256xf32>
    %157 = vector.extract_strided_slice %149 {offsets = [0, 1792], sizes = [1, 256], strides = [1, 1]} : vector<1x2048xf32> to vector<1x256xf32>
    %158 = tpu.concatenate %150, %151, %152, %153, %154, %155, %156, %157 in 0 : vector<1x256xf32>, vector<1x256xf32>, vector<1x256xf32>, vector<1x256xf32>, vector<1x256xf32>, vector<1x256xf32>, vector<1x256xf32>, vector<1x256xf32> -> vector<8x256xf32>
    %c0_51 = arith.constant 0 : index
    %c2560 = arith.constant 2560 : index
    %159 = vector.load %arg12[%c0_51, %c2560] : memref<8x4096xf32, #tpu.memory_space<vmem>>, vector<8x256xf32>
    tpu.vector_store %arg12[%c0_51, %c2560], %158 {strides = array<i32>} : memref<8x4096xf32, #tpu.memory_space<vmem>>, vector<8x256xf32>,
    %160 = vector.extract_strided_slice %38 {offsets = [11, 0], sizes = [1, 2048], strides = [1, 1]} : vector<16x2048xf32> to vector<1x2048xf32>
    %161 = vector.extract_strided_slice %160 {offsets = [0, 0], sizes = [1, 256], strides = [1, 1]} : vector<1x2048xf32> to vector<1x256xf32>
    %162 = vector.extract_strided_slice %160 {offsets = [0, 256], sizes = [1, 256], strides = [1, 1]} : vector<1x2048xf32> to vector<1x256xf32>
    %163 = vector.extract_strided_slice %160 {offsets = [0, 512], sizes = [1, 256], strides = [1, 1]} : vector<1x2048xf32> to vector<1x256xf32>
    %164 = vector.extract_strided_slice %160 {offsets = [0, 768], sizes = [1, 256], strides = [1, 1]} : vector<1x2048xf32> to vector<1x256xf32>
    %165 = vector.extract_strided_slice %160 {offsets = [0, 1024], sizes = [1, 256], strides = [1, 1]} : vector<1x2048xf32> to vector<1x256xf32>
    %166 = vector.extract_strided_slice %160 {offsets = [0, 1280], sizes = [1, 256], strides = [1, 1]} : vector<1x2048xf32> to vector<1x256xf32>
    %167 = vector.extract_strided_slice %160 {offsets = [0, 1536], sizes = [1, 256], strides = [1, 1]} : vector<1x2048xf32> to vector<1x256xf32>
    %168 = vector.extract_strided_slice %160 {offsets = [0, 1792], sizes = [1, 256], strides = [1, 1]} : vector<1x2048xf32> to vector<1x256xf32>
    %169 = tpu.concatenate %161, %162, %163, %164, %165, %166, %167, %168 in 0 : vector<1x256xf32>, vector<1x256xf32>, vector<1x256xf32>, vector<1x256xf32>, vector<1x256xf32>, vector<1x256xf32>, vector<1x256xf32>, vector<1x256xf32> -> vector<8x256xf32>
    %c0_52 = arith.constant 0 : index
    %c2816 = arith.constant 2816 : index
    %170 = vector.load %arg12[%c0_52, %c2816] : memref<8x4096xf32, #tpu.memory_space<vmem>>, vector<8x256xf32>
    tpu.vector_store %arg12[%c0_52, %c2816], %169 {strides = array<i32>} : memref<8x4096xf32, #tpu.memory_space<vmem>>, vector<8x256xf32>,
    %171 = vector.extract_strided_slice %38 {offsets = [12, 0], sizes = [1, 2048], strides = [1, 1]} : vector<16x2048xf32> to vector<1x2048xf32>
    %172 = vector.extract_strided_slice %171 {offsets = [0, 0], sizes = [1, 256], strides = [1, 1]} : vector<1x2048xf32> to vector<1x256xf32>
    %173 = vector.extract_strided_slice %171 {offsets = [0, 256], sizes = [1, 256], strides = [1, 1]} : vector<1x2048xf32> to vector<1x256xf32>
    %174 = vector.extract_strided_slice %171 {offsets = [0, 512], sizes = [1, 256], strides = [1, 1]} : vector<1x2048xf32> to vector<1x256xf32>
    %175 = vector.extract_strided_slice %171 {offsets = [0, 768], sizes = [1, 256], strides = [1, 1]} : vector<1x2048xf32> to vector<1x256xf32>
    %176 = vector.extract_strided_slice %171 {offsets = [0, 1024], sizes = [1, 256], strides = [1, 1]} : vector<1x2048xf32> to vector<1x256xf32>
    %177 = vector.extract_strided_slice %171 {offsets = [0, 1280], sizes = [1, 256], strides = [1, 1]} : vector<1x2048xf32> to vector<1x256xf32>
    %178 = vector.extract_strided_slice %171 {offsets = [0, 1536], sizes = [1, 256], strides = [1, 1]} : vector<1x2048xf32> to vector<1x256xf32>
    %179 = vector.extract_strided_slice %171 {offsets = [0, 1792], sizes = [1, 256], strides = [1, 1]} : vector<1x2048xf32> to vector<1x256xf32>
    %180 = tpu.concatenate %172, %173, %174, %175, %176, %177, %178, %179 in 0 : vector<1x256xf32>, vector<1x256xf32>, vector<1x256xf32>, vector<1x256xf32>, vector<1x256xf32>, vector<1x256xf32>, vector<1x256xf32>, vector<1x256xf32> -> vector<8x256xf32>
    %c0_53 = arith.constant 0 : index
    %c3072 = arith.constant 3072 : index
    %181 = vector.load %arg12[%c0_53, %c3072] : memref<8x4096xf32, #tpu.memory_space<vmem>>, vector<8x256xf32>
    tpu.vector_store %arg12[%c0_53, %c3072], %180 {strides = array<i32>} : memref<8x4096xf32, #tpu.memory_space<vmem>>, vector<8x256xf32>,
    %182 = vector.extract_strided_slice %38 {offsets = [13, 0], sizes = [1, 2048], strides = [1, 1]} : vector<16x2048xf32> to vector<1x2048xf32>
    %183 = vector.extract_strided_slice %182 {offsets = [0, 0], sizes = [1, 256], strides = [1, 1]} : vector<1x2048xf32> to vector<1x256xf32>
    %184 = vector.extract_strided_slice %182 {offsets = [0, 256], sizes = [1, 256], strides = [1, 1]} : vector<1x2048xf32> to vector<1x256xf32>
    %185 = vector.extract_strided_slice %182 {offsets = [0, 512], sizes = [1, 256], strides = [1, 1]} : vector<1x2048xf32> to vector<1x256xf32>
    %186 = vector.extract_strided_slice %182 {offsets = [0, 768], sizes = [1, 256], strides = [1, 1]} : vector<1x2048xf32> to vector<1x256xf32>
    %187 = vector.extract_strided_slice %182 {offsets = [0, 1024], sizes = [1, 256], strides = [1, 1]} : vector<1x2048xf32> to vector<1x256xf32>
    %188 = vector.extract_strided_slice %182 {offsets = [0, 1280], sizes = [1, 256], strides = [1, 1]} : vector<1x2048xf32> to vector<1x256xf32>
    %189 = vector.extract_strided_slice %182 {offsets = [0, 1536], sizes = [1, 256], strides = [1, 1]} : vector<1x2048xf32> to vector<1x256xf32>
    %190 = vector.extract_strided_slice %182 {offsets = [0, 1792], sizes = [1, 256], strides = [1, 1]} : vector<1x2048xf32> to vector<1x256xf32>
    %191 = tpu.concatenate %183, %184, %185, %186, %187, %188, %189, %190 in 0 : vector<1x256xf32>, vector<1x256xf32>, vector<1x256xf32>, vector<1x256xf32>, vector<1x256xf32>, vector<1x256xf32>, vector<1x256xf32>, vector<1x256xf32> -> vector<8x256xf32>
    %c0_54 = arith.constant 0 : index
    %c3328 = arith.constant 3328 : index
    %192 = vector.load %arg12[%c0_54, %c3328] : memref<8x4096xf32, #tpu.memory_space<vmem>>, vector<8x256xf32>
    tpu.vector_store %arg12[%c0_54, %c3328], %191 {strides = array<i32>} : memref<8x4096xf32, #tpu.memory_space<vmem>>, vector<8x256xf32>,
    %193 = vector.extract_strided_slice %38 {offsets = [14, 0], sizes = [1, 2048], strides = [1, 1]} : vector<16x2048xf32> to vector<1x2048xf32>
    %194 = vector.extract_strided_slice %193 {offsets = [0, 0], sizes = [1, 256], strides = [1, 1]} : vector<1x2048xf32> to vector<1x256xf32>
    %195 = vector.extract_strided_slice %193 {offsets = [0, 256], sizes = [1, 256], strides = [1, 1]} : vector<1x2048xf32> to vector<1x256xf32>
    %196 = vector.extract_strided_slice %193 {offsets = [0, 512], sizes = [1, 256], strides = [1, 1]} : vector<1x2048xf32> to vector<1x256xf32>
    %197 = vector.extract_strided_slice %193 {offsets = [0, 768], sizes = [1, 256], strides = [1, 1]} : vector<1x2048xf32> to vector<1x256xf32>
    %198 = vector.extract_strided_slice %193 {offsets = [0, 1024], sizes = [1, 256], strides = [1, 1]} : vector<1x2048xf32> to vector<1x256xf32>
    %199 = vector.extract_strided_slice %193 {offsets = [0, 1280], sizes = [1, 256], strides = [1, 1]} : vector<1x2048xf32> to vector<1x256xf32>
    %200 = vector.extract_strided_slice %193 {offsets = [0, 1536], sizes = [1, 256], strides = [1, 1]} : vector<1x2048xf32> to vector<1x256xf32>
    %201 = vector.extract_strided_slice %193 {offsets = [0, 1792], sizes = [1, 256], strides = [1, 1]} : vector<1x2048xf32> to vector<1x256xf32>
    %202 = tpu.concatenate %194, %195, %196, %197, %198, %199, %200, %201 in 0 : vector<1x256xf32>, vector<1x256xf32>, vector<1x256xf32>, vector<1x256xf32>, vector<1x256xf32>, vector<1x256xf32>, vector<1x256xf32>, vector<1x256xf32> -> vector<8x256xf32>
    %c0_55 = arith.constant 0 : index
    %c3584 = arith.constant 3584 : index
    %203 = vector.load %arg12[%c0_55, %c3584] : memref<8x4096xf32, #tpu.memory_space<vmem>>, vector<8x256xf32>
    tpu.vector_store %arg12[%c0_55, %c3584], %202 {strides = array<i32>} : memref<8x4096xf32, #tpu.memory_space<vmem>>, vector<8x256xf32>,
    %204 = vector.extract_strided_slice %38 {offsets = [15, 0], sizes = [1, 2048], strides = [1, 1]} : vector<16x2048xf32> to vector<1x2048xf32>
    %205 = vector.extract_strided_slice %204 {offsets = [0, 0], sizes = [1, 256], strides = [1, 1]} : vector<1x2048xf32> to vector<1x256xf32>
    %206 = vector.extract_strided_slice %204 {offsets = [0, 256], sizes = [1, 256], strides = [1, 1]} : vector<1x2048xf32> to vector<1x256xf32>
    %207 = vector.extract_strided_slice %204 {offsets = [0, 512], sizes = [1, 256], strides = [1, 1]} : vector<1x2048xf32> to vector<1x256xf32>
    %208 = vector.extract_strided_slice %204 {offsets = [0, 768], sizes = [1, 256], strides = [1, 1]} : vector<1x2048xf32> to vector<1x256xf32>
    %209 = vector.extract_strided_slice %204 {offsets = [0, 1024], sizes = [1, 256], strides = [1, 1]} : vector<1x2048xf32> to vector<1x256xf32>
    %210 = vector.extract_strided_slice %204 {offsets = [0, 1280], sizes = [1, 256], strides = [1, 1]} : vector<1x2048xf32> to vector<1x256xf32>
    %211 = vector.extract_strided_slice %204 {offsets = [0, 1536], sizes = [1, 256], strides = [1, 1]} : vector<1x2048xf32> to vector<1x256xf32>
    %212 = vector.extract_strided_slice %204 {offsets = [0, 1792], sizes = [1, 256], strides = [1, 1]} : vector<1x2048xf32> to vector<1x256xf32>
    %213 = tpu.concatenate %205, %206, %207, %208, %209, %210, %211, %212 in 0 : vector<1x256xf32>, vector<1x256xf32>, vector<1x256xf32>, vector<1x256xf32>, vector<1x256xf32>, vector<1x256xf32>, vector<1x256xf32>, vector<1x256xf32> -> vector<8x256xf32>
    %c0_56 = arith.constant 0 : index
    %c3840 = arith.constant 3840 : index
    %214 = vector.load %arg12[%c0_56, %c3840] : memref<8x4096xf32, #tpu.memory_space<vmem>>, vector<8x256xf32>
    tpu.vector_store %arg12[%c0_56, %c3840], %213 {strides = array<i32>} : memref<8x4096xf32, #tpu.memory_space<vmem>>, vector<8x256xf32>,
    %c0_57 = arith.constant 0 : index
    %c0_58 = arith.constant 0 : index
    %215 = vector.load %arg12[%c0_57, %c0_58] : memref<8x4096xf32, #tpu.memory_space<vmem>>, vector<8x4096xf32>
    %c0_59 = arith.constant 0 : index
    %c0_60 = arith.constant 0 : index
    %216 = vector.load %arg4[%c0_59, %c0_60] : memref<4096x128xf32, #tpu.memory_space<vmem>>, vector<4096x128xf32>
    %cst_61 = arith.constant dense<0.000000e+00> : vector<8x128xf32>
    %217 = tpu.matmul %215, %216, %cst_61 {dimension_numbers = #tpu.dot_dimension_numbers<[1], [0], [0], [1], [0, 0, 1, 1], [], []>} : vector<8x4096xf32>, vector<4096x128xf32>, vector<8x128xf32> -> vector<8x128xf32>
    %cst_62 = arith.constant 0.000000e+00 : f32
    %cst_63 = arith.constant 1.000000e+00 : f32
    %218 = vector.broadcast %cst_62 : f32 to vector<8x128xf32>
    %219 = arith.maximumf %218, %217 : vector<8x128xf32>
    %220 = vector.broadcast %cst_63 : f32 to vector<8x128xf32>
    %221 = arith.minimumf %220, %219 : vector<8x128xf32>
    %c0_64 = arith.constant 0 : index
    %c0_65 = arith.constant 0 : index
    %222 = vector.load %arg7[%c0_64, %c0_65] : memref<128x64xf32, #tpu.memory_space<vmem>>, vector<128x64xf32>
    %cst_66 = arith.constant dense<0.000000e+00> : vector<8x64xf32>
    %223 = tpu.matmul %221, %222, %cst_66 {dimension_numbers = #tpu.dot_dimension_numbers<[1], [0], [0], [1], [0, 0, 1, 1], [], []>} : vector<8x128xf32>, vector<128x64xf32>, vector<8x64xf32> -> vector<8x64xf32>
    %cst_67 = arith.constant 0.000000e+00 : f32
    %224 = vector.broadcast %cst_67 : f32 to vector<2x32xf32>
    %225 = vector.extract_strided_slice %223 {offsets = [0, 0], sizes = [2, 32], strides = [1, 1]} : vector<8x64xf32> to vector<2x32xf32>
    %226 = vector.extract_strided_slice %223 {offsets = [0, 32], sizes = [2, 32], strides = [1, 1]} : vector<8x64xf32> to vector<2x32xf32>
    %c0_68 = arith.constant 0 : index
    %c0_69 = arith.constant 0 : index
    %227 = vector.load %arg5[%c0_68, %c0_69] : memref<32x32xf32, #tpu.memory_space<vmem>>, vector<32x32xf32>
    %cst_70 = arith.constant dense<0.000000e+00> : vector<2x32xf32>
    %228 = tpu.matmul %224, %227, %cst_70 {dimension_numbers = #tpu.dot_dimension_numbers<[1], [0], [0], [1], [0, 0, 1, 1], [], []>} : vector<2x32xf32>, vector<32x32xf32>, vector<2x32xf32> -> vector<2x32xf32>
    %229 = arith.addf %228, %225 : vector<2x32xf32>
    %cst_71 = arith.constant 5.000000e-01 : f32
    %230 = vector.broadcast %cst_71 : f32 to vector<2x32xf32>
    %231 = arith.mulf %229, %230 : vector<2x32xf32>
    %cst_72 = arith.constant 5.000000e-01 : f32
    %232 = vector.broadcast %cst_72 : f32 to vector<2x32xf32>
    %233 = arith.addf %231, %232 : vector<2x32xf32>
    %cst_73 = arith.constant 0.000000e+00 : f32
    %cst_74 = arith.constant 1.000000e+00 : f32
    %234 = vector.broadcast %cst_73 : f32 to vector<2x32xf32>
    %235 = arith.maximumf %234, %233 : vector<2x32xf32>
    %236 = vector.broadcast %cst_74 : f32 to vector<2x32xf32>
    %237 = arith.minimumf %236, %235 : vector<2x32xf32>
    %238 = arith.mulf %237, %224 : vector<2x32xf32>
    %c0_75 = arith.constant 0 : index
    %c0_76 = arith.constant 0 : index
    %239 = vector.load %arg6[%c0_75, %c0_76] : memref<32x32xf32, #tpu.memory_space<vmem>>, vector<32x32xf32>
    %cst_77 = arith.constant dense<0.000000e+00> : vector<2x32xf32>
    %240 = tpu.matmul %238, %239, %cst_77 {dimension_numbers = #tpu.dot_dimension_numbers<[1], [0], [0], [1], [0, 0, 1, 1], [], []>} : vector<2x32xf32>, vector<32x32xf32>, vector<2x32xf32> -> vector<2x32xf32>
    %241 = arith.addf %240, %226 : vector<2x32xf32>
    %cst_78 = arith.constant -1.000000e+00 : f32
    %cst_79 = arith.constant 1.000000e+00 : f32
    %242 = vector.broadcast %cst_78 : f32 to vector<2x32xf32>
    %243 = arith.maximumf %242, %241 : vector<2x32xf32>
    %244 = vector.broadcast %cst_79 : f32 to vector<2x32xf32>
    %245 = arith.minimumf %244, %243 : vector<2x32xf32>
    %246 = arith.mulf %237, %245 : vector<2x32xf32>
    %cst_80 = arith.constant 0.000000e+00 : f32
    %247 = vector.broadcast %cst_80 : f32 to vector<2x32xf32>
    %248 = arith.subf %247, %246 : vector<2x32xf32>
    %249 = arith.addf %238, %248 : vector<2x32xf32>
    %250 = arith.addf %249, %245 : vector<2x32xf32>
    %251 = vector.extract_strided_slice %223 {offsets = [2, 0], sizes = [2, 32], strides = [1, 1]} : vector<8x64xf32> to vector<2x32xf32>
    %252 = vector.extract_strided_slice %223 {offsets = [2, 32], sizes = [2, 32], strides = [1, 1]} : vector<8x64xf32> to vector<2x32xf32>
    %c0_81 = arith.constant 0 : index
    %c0_82 = arith.constant 0 : index
    %253 = vector.load %arg5[%c0_81, %c0_82] : memref<32x32xf32, #tpu.memory_space<vmem>>, vector<32x32xf32>
    %cst_83 = arith.constant dense<0.000000e+00> : vector<2x32xf32>
    %254 = tpu.matmul %250, %253, %cst_83 {dimension_numbers = #tpu.dot_dimension_numbers<[1], [0], [0], [1], [0, 0, 1, 1], [], []>} : vector<2x32xf32>, vector<32x32xf32>, vector<2x32xf32> -> vector<2x32xf32>
    %255 = arith.addf %254, %251 : vector<2x32xf32>
    %cst_84 = arith.constant 5.000000e-01 : f32
    %256 = vector.broadcast %cst_84 : f32 to vector<2x32xf32>
    %257 = arith.mulf %255, %256 : vector<2x32xf32>
    %cst_85 = arith.constant 5.000000e-01 : f32
    %258 = vector.broadcast %cst_85 : f32 to vector<2x32xf32>
    %259 = arith.addf %257, %258 : vector<2x32xf32>
    %cst_86 = arith.constant 0.000000e+00 : f32
    %cst_87 = arith.constant 1.000000e+00 : f32
    %260 = vector.broadcast %cst_86 : f32 to vector<2x32xf32>
    %261 = arith.maximumf %260, %259 : vector<2x32xf32>
    %262 = vector.broadcast %cst_87 : f32 to vector<2x32xf32>
    %263 = arith.minimumf %262, %261 : vector<2x32xf32>
    %264 = arith.mulf %263, %250 : vector<2x32xf32>
    %c0_88 = arith.constant 0 : index
    %c0_89 = arith.constant 0 : index
    %265 = vector.load %arg6[%c0_88, %c0_89] : memref<32x32xf32, #tpu.memory_space<vmem>>, vector<32x32xf32>
    %cst_90 = arith.constant dense<0.000000e+00> : vector<2x32xf32>
    %266 = tpu.matmul %264, %265, %cst_90 {dimension_numbers = #tpu.dot_dimension_numbers<[1], [0], [0], [1], [0, 0, 1, 1], [], []>} : vector<2x32xf32>, vector<32x32xf32>, vector<2x32xf32> -> vector<2x32xf32>
    %267 = arith.addf %266, %252 : vector<2x32xf32>
    %cst_91 = arith.constant -1.000000e+00 : f32
    %cst_92 = arith.constant 1.000000e+00 : f32
    %268 = vector.broadcast %cst_91 : f32 to vector<2x32xf32>
    %269 = arith.maximumf %268, %267 : vector<2x32xf32>
    %270 = vector.broadcast %cst_92 : f32 to vector<2x32xf32>
    %271 = arith.minimumf %270, %269 : vector<2x32xf32>
    %272 = arith.mulf %263, %271 : vector<2x32xf32>
    %cst_93 = arith.constant 0.000000e+00 : f32
    %273 = vector.broadcast %cst_93 : f32 to vector<2x32xf32>
    %274 = arith.subf %273, %272 : vector<2x32xf32>
    %275 = arith.addf %264, %274 : vector<2x32xf32>
    %276 = arith.addf %275, %271 : vector<2x32xf32>
    %277 = vector.extract_strided_slice %223 {offsets = [4, 0], sizes = [2, 32], strides = [1, 1]} : vector<8x64xf32> to vector<2x32xf32>
    %278 = vector.extract_strided_slice %223 {offsets = [4, 32], sizes = [2, 32], strides = [1, 1]} : vector<8x64xf32> to vector<2x32xf32>
    %c0_94 = arith.constant 0 : index
    %c0_95 = arith.constant 0 : index
    %279 = vector.load %arg5[%c0_94, %c0_95] : memref<32x32xf32, #tpu.memory_space<vmem>>, vector<32x32xf32>
    %cst_96 = arith.constant dense<0.000000e+00> : vector<2x32xf32>
    %280 = tpu.matmul %276, %279, %cst_96 {dimension_numbers = #tpu.dot_dimension_numbers<[1], [0], [0], [1], [0, 0, 1, 1], [], []>} : vector<2x32xf32>, vector<32x32xf32>, vector<2x32xf32> -> vector<2x32xf32>
    %281 = arith.addf %280, %277 : vector<2x32xf32>
    %cst_97 = arith.constant 5.000000e-01 : f32
    %282 = vector.broadcast %cst_97 : f32 to vector<2x32xf32>
    %283 = arith.mulf %281, %282 : vector<2x32xf32>
    %cst_98 = arith.constant 5.000000e-01 : f32
    %284 = vector.broadcast %cst_98 : f32 to vector<2x32xf32>
    %285 = arith.addf %283, %284 : vector<2x32xf32>
    %cst_99 = arith.constant 0.000000e+00 : f32
    %cst_100 = arith.constant 1.000000e+00 : f32
    %286 = vector.broadcast %cst_99 : f32 to vector<2x32xf32>
    %287 = arith.maximumf %286, %285 : vector<2x32xf32>
    %288 = vector.broadcast %cst_100 : f32 to vector<2x32xf32>
    %289 = arith.minimumf %288, %287 : vector<2x32xf32>
    %290 = arith.mulf %289, %276 : vector<2x32xf32>
    %c0_101 = arith.constant 0 : index
    %c0_102 = arith.constant 0 : index
    %291 = vector.load %arg6[%c0_101, %c0_102] : memref<32x32xf32, #tpu.memory_space<vmem>>, vector<32x32xf32>
    %cst_103 = arith.constant dense<0.000000e+00> : vector<2x32xf32>
    %292 = tpu.matmul %290, %291, %cst_103 {dimension_numbers = #tpu.dot_dimension_numbers<[1], [0], [0], [1], [0, 0, 1, 1], [], []>} : vector<2x32xf32>, vector<32x32xf32>, vector<2x32xf32> -> vector<2x32xf32>
    %293 = arith.addf %292, %278 : vector<2x32xf32>
    %cst_104 = arith.constant -1.000000e+00 : f32
    %cst_105 = arith.constant 1.000000e+00 : f32
    %294 = vector.broadcast %cst_104 : f32 to vector<2x32xf32>
    %295 = arith.maximumf %294, %293 : vector<2x32xf32>
    %296 = vector.broadcast %cst_105 : f32 to vector<2x32xf32>
    %297 = arith.minimumf %296, %295 : vector<2x32xf32>
    %298 = arith.mulf %289, %297 : vector<2x32xf32>
    %cst_106 = arith.constant 0.000000e+00 : f32
    %299 = vector.broadcast %cst_106 : f32 to vector<2x32xf32>
    %300 = arith.subf %299, %298 : vector<2x32xf32>
    %301 = arith.addf %290, %300 : vector<2x32xf32>
    %302 = arith.addf %301, %297 : vector<2x32xf32>
    %303 = vector.extract_strided_slice %223 {offsets = [6, 0], sizes = [2, 32], strides = [1, 1]} : vector<8x64xf32> to vector<2x32xf32>
    %304 = vector.extract_strided_slice %223 {offsets = [6, 32], sizes = [2, 32], strides = [1, 1]} : vector<8x64xf32> to vector<2x32xf32>
    %c0_107 = arith.constant 0 : index
    %c0_108 = arith.constant 0 : index
    %305 = vector.load %arg5[%c0_107, %c0_108] : memref<32x32xf32, #tpu.memory_space<vmem>>, vector<32x32xf32>
    %cst_109 = arith.constant dense<0.000000e+00> : vector<2x32xf32>
    %306 = tpu.matmul %302, %305, %cst_109 {dimension_numbers = #tpu.dot_dimension_numbers<[1], [0], [0], [1], [0, 0, 1, 1], [], []>} : vector<2x32xf32>, vector<32x32xf32>, vector<2x32xf32> -> vector<2x32xf32>
    %307 = arith.addf %306, %303 : vector<2x32xf32>
    %cst_110 = arith.constant 5.000000e-01 : f32
    %308 = vector.broadcast %cst_110 : f32 to vector<2x32xf32>
    %309 = arith.mulf %307, %308 : vector<2x32xf32>
    %cst_111 = arith.constant 5.000000e-01 : f32
    %310 = vector.broadcast %cst_111 : f32 to vector<2x32xf32>
    %311 = arith.addf %309, %310 : vector<2x32xf32>
    %cst_112 = arith.constant 0.000000e+00 : f32
    %cst_113 = arith.constant 1.000000e+00 : f32
    %312 = vector.broadcast %cst_112 : f32 to vector<2x32xf32>
    %313 = arith.maximumf %312, %311 : vector<2x32xf32>
    %314 = vector.broadcast %cst_113 : f32 to vector<2x32xf32>
    %315 = arith.minimumf %314, %313 : vector<2x32xf32>
    %316 = arith.mulf %315, %302 : vector<2x32xf32>
    %c0_114 = arith.constant 0 : index
    %c0_115 = arith.constant 0 : index
    %317 = vector.load %arg6[%c0_114, %c0_115] : memref<32x32xf32, #tpu.memory_space<vmem>>, vector<32x32xf32>
    %cst_116 = arith.constant dense<0.000000e+00> : vector<2x32xf32>
    %318 = tpu.matmul %316, %317, %cst_116 {dimension_numbers = #tpu.dot_dimension_numbers<[1], [0], [0], [1], [0, 0, 1, 1], [], []>} : vector<2x32xf32>, vector<32x32xf32>, vector<2x32xf32> -> vector<2x32xf32>
    %319 = arith.addf %318, %304 : vector<2x32xf32>
    %cst_117 = arith.constant -1.000000e+00 : f32
    %cst_118 = arith.constant 1.000000e+00 : f32
    %320 = vector.broadcast %cst_117 : f32 to vector<2x32xf32>
    %321 = arith.maximumf %320, %319 : vector<2x32xf32>
    %322 = vector.broadcast %cst_118 : f32 to vector<2x32xf32>
    %323 = arith.minimumf %322, %321 : vector<2x32xf32>
    %324 = arith.mulf %315, %323 : vector<2x32xf32>
    %cst_119 = arith.constant 0.000000e+00 : f32
    %325 = vector.broadcast %cst_119 : f32 to vector<2x32xf32>
    %326 = arith.subf %325, %324 : vector<2x32xf32>
    %327 = arith.addf %316, %326 : vector<2x32xf32>
    %328 = arith.addf %327, %323 : vector<2x32xf32>
    %c0_120 = arith.constant 0 : index
    %c0_121 = arith.constant 0 : index
    %329 = vector.load %arg8[%c0_120, %c0_121] : memref<32x7xf32, #tpu.memory_space<vmem>>, vector<32x7xf32>
    %cst_122 = arith.constant dense<0.000000e+00> : vector<2x7xf32>
    %330 = tpu.matmul %328, %329, %cst_122 {dimension_numbers = #tpu.dot_dimension_numbers<[1], [0], [0], [1], [0, 0, 1, 1], [], []>} : vector<2x32xf32>, vector<32x7xf32>, vector<2x7xf32> -> vector<2x7xf32>
    %cst_123 = arith.constant -1.000000e+00 : f32
    %cst_124 = arith.constant 1.000000e+00 : f32
    %331 = vector.broadcast %cst_123 : f32 to vector<2x7xf32>
    %332 = arith.maximumf %331, %330 : vector<2x7xf32>
    %333 = vector.broadcast %cst_124 : f32 to vector<2x7xf32>
    %334 = arith.minimumf %333, %332 : vector<2x7xf32>
    %c0_125 = arith.constant 0 : index
    %c0_126 = arith.constant 0 : index
    %335 = vector.load %arg9[%c0_125, %c0_126] : memref<2x7xf32, #tpu.memory_space<vmem>>, vector<2x7xf32>
    tpu.vector_store %arg9[%c0_125, %c0_126], %334 {strides = array<i32>} : memref<2x7xf32, #tpu.memory_space<vmem>>, vector<2x7xf32>,
    return
  }
}

</mosaic_0001>

<bundles_post_ra>
// kernel: forward_pallas.1
= control target key start
LH: loop header
LB: loop body
LE: loop exit
PB: predicated region body
PF: predicated region fallthrough
CT: control target
= control target key end

     0   :  { %14 = vsyncpa [#allocation6], 0  ;;  %s6966_s0 = inlined_call_operand.vmem [shape: f32[16,2048], index: 0, kind: input, shape index: {}]   ;;  %s6967_s1 = inlined_call_operand.hbm [shape: f32[8,2048], index: 1, kind: input, shape index: {}]   ;;  %s6968_s2 = inlined_call_operand.hbm [shape: f32[8,16], index: 2, kind: input, shape index: {}]   ;;  %s6969_s3 = inlined_call_operand.hbm [shape: f32[16,72], index: 3, kind: input, shape index: {}]   ;;  %s6970_s4 = inlined_call_operand.hbm [shape: f32[4096,128], index: 4, kind: input, shape index: {}]   ;;  %s6971_s5 = inlined_call_operand.hbm [shape: f32[32,32], index: 5, kind: input, shape index: {}]   ;;  %s6972_s6 = inlined_call_operand.hbm [shape: f32[32,32], index: 6, kind: input, shape index: {}]   ;;  %s6973_s7 = inlined_call_operand.vmem [shape: f32[128,64], index: 7, kind: input, shape index: {}]   ;;  %s6974_s8 = inlined_call_operand.vmem [shape: f32[32,7], index: 8, kind: input, shape index: {}]   ;;  %s6975_s9 = inlined_call_operand.hbm [shape: f32[2,7], index: 9, kind: output, shape index: {}]  }
   0x1   :  { %15 = vsyncpa [#allocation9], 0 }
   0x2   :  { %16 = vsyncpa [#allocation12], 0 }
   0x3   :  { %17 = vsyncpa [#allocation15], 0  ;;  %s37_s11 = sshll.u32 %s6968_s2, 4  ;;  %s38_s11 = int_to_ptr.hbm [resolvable:$true] %s37_s11 }
   0x4   :  { %18 = vsyncpa [#allocation7], 0  ;;  %s4965_s12 = smov [#allocation8]   ;;  %s60_s16 = sshll.u32 %s6970_s4, 4  ;;  %s61_s16 = int_to_ptr.hbm [resolvable:$true] %s60_s16 }
   0x5   :  { %s39_s13 = sshll.u32 %s4965_s12, 4  ;;  %s4966_s17 = smov [#allocation11]   ;;  %s40_s13 = int_to_ptr.vmem [resolvable:$true] %s39_s13 }
   0x6   :  { %42 = dma.hbm_to_vmem [thread:$0]  %s38_s11, 128, %s40_s13, [#allocation9]  }
   0x7   :  { %s62_s18 = sshll.u32 %s4966_s17, 4  ;;  %s26_s21 = sshll.u32 %s6967_s1, 4  ;;  %s63_s18 = int_to_ptr.vmem [resolvable:$true] %s62_s18  ;;  %s27_s21 = int_to_ptr.hbm [resolvable:$true] %s26_s21 }
   0x8   :  { %s4967_s2 = smov 128   ;;  %s4968_s22 = smov 8  }
   0x9   :  { %68 = dma.hbm_to_vmem [thread:$0]  %s61_s16, 65536, %s63_s18, [#allocation12], %s4967_s2, %s4967_s2, %s4968_s22  }
   0xa   :  { %s47_s25 = sshll.u32 %s6969_s3, 4  ;;  %s4969_s26 = smov [#allocation5]   ;;  %s48_s25 = int_to_ptr.hbm [resolvable:$true] %s47_s25 }
   0xb   :  { %s28_s27 = sshll.u32 %s4969_s26, 4  ;;  %s4970_s4 = smov [#allocation10]   ;;  %s29_s27 = int_to_ptr.vmem [resolvable:$true] %s28_s27 }
   0xc   :  { %31 = dma.hbm_to_vmem [thread:$0]  %s27_s21, 2048, %s29_s27, [#allocation6]  }
   0xd   :  { %s49_s28 = sshll.u32 %s4970_s4, 4  ;;  %s73_s1 = sshll.u32 %s6971_s5, 4  ;;  %s50_s28 = int_to_ptr.vmem [resolvable:$true] %s49_s28  ;;  %s74_s1 = int_to_ptr.hbm [resolvable:$true] %s73_s1 }
   0xe   :  { %55 = dma.hbm_to_vmem [thread:$0]  %s48_s25, 256, %s50_s28, [#allocation9], %s4967_s2, %s4967_s2, %s4968_s22  }
   0xf   :  { %s86_s12 = sshll.u32 %s6972_s6, 4  ;;  %s4971_s13 = smov [#allocation13]   ;;  %s87_s12 = int_to_ptr.hbm [resolvable:$true] %s86_s12 }
  0x10   :  { %s75_s3 = sshll.u32 %s4971_s13, 4  ;;  %s4972_s14 = smov [#allocation14]   ;;  %s76_s3 = int_to_ptr.vmem [resolvable:$true] %s75_s3 }
  0x11   :  { %81 = dma.hbm_to_vmem [thread:$0]  %s74_s1, 512, %s76_s3, [#allocation12], %s4967_s2, %s4967_s2, %s4968_s22  }
  0x12   :  { %s88_s15 = sshll.u32 %s4972_s14, 4  ;;  %s89_s15 = int_to_ptr.vmem [resolvable:$true] %s88_s15 }
  0x13   :  { %94 = dma.hbm_to_vmem [thread:$0]  %s87_s12, 512, %s89_s15, [#allocation15], %s4967_s2, %s4967_s2, %s4968_s22  }
  0x14   :  { %4955 = dma.done.wait [#allocation6], 2048  }
  0x15   :  { %4956 = vsyncadd [#allocation6], 4294965248 }
  0x16   :  { %4957 = dma.done.wait [#allocation9], 384  }
  0x17   :  { %4958 = vsyncadd [#allocation9], 4294966912 }
  0x18   :  { %4959 = dma.done.wait [#allocation12], 66048  }
  0x19   :  { %4960 = vsyncadd [#allocation12], 4294901248 }
  0x1a   :  { %4961 = dma.done.wait [#allocation15], 512  }
  0x1b   :  { %4962 = vsyncadd [#allocation15], 4294966784  ;;  %v142_v0 = vld [vmem:[%s6966_s0 + $0x90] sm:$0xff]  ;;  %v143_v1 = vld [vmem:[%s6966_s0 + $0x98] sm:$0xff]  ;;  %vm156_vm0 = vcmask 130048   ;;  %s4974_s23 = smov 114  }
  0x1c   :  { %v126_v2 = vld [vmem:[%s6966_s0 + $0x10] sm:$0xff]  ;;  %214 = vmatpush.msra.mxu2 %v142_v0  ;;  %234 = vmatpush.msra.mxu3 %v143_v1  ;;  %v127_v3 = vld [vmem:[%s6966_s0 + $0x18] sm:$0xff]  ;;  %v5064_v4 = vld [vmem:[#allocation8] sm:$0xff]  ;;  %s4975_s24 = smov 1   ;;  %s4976_s25 = smov 115   ;;  %vm1481_vm1 = vcmask 932864  }
  0x1d   :  { %v141_v5 = vld [vmem:[%s6966_s0 + $0x88] sm:$0xff]  ;;  %v146_v7 = vld [vmem:[%s6966_s0 + $0xb0] sm:$0xff]  ;;  %v140_v8 = vld [vmem:[%s6966_s0 + $0x80] sm:$0xff]  ;;  %s4977_s26 = smov 12   ;;  %s4978_s27 = smov 127   ;;  %vm981_vm2 = vcmask 7168  }
  0x1e   :  { %194 = vmatpush.msra.mxu1 %v141_v5  ;;  %v125_v6 = vld [vmem:[%s6966_s0 + $0x8] sm:$0xff]  ;;  %215 = vmatpush.msra.mxu2 %v126_v2  ;;  %v130_v9 = vld [vmem:[%s6966_s0 + $0x30] sm:$0xff]  ;;  %v124_v11 = vld [vmem:[%s6966_s0] sm:$0xff]  ;;  %s4979_s4 = smov 13   ;;  %s4980_s28 = smov 14   ;;  %vm1364_vm3 = vcmask 941056  }
  0x1f   :  { %235 = vmatpush.msra.mxu3 %v127_v3  ;;  %4389 = vmatmul.msk.f32.vlgmr.msra.gmra.mxu2 %vm156_vm0, %v5064_v4  ;;  %v145_v10 = vld [vmem:[%s6966_s0 + $0xa8] sm:$0xff]  ;;  %v150_v12 = vld [vmem:[%s6966_s0 + $0xd0] sm:$0xff]  ;;  %v144_v14 = vld [vmem:[%s6966_s0 + $0xa0] sm:$0xff]  ;;  %vm1247_vm4 = vcmask 949248   ;;  %vm1130_vm5 = vcmask 1039360   ;;  %vm864_vm6 = vcmask 97280  }
  0x20   :  { %4390 = vmatmul.msk.f32.vlgmr.msra.gmra.mxu3 %vm156_vm0, %v5064_v4  ;;  %195 = vmatpush.msra.mxu1 %v125_v6  ;;  %v129_v13 = vld [vmem:[%s6966_s0 + $0x28] sm:$0xff]  ;;  %v134_v16 = vld [vmem:[%s6966_s0 + $0x50] sm:$0xff]  ;;  %v147_v17 = vld [vmem:[%s6966_s0 + $0xb8] sm:$0xff]  ;;  %vm747_vm7 = vcmask 105472   ;;  %vm630_vm8 = vcmask 113664   ;;  %vm1676_vm9 = vcmask 588800  }
  0x21   :  { %294 = vmatpush.msrb.mxu2 %v146_v7  ;;  %4388 = vmatmul.msk.f32.vlgmr.msra.gmra.mxu1 %vm156_vm0, %v5064_v4  ;;  %v149_v15 = vld [vmem:[%s6966_s0 + $0xc8] sm:$0xff]  ;;  %v128_v18 = vld [vmem:[%s6966_s0 + $0x20] sm:$0xff]  ;;  %v131_v20 = vld [vmem:[%s6966_s0 + $0x38] sm:$0xff]  ;;  %vm2157_vm10 = vcmask 1040384   ;;  %vm2160_vm11 = vcmask 1041408   ;;  %vm2163_vm12 = vcmask 1042432  }
  0x22   :  { %174 = vmatpush.msra.mxu0 %v140_v8  ;;  %274 = vmatpush.msrb.mxu1 %v145_v10  ;;  %v133_v19 = vld [vmem:[%s6966_s0 + $0x48] sm:$0xff]  ;;  %v148_v21 = vld [vmem:[%s6966_s0 + $0xc0] sm:$0xff]  ;;  %v154_v23 = vld [vmem:[%s6966_s0 + $0xf0] sm:$0xff]  ;;  %vm2166_vm13 = vcmask 1043456   ;;  %vm2169_vm14 = vcmask 1044480   ;;  %vm2172_vm15 = vcmask 1045504  }
  0x23   :  { %295 = vmatpush.msrb.mxu2 %v130_v9  ;;  %314 = vmatpush.msrb.mxu3 %v147_v17  ;;  %v153_v22 = vld [vmem:[%s6966_s0 + $0xe8] sm:$0xff]  ;;  %v151_v24 = vld [vmem:[%s6966_s0 + $0xd8] sm:$0xff]  ;;  %v132_v26 = vld [vmem:[%s6966_s0 + $0x40] sm:$0xff]  ;;  %s4983_s6 = smov [#allocation16]   ;;  %s4374_s20 = sshll.u32 %s6975_s9, 4  ;;  %s4375_s20 = int_to_ptr.hbm [resolvable:$true] %s4374_s20 }
  0x24   :  { %175 = vmatpush.msra.mxu0 %v124_v11  ;;  %275 = vmatpush.msrb.mxu1 %v129_v13  ;;  %v137_v25 = vld [vmem:[%s6966_s0 + $0x68] sm:$0xff]  ;;  %v138_v27 = vld [vmem:[%s6966_s0 + $0x70] sm:$0xff]  ;;  %v135_v28 = vld [vmem:[%s6966_s0 + $0x58] sm:$0xff]  ;;  %s4372_s17 = sshll.u32 %s4983_s6, 4  ;;  %s4373_s17 = int_to_ptr.vmem [resolvable:$true] %s4372_s17 }
  0x25   :  { %374 = vmatpush.msra.mxu2 %v150_v12  ;;  %4387 = vmatmul.msk.f32.vlgmr.msra.gmra.mxu0 %vm156_vm0, %v5064_v4  ;;  %v152_v29 = vld [vmem:[%s6966_s0 + $0xe0] sm:$0xff]  ;;  %v155_v31 = vld [vmem:[%s6966_s0 + $0xf8] sm:$0xff]  ;;  %v513_v37 = vld [vmem:[#allocation5 + $0x8] sm:$0xff] }
  0x26   :  { %254 = vmatpush.msrb.mxu0 %v144_v14  ;;  %354 = vmatpush.msra.mxu1 %v149_v15  ;;  %v136_v30 = vld [vmem:[%s6966_s0 + $0x60] sm:$0xff]  ;;  %v139_v32 = vld [vmem:[%s6966_s0 + $0x78] sm:$0xff]  ;;  %v514_v42 = vld [vmem:[#allocation5 + $0x10] sm:$0xff]  ;;  %s4973_s0 = smov 116  }
  0x27   :  { %375 = vmatpush.msra.mxu2 %v134_v16  ;;  %315 = vmatpush.msrb.mxu3 %v131_v20  ;;  %v515_v43 = vld [vmem:[#allocation5 + $0x18] sm:$0xff]  ;;  %v512_v56 = vld [vmem:[#allocation5] sm:$0xff]  ;;  %v517_v1 = vld [vmem:[#allocation5 + $0x28] sm:$0xff] }
  0x28   :  { %4393 = vmatmul.msk.f32.vlgmr.msrb.gmra.mxu2 %vm156_vm0, %v5064_v4  ;;  %255 = vmatpush.msrb.mxu0 %v128_v18  ;;  %v516_v57 = vld [vmem:[#allocation5 + $0x20] sm:$0xff]  ;;  %v518_v7 = vld [vmem:[#allocation5 + $0x30] sm:$0xff]  ;;  %v519_v16 = vld [vmem:[#allocation5 + $0x38] sm:$0xff] }
  0x29   :  { %355 = vmatpush.msra.mxu1 %v133_v19  ;;  %4394 = vmatmul.msk.f32.vlgmr.msrb.gmra.mxu3 %vm156_vm0, %v5064_v4  ;;  %v520_v17 = vld [vmem:[#allocation5 + $0x40] sm:$0xff] }
  0x2a   :  { %4392 = vmatmul.msk.f32.vlgmr.msrb.gmra.mxu1 %vm156_vm0, %v5064_v4  ;;  %334 = vmatpush.msra.mxu0 %v148_v21 }
  0x2b   :  { %434 = vmatpush.msrb.mxu1 %v153_v22  ;;  %454 = vmatpush.msrb.mxu2 %v154_v23 }
  0x2c   :  { %394 = vmatpush.msra.mxu3 %v151_v24  ;;  %335 = vmatpush.msra.mxu0 %v132_v26 }
  0x2d   :  { %4391 = vmatmul.msk.f32.vlgmr.msrb.gmra.mxu0 %vm156_vm0, %v5064_v4  ;;  %435 = vmatpush.msrb.mxu1 %v137_v25  ;;  %v521_v25 = vld [vmem:[#allocation5 + $0x48] sm:$0xff] }
  0x2e   :  { %455 = vmatpush.msrb.mxu2 %v138_v27  ;;  %395 = vmatpush.msra.mxu3 %v135_v28 }
  0x2f   :  { %414 = vmatpush.msrb.mxu0 %v152_v29 }
  0x30   :  { %4397 = vmatmul.msk.f32.vlgmr.msra.gmra.mxu2 %vm156_vm0, %v5064_v4  ;;  %474 = vmatpush.msrb.mxu3 %v155_v31  ;;  %v522_v31 = vld [vmem:[#allocation5 + $0x50] sm:$0xff] }
  0x31   :  { %415 = vmatpush.msrb.mxu0 %v136_v30  ;;  %4398 = vmatmul.msk.f32.vlgmr.msra.gmra.mxu3 %vm156_vm0, %v5064_v4 }
  0x32   :  { %4396 = vmatmul.msk.f32.vlgmr.msra.gmra.mxu1 %vm156_vm0, %v5064_v4  ;;  %475 = vmatpush.msrb.mxu3 %v139_v32 }
  0x35   :  { %4395 = vmatmul.msk.f32.vlgmr.msra.gmra.mxu0 %vm156_vm0, %v5064_v4 }
  0x38   :  { %4401 = vmatmul.msk.f32.vlgmr.msrb.gmra.mxu2 %vm156_vm0, %v5064_v4 }
  0x39   :  { %4402 = vmatmul.msk.f32.vlgmr.msrb.gmra.mxu3 %vm156_vm0, %v5064_v4 }
  0x3a   :  { %4400 = vmatmul.msk.f32.vlgmr.msrb.gmra.mxu1 %vm156_vm0, %v5064_v4 }
  0x3d   :  { %4399 = vmatmul.msk.f32.vlgmr.msrb.gmra.mxu0 %vm156_vm0, %v5064_v4  ;;  %vm2175_vm0 = vcmask 1046528  }
  0x9e   :  { %v197_v33 = vpop.f32.mrf.mxu1 }
  0x9f   :  { %v481_v34 = vmax.f32 %v197_v33, 0.0 }
  0xa1   :  { %v497_v35 = vmin.f32 %v481_v34, 1.0 }
  0xa2   :  { %v177_v36 = vpop.f32.mrf.mxu0  ;;  %v217_v38 = vpop.f32.mrf.mxu2 }
  0xa3   :  { %v237_v39 = vpop.f32.mrf.mxu3  ;;  %v482_v40 = vmax.f32 %v217_v38, 0.0  ;;  %v5182_v44 = vmul.f32 %v513_v37, %v497_v35  ;;  %v480_v52 = vmax.f32 %v177_v36, 0.0  ;;  %v523_v38 = vld [vmem:[#allocation5 + $0x58] sm:$0xff] }
  0xa4   :  { %v483_v41 = vmax.f32 %v237_v39, 0.0 }
  0xa5   :  { %v498_v45 = vmin.f32 %v482_v40, 1.0  ;;  %v496_v54 = vmin.f32 %v480_v52, 1.0 }
  0xa6   :  { %v499_v46 = vmin.f32 %v483_v41, 1.0 }
  0xa7   :  { %v5184_v47 = vmul.f32 %v514_v42, %v498_v45  ;;  %v277_v58 = vpop.f32.mrf.mxu1  ;;  %v5198_v60 = vmul.f32 %v512_v56, %v496_v54 }
  0xa8   :  { %v5186_v48 = vmul.f32 %v515_v43, %v499_v46  ;;  %v485_v62 = vmax.f32 %v277_v58, 0.0 }
  0xa9   :  { %v4487_v50 = vpack.i.bf16 %v5184_v47, %v5182_v44 }
  0xaa   :  { %v4477_v49 = vpack.i.bf16 %v5186_v48, %v5184_v47  ;;  %v257_v51 = vpop.f32.mrf.mxu0  ;;  %v4497_v59 = vpack.i.bf16 0.0, %v5186_v48  ;;  %v501_v63 = vmin.f32 %v485_v62, 1.0 }
  0xab   :  { %4488 = vrot.lane.b32.xlu2 %v4487_v50, %s4975_s24  ;;  %v484_v53 = vmax.f32 %v257_v51, 0.0  ;;  %v297_v4 = vpop.f32.mrf.mxu2 }
  0xac   :  { %4478 = vrot.lane.b32.xlu1 %v4477_v49, %s4973_s0  ;;  %4468 = vrot.lane.b32.xlu0 %v4477_v49, %s4974_s23  ;;  %v5207_v2 = vmul.f32 %v517_v1, %v501_v63  ;;  %v486_v5 = vmax.f32 %v297_v4, 0.0  ;;  %v317_v9 = vpop.f32.mrf.mxu3 }
  0xad   :  { %v500_v55 = vmin.f32 %v484_v53, 1.0  ;;  %v487_v12 = vmax.f32 %v317_v9, 0.0 }
  0xae   :  { %v4547_v3 = vpack.i.bf16 %v5207_v2, %v5198_v60  ;;  %v502_v6 = vmin.f32 %v486_v5, 1.0 }
  0xaf   :  { %v5200_v61 = vmul.f32 %v516_v57, %v500_v55  ;;  %v503_v14 = vmin.f32 %v487_v12, 1.0  ;;  %v357_v21 = vpop.f32.mrf.mxu1  ;;  %v525_v55 = vld [vmem:[#allocation5 + $0x68] sm:$0xff] }
  0xb0   :  { %v5218_v8 = vmul.f32 %v518_v7, %v502_v6  ;;  %v489_v22 = vmax.f32 %v357_v21, 0.0 }
  0xb1   :  { %v4532_v0 = vpack.i.bf16 %v5198_v60, %v5200_v61  ;;  %v5227_v18 = vmul.f32 %v519_v16, %v503_v14 }
  0xb2   :  { %v337_v10 = vpop.f32.mrf.mxu0  ;;  %v4567_v11 = vpack.i.bf16 %v5218_v8, %v5182_v44  ;;  %v505_v24 = vmin.f32 %v489_v22, 1.0 }
  0xb3   :  { %4498 = vrot.lane.b32.xlu2 %v4497_v59, %s4975_s24  ;;  %v488_v13 = vmax.f32 %v337_v10, 0.0  ;;  %v4587_v23 = vpack.i.bf16 %v5227_v18, %v5218_v8  ;;  %v377_v28 = vpop.f32.mrf.mxu2 }
  0xb4   :  { %4473 = vrot.lane.b32.xlu0 %v4477_v49, %s4976_s25  ;;  %4493 = vrot.lane.b32.xlu1 %v4487_v50, %s4977_s26  ;;  %v5242_v26 = vmul.f32 %v521_v25, %v505_v24  ;;  %v490_v29 = vmax.f32 %v377_v28, 0.0  ;;  %v397_v33 = vpop.f32.mrf.mxu3 }
  0xb5   :  { %v504_v15 = vmin.f32 %v488_v13, 1.0  ;;  %v491_v35 = vmax.f32 %v397_v33, 0.0 }
  0xb6   :  { %v4627_v27 = vpack.i.bf16 %v5242_v26, %v5200_v61  ;;  %v506_v30 = vmin.f32 %v490_v29, 1.0 }
  0xb7   :  { %v5229_v19 = vmul.f32 %v520_v17, %v504_v15  ;;  %v507_v37 = vmin.f32 %v491_v35, 1.0  ;;  %v437_v46 = vpop.f32.mrf.mxu1 }
  0xb8   :  { %v5252_v32 = vmul.f32 %v522_v31, %v506_v30 }
  0xb9   :  { %v4607_v20 = vpack.i.bf16 %v5229_v19, %v5227_v18  ;;  %v5264_v40 = vmul.f32 %v523_v38, %v507_v37 }
  0xba   :  { %v4652_v34 = vpack.i.bf16 %v5252_v32, %v5207_v2  ;;  %v417_v39 = vpop.f32.mrf.mxu0 }
  0xbb   :  { %4533 = vrot.lane.b32.xlu2 %v4532_v0, %s4976_s25  ;;  %v492_v41 = vmax.f32 %v417_v39, 0.0  ;;  %v4672_v45 = vpack.i.bf16 %v5264_v40, %v5252_v32  ;;  %v457_v6 = vpop.f32.mrf.mxu2 }
  0xbc   :  { %4483 = vrot.lane.b32.xlu0 %v4477_v49, %s4978_s27  ;;  %4508 = vrot.lane.b32.xlu1 %v4497_v59, %s4977_s26  ;;  %v524_v49 = vld [vmem:[#allocation5 + $0x60] sm:$0xff]  ;;  %v494_v7 = vmax.f32 %v457_v6, 0.0  ;;  %v477_v39 = vpop.f32.mrf.mxu3 }
  0xbd   :  { %v508_v43 = vmin.f32 %v492_v41, 1.0 }
  0xbe   :  { %v510_v17 = vmin.f32 %v494_v7, 1.0 }
  0xbf   :  { %v5273_v51 = vmul.f32 %v524_v49, %v508_v43  ;;  %v495_v43 = vmax.f32 %v477_v39, 0.0 }
  0xc1   :  { %v4692_v54 = vpack.i.bf16 %v5273_v51, %v5264_v40 }
  0xc3   :  { %4548 = vrot.lane.b32.xlu2 %v4547_v3, %s4975_s24 }
  0xc4   :  { %4503 = vrot.lane.b32.xlu0 %v4487_v50, %s4979_s4  ;;  %4518 = vrot.lane.b32.xlu1 %v4497_v59, %s4979_s4 }
  0xcb   :  { %4563 = vrot.lane.b32.xlu2 %v4547_v3, %s4980_s28 }
  0xcc   :  { %4513 = vrot.lane.b32.xlu0 %v4487_v50, %s4980_s28  ;;  %4523 = vrot.lane.b32.xlu1 %v4497_v59, %s4980_s28  ;;  %v493_v50 = vmax.f32 %v437_v46, 0.0 }
  0xce   :  { %v509_v53 = vmin.f32 %v493_v50, 1.0 }
  0xd0   :  { %v5282_v56 = vmul.f32 %v525_v55, %v509_v53 }
  0xd2   :  { %v4707_v4 = vpack.i.bf16 %v5282_v56, %v5229_v19 }
  0xd3   :  { %4568 = vrot.lane.b32.xlu2 %v4567_v11, %s4974_s23 }
  0xd4   :  { %4543 = vrot.lane.b32.xlu0 %v4532_v0, %s4978_s27  ;;  %4528 = vrot.lane.b32.xlu1 %v4532_v0, %s4974_s23 }
  0xdb   :  { %4573 = vrot.lane.b32.xlu2 %v4567_v11, %s4976_s25 }
  0xdc   :  { %4553 = vrot.lane.b32.xlu0 %v4547_v3, %s4977_s26  ;;  %4538 = vrot.lane.b32.xlu1 %v4532_v0, %s4973_s0 }
  0xe3   :  { %4608 = vrot.lane.b32.xlu2 %v4607_v20, %s4974_s23 }
  0xe4   :  { %4558 = vrot.lane.b32.xlu0 %v4547_v3, %s4979_s4  ;;  %4578 = vrot.lane.b32.xlu1 %v4567_v11, %s4973_s0 }
  0xeb   :  { %4613 = vrot.lane.b32.xlu2 %v4607_v20, %s4976_s25 }
  0xec   :  { %4583 = vrot.lane.b32.xlu0 %v4567_v11, %s4978_s27  ;;  %4588 = vrot.lane.b32.xlu1 %v4587_v23, %s4975_s24 }
  0xf3   :  { %4628 = vrot.lane.b32.xlu2 %v4627_v27, %s4975_s24 }
  0xf4   :  { %4593 = vrot.lane.b32.xlu0 %v4587_v23, %s4977_s26  ;;  %4598 = vrot.lane.b32.xlu1 %v4587_v23, %s4979_s4 }
  0xfb   :  { %4633 = vrot.lane.b32.xlu2 %v4627_v27, %s4977_s26 }
  0xfc   :  { %4603 = vrot.lane.b32.xlu0 %v4587_v23, %s4980_s28  ;;  %4618 = vrot.lane.b32.xlu1 %v4607_v20, %s4973_s0 }
 0x103   :  { %4653 = vrot.lane.b32.xlu2 %v4652_v34, %s4976_s25 }
 0x104   :  { %4643 = vrot.lane.b32.xlu0 %v4627_v27, %s4980_s28  ;;  %4623 = vrot.lane.b32.xlu1 %v4607_v20, %s4978_s27  ;;  %v526_v20 = vld [vmem:[#allocation5 + $0x70] sm:$0xff] }
 0x105   :  { %v5259_v36 = vpop.permute.xlu2 %4488  ;;  %v5328_v22 = vmul.f32 %v526_v20, %v510_v17 }
 0x106   :  { %v4491_v30 = vunpack.i.h.bf16 %v5259_v36  ;;  %v4490_v31 = vunpack.i.l.bf16 %v5259_v36 }
 0x107   :  { %v4732_v35 = vpack.i.bf16 %v5328_v22, %v5242_v26 }
 0x108   :  { %v984_v41 = vsel %vm981_vm2, %v4490_v31, %v4491_v30 }
 0x10b   :  { %4663 = vrot.lane.b32.xlu2 %v4652_v34, %s4978_s27 }
 0x10c   :  { %4648 = vrot.lane.b32.xlu0 %v4652_v34, %s4974_s23  ;;  %4638 = vrot.lane.b32.xlu1 %v4627_v27, %s4979_s4 }
 0x10d   :  { %v5266_v42 = vpop.permute.xlu2 %4498 }
 0x10e   :  { %v4501_v0 = vunpack.i.h.bf16 %v5266_v42 }
 0x113   :  { %4668 = vrot.lane.b32.xlu2 %v4672_v45, %s4975_s24 }
 0x114   :  { %4658 = vrot.lane.b32.xlu0 %v4652_v34, %s4973_s0  ;;  %4673 = vrot.lane.b32.xlu1 %v4672_v45, %s4977_s26 }
 0x115   :  { %v5275_v52 = vpop.permute.xlu2 %4533 }
 0x11b   :  { %4678 = vrot.lane.b32.xlu2 %v4672_v45, %s4979_s4 }
 0x11c   :  { %4683 = vrot.lane.b32.xlu1 %v4672_v45, %s4980_s28  ;;  %4693 = vrot.lane.b32.xlu0 %v4692_v54, %s4976_s25 }
 0x11d   :  { %v5290_v63 = vpop.permute.xlu2 %4548 }
 0x11e   :  { %v5284_v57 = vpop.permute.xlu1 %4478  ;;  %v5286_v58 = vpop.permute.xlu0 %4468  ;;  %v4550_v1 = vunpack.i.l.bf16 %v5290_v63 }
 0x11f   :  { %v4471_v59 = vunpack.i.h.bf16 %v5286_v58  ;;  %v4470_v62 = vunpack.i.l.bf16 %v5286_v58  ;;  %v4481_v11 = vunpack.i.h.bf16 %v5284_v57  ;;  %v4480_v12 = vunpack.i.l.bf16 %v5284_v57 }
 0x120   :  { %v5302_v5 = vsel %vm981_vm2, %v4501_v0, %v4550_v1 }
 0x121   :  { %v1484_v3 = vsel %vm1481_vm1, %v4470_v62, %v4471_v59  ;;  %v1250_v21 = vsel %vm1247_vm4, %v4480_v12, %v4481_v11 }
 0x122   :  { %1736 = vmatpush.msra.mxu2 %v1484_v3  ;;  %v527_v3 = vld [vmem:[#allocation5 + $0x78] sm:$0xff] }
 0x123   :  { %4698 = vrot.lane.b32.xlu2 %v4692_v54, %s4973_s0 }
 0x124   :  { %4708 = vrot.lane.b32.xlu0 %v4707_v4, %s4975_s24  ;;  %4688 = vrot.lane.b32.xlu1 %v4692_v54, %s4974_s23 }
 0x125   :  { %v5315_v15 = vpop.permute.xlu2 %4563 }
 0x126   :  { %v5307_v9 = vpop.permute.xlu0 %4473  ;;  %v5309_v10 = vpop.permute.xlu1 %4493  ;;  %v4565_v36 = vunpack.i.l.bf16 %v5315_v15 }
 0x127   :  { %v4476_v13 = vunpack.i.h.bf16 %v5307_v9  ;;  %v4475_v14 = vunpack.i.l.bf16 %v5307_v9  ;;  %v4496_v37 = vunpack.i.h.bf16 %v5309_v10  ;;  %v4495_v38 = vunpack.i.l.bf16 %v5309_v10 }
 0x129   :  { %v1367_v16 = vsel %vm1364_vm3, %v4475_v14, %v4476_v13  ;;  %v867_v53 = vsel %vm864_vm6, %v4495_v38, %v4496_v37 }
 0x12a   :  { %1737 = vmatpush.msra.mxu2 %v1367_v16 }
 0x12b   :  { %4703 = vrot.lane.b32.xlu2 %v4692_v54, %s4978_s27 }
 0x12c   :  { %1738 = vmatpush.msra.mxu2 %v1250_v21  ;;  %4713 = vrot.lane.b32.xlu0 %v4707_v4, %s4977_s26 }
 0x12d   :  { %4723 = vrot.lane.b32.xlu1 %v4707_v4, %s4980_s28  ;;  %v5336_v28 = vpop.permute.xlu2 %4568 }
 0x12e   :  { %v5330_v23 = vpop.permute.xlu0 %4483  ;;  %v5332_v24 = vpop.permute.xlu1 %4508  ;;  %v4570_v29 = vunpack.i.l.bf16 %v5336_v28  ;;  %v6976_v20 = vunpack.i.h.bf16 %v5336_v28 }
 0x12f   :  { %v4486_v25 = vunpack.i.h.bf16 %v5330_v23  ;;  %v4485_v27 = vunpack.i.l.bf16 %v5330_v23 }
 0x130   :  { %v1483_v34 = vsel %vm1481_vm1, %v4570_v29, %v4470_v62  ;;  %v511_v62 = vmin.f32 %v495_v43, 1.0 }
 0x131   :  { %v1133_v33 = vsel %vm1130_vm5, %v4485_v27, %v4486_v25  ;;  %1713 = vmatpush.msra.mxu1 %v1483_v34 }
 0x132   :  { %1739 = vmatpush.msra.mxu2 %v1133_v33 }
 0x133   :  { %4718 = vrot.lane.b32.xlu2 %v4707_v4, %s4979_s4  ;;  %v5387_v4 = vmul.f32 %v527_v3, %v511_v62 }
 0x134   :  { %1740 = vmatpush.msra.mxu2 %v5184_v47  ;;  %4733 = vrot.lane.b32.xlu0 %v4732_v35, %s4976_s25 }
 0x135   :  { %1356 = vrot.lane.b32.xlu1 %v5282_v56, %s4976_s25  ;;  %v5369_v50 = vpop.permute.xlu2 %4573  ;;  %v4757_v33 = vpack.i.bf16 0.0, %v5387_v4 }
 0x136   :  { %v5363_v45 = vpop.permute.xlu0 %4503  ;;  %v5365_v46 = vpop.permute.xlu1 %4518  ;;  %1741 = vmatpush.msra.mxu2 %v984_v41  ;;  %v4575_v54 = vunpack.i.l.bf16 %v5369_v50  ;;  %v6981_v3 = vunpack.i.h.bf16 %v5369_v50 }
 0x137   :  { %v4506_v47 = vunpack.i.h.bf16 %v5363_v45  ;;  %v6978_v49 = vunpack.i.l.bf16 %v5363_v45 }
 0x138   :  { %1742 = vmatpush.msra.mxu2 %v867_v53  ;;  %v1366_v0 = vsel %vm1364_vm3, %v4575_v54, %v4475_v14  ;;  %v4535_v53 = vunpack.i.l.bf16 %v5275_v52 }
 0x139   :  { %v750_v55 = vsel %vm747_vm7, %v6978_v49, %v4506_v47  ;;  %1714 = vmatpush.msra.mxu1 %v1366_v0 }
 0x13a   :  { %1743 = vmatpush.msra.mxu2 %v750_v55 }
 0x13b   :  { %1473 = vrot.lane.b32.xlu2 %v5282_v56, %s4974_s23 }
 0x13c   :  { %4743 = vrot.lane.b32.xlu0 %v4732_v35, %s4978_s27 }
 0x13d   :  { %4728 = vrot.lane.b32.xlu1 %v4732_v35, %s4974_s23  ;;  %v5395_v17 = vpop.permute.xlu2 %4608 }
 0x13e   :  { %v5389_v6 = vpop.permute.xlu0 %4513  ;;  %v5391_v7 = vpop.permute.xlu1 %4523  ;;  %v4610_v21 = vunpack.i.l.bf16 %v5395_v17 }
 0x13f   :  { %v4516_v16 = vunpack.i.h.bf16 %v5389_v6  ;;  %v6977_v14 = vunpack.i.l.bf16 %v5389_v6 }
 0x140   :  { %v1488_v39 = vsel %vm1481_vm1, %v6976_v20, %v4610_v21 }
 0x141   :  { %v633_v34 = vsel %vm630_vm8, %v6977_v14, %v4516_v16 }
 0x142   :  { %1744 = vmatpush.msra.mxu2 %v633_v34 }
 0x143   :  { %1239 = vrot.lane.b32.xlu2 %v5282_v56, %s4973_s0 }
 0x144   :  { %1828 = vmatpush.msrb.mxu2 %v1488_v39  ;;  %4758 = vrot.lane.b32.xlu0 %v4757_v33, %s4973_s0  ;;  %v4536_v39 = vunpack.i.h.bf16 %v5275_v52 }
 0x145   :  { %4738 = vrot.lane.b32.xlu1 %v4732_v35, %s4973_s0  ;;  %v5421_v0 = vpop.permute.xlu2 %4613 }
 0x146   :  { %v5414_v41 = vpop.permute.xlu0 %4543  ;;  %v5416_v43 = vpop.permute.xlu1 %4528  ;;  %v4615_v34 = vunpack.i.l.bf16 %v5421_v0  ;;  %v1365_v49 = vsel %vm1364_vm3, %v4536_v39, %v4575_v54 }
 0x147   :  { %v4531_v55 = vunpack.i.h.bf16 %v5416_v43  ;;  %v4530_v62 = vunpack.i.l.bf16 %v5416_v43  ;;  %v6979_v54 = vunpack.i.l.bf16 %v5414_v41  ;;  %v7003_v43 = vunpack.i.h.bf16 %v5369_v50 }
 0x148   :  { %v1371_v14 = vsel %vm1364_vm3, %v6981_v3, %v4615_v34 }
 0x149   :  { %v1482_v35 = vsel %vm1481_vm1, %v4531_v55, %v4570_v29  ;;  %v1485_v20 = vsel %vm1481_vm1, %v4471_v59, %v4530_v62  ;;  %1829 = vmatpush.msrb.mxu2 %v1371_v14  ;;  %v1368_v29 = vsel %vm1364_vm3, %v4476_v13, %v4535_v53  ;;  %v6992_v13 = vunpack.i.l.bf16 %v5266_v42 }
 0x14a   :  { %1690 = vmatpush.msra.mxu0 %v1482_v35  ;;  %1759 = vmatpush.msra.mxu3 %v1485_v20  ;;  %v6989_v55 = vunpack.i.l.bf16 %v5332_v24 }
 0x14b   :  { %4748 = vrot.lane.b32.xlu2 %v4757_v33, %s4974_s23 }
 0x14c   :  { %1691 = vmatpush.msra.mxu0 %v1365_v49  ;;  %1760 = vmatpush.msra.mxu3 %v1368_v29  ;;  %v1134_v49 = vsel %vm1130_vm5, %v4486_v25, %v6979_v54  ;;  %v868_v3 = vsel %vm864_vm6, %v4496_v37, %v6989_v55 }
 0x14d   :  { %4763 = vrot.lane.b32.xlu0 %v4757_v33, %s4978_s27  ;;  %4753 = vrot.lane.b32.xlu1 %v4757_v33, %s4976_s25  ;;  %v5454_v20 = vpop.permute.xlu2 %4628  ;;  %v4772_v33 = vpack.i.bf16 %v5387_v4, %v5328_v22 }
 0x14e   :  { %v5448_v58 = vpop.permute.xlu0 %4553  ;;  %v5450_v59 = vpop.permute.xlu1 %4538 }
 0x14f   :  { %v6980_v14 = vunpack.i.l.bf16 %v5450_v59  ;;  %v4541_v25 = vunpack.i.h.bf16 %v5450_v59 }
 0x151   :  { %v1251_v9 = vsel %vm1247_vm4, %v4481_v11, %v6980_v14  ;;  %v6986_v14 = vunpack.i.l.bf16 %v5391_v7 }
 0x152   :  { %1761 = vmatpush.msra.mxu3 %v1251_v9  ;;  %v985_v9 = vsel %vm981_vm2, %v4491_v30, %v6992_v13  ;;  %v6985_v30 = vunpack.i.h.bf16 %v5395_v17 }
 0x153   :  { %4773 = vrot.lane.b32.xlu2 %v4772_v33, %s4977_s26 }
 0x154   :  { %1762 = vmatpush.msra.mxu3 %v1134_v49  ;;  %v6988_v49 = vunpack.i.l.bf16 %v5365_v46 }
 0x155   :  { %4768 = vrot.lane.b32.xlu0 %v4772_v33, %s4975_s24  ;;  %1122 = vrot.lane.b32.xlu1 %v5282_v56, %s4978_s27  ;;  %v5481_v29 = vpop.permute.xlu2 %4633 }
 0x156   :  { %v5474_v11 = vpop.permute.xlu0 %4558  ;;  %v5476_v39 = vpop.permute.xlu1 %4578  ;;  %1763 = vmatpush.msra.mxu3 %v5186_v48  ;;  %v751_v57 = vsel %vm747_vm7, %v4506_v47, %v6988_v49  ;;  %v634_v47 = vsel %vm630_vm8, %v4516_v16, %v6986_v14 }
 0x157   :  { %v4580_v35 = vunpack.i.l.bf16 %v5476_v39  ;;  %v4561_v49 = vunpack.i.h.bf16 %v5474_v11 }
 0x158   :  { %1764 = vmatpush.msra.mxu3 %v985_v9 }
 0x159   :  { %v1248_v54 = vsel %vm1247_vm4, %v4541_v25, %v4580_v35  ;;  %v1249_v48 = vsel %vm1247_vm4, %v4580_v35, %v4480_v12  ;;  %v6984_v12 = vunpack.i.h.bf16 %v5421_v0 }
 0x15a   :  { %1692 = vmatpush.msra.mxu0 %v1248_v54  ;;  %1715 = vmatpush.msra.mxu1 %v1249_v48 }
 0x15b   :  { %1765 = vmatpush.msra.mxu3 %v868_v3  ;;  %4783 = vrot.lane.b32.xlu2 %v4772_v33, %s4980_s28  ;;  %v4546_v3 = vunpack.i.h.bf16 %v5414_v41  ;;  %v1372_v16 = vsel %vm1364_vm3, %v4615_v34, %v6984_v12  ;;  %v4560_v34 = vunpack.i.l.bf16 %v5474_v11  ;;  %v4566_v11 = vunpack.i.h.bf16 %v5315_v15 }
 0x15d   :  { %1766 = vmatpush.msra.mxu3 %v751_v57  ;;  %4778 = vrot.lane.b32.xlu0 %v4772_v33, %s4979_s4  ;;  %v5521_v35 = vpop.permute.xlu2 %4653  ;;  %v1489_v33 = vsel %vm1481_vm1, %v4610_v21, %v6985_v30  ;;  %v4555_v57 = vunpack.i.l.bf16 %v5448_v58  ;;  %v4511_v21 = vunpack.i.h.bf16 %v5332_v24 }
 0x15e   :  { %973 = vrot.lane.b32.xlu1 %v5273_v51, %s4975_s24  ;;  %v5510_v37 = vpop.permute.xlu0 %4583  ;;  %v5512_v54 = vpop.permute.xlu1 %4588  ;;  %v4655_v12 = vunpack.i.l.bf16 %v5521_v35 }
 0x15f   :  { %v4585_v25 = vunpack.i.l.bf16 %v5510_v37  ;;  %1767 = vmatpush.msra.mxu3 %v634_v47  ;;  %v4521_v47 = vunpack.i.h.bf16 %v5365_v46 }
 0x161   :  { %1851 = vmatpush.msrb.mxu3 %v1489_v33  ;;  %v1131_v9 = vsel %vm1130_vm5, %v4546_v3, %v4585_v25  ;;  %v1132_v48 = vsel %vm1130_vm5, %v4585_v25, %v4485_v27  ;;  %v4526_v3 = vunpack.i.h.bf16 %v5391_v7  ;;  %v865_v25 = vsel %vm864_vm6, %v4511_v21, %v4555_v57 }
 0x162   :  { %1693 = vmatpush.msra.mxu0 %v1131_v9  ;;  %1716 = vmatpush.msra.mxu1 %v1132_v48  ;;  %v866_v33 = vsel %vm864_vm6, %v4555_v57, %v4495_v38  ;;  %v7001_v9 = vunpack.i.l.bf16 %v5389_v6  ;;  %v4581_v57 = vunpack.i.h.bf16 %v5476_v39  ;;  %v4635_v39 = vunpack.i.l.bf16 %v5481_v29 }
 0x163   :  { %1852 = vmatpush.msrb.mxu3 %v1372_v16  ;;  %622 = vrot.lane.b32.xlu2 %v5273_v51, %s4980_s28  ;;  %v631_v16 = vsel %vm630_vm8, %v4526_v3, %v4565_v36 }
 0x164   :  { %1694 = vmatpush.msra.mxu0 %v5198_v60  ;;  %1717 = vmatpush.msra.mxu1 %v5182_v44  ;;  %v983_v44 = vsel %vm981_vm2, %v4550_v1, %v4490_v31  ;;  %v748_v1 = vsel %vm747_vm7, %v4521_v47, %v4560_v34  ;;  %v632_v10 = vsel %vm630_vm8, %v4565_v36, %v7001_v9 }
 0x165   :  { %856 = vrot.lane.b32.xlu0 %v5273_v51, %s4977_s26  ;;  %v5558_v60 = vpop.permute.xlu2 %4663 }
 0x166   :  { %739 = vrot.lane.b32.xlu1 %v5273_v51, %s4979_s4  ;;  %v5548_v23 = vpop.permute.xlu0 %4593  ;;  %v5550_v27 = vpop.permute.xlu1 %4598  ;;  %1695 = vmatpush.msra.mxu0 %v5302_v5  ;;  %v7000_v5 = vunpack.i.l.bf16 %v5363_v45  ;;  %v4665_v52 = vunpack.i.l.bf16 %v5558_v60 }
 0x167   :  { %1718 = vmatpush.msra.mxu1 %v983_v44 }
 0x168   :  { %1696 = vmatpush.msra.mxu0 %v865_v25  ;;  %v749_v31 = vsel %vm747_vm7, %v4560_v34, %v7000_v5  ;;  %v4586_v25 = vunpack.i.h.bf16 %v5510_v37  ;;  %v5599_v5 = vld [vmem:[#allocation10] sm:$0xff]  ;;  %v7006_v37 = vunpack.i.l.bf16 %v5266_v42 }
 0x169   :  { %1719 = vmatpush.msra.mxu1 %v866_v33  ;;  %4407 = vmatmul.msk.f32.vlgmr.msra.gmra.mxu2 %vm1676_vm9, %v5599_v5 }
 0x16a   :  { %1697 = vmatpush.msra.mxu0 %v748_v1  ;;  %4409 = vmatmul.msk.f32.vlgmr.msra.gmra.mxu3 %vm1676_vm9, %v5599_v5 }
 0x16b   :  { %1720 = vmatpush.msra.mxu1 %v749_v31  ;;  %v6987_v31 = vunpack.i.h.bf16 %v5512_v54 }
 0x16c   :  { %1698 = vmatpush.msra.mxu0 %v631_v16  ;;  %v4590_v16 = vunpack.i.l.bf16 %v5512_v54 }
 0x16d   :  { %1721 = vmatpush.msra.mxu1 %v632_v10  ;;  %v5582_v34 = vpop.permute.xlu2 %4668  ;;  %4403 = vmatmul.msk.f32.vlgmr.msra.gmra.mxu0 %vm1676_vm9, %v5599_v5 }
 0x16e   :  { %v5575_v38 = vpop.permute.xlu0 %4603  ;;  %v5577_v48 = vpop.permute.xlu1 %4618  ;;  %4405 = vmatmul.msk.f32.vlgmr.msra.gmra.mxu1 %vm1676_vm9, %v5599_v5 }
 0x16f   :  { %v6983_v45 = vunpack.i.h.bf16 %v5577_v48  ;;  %v4620_v21 = vunpack.i.l.bf16 %v5577_v48  ;;  %v4606_v55 = vunpack.i.h.bf16 %v5575_v38 }
 0x171   :  { %v1254_v6 = vsel %vm1247_vm4, %v4581_v57, %v4620_v21  ;;  %v1255_v44 = vsel %vm1247_vm4, %v4620_v21, %v6983_v45  ;;  %v6990_v21 = vunpack.i.h.bf16 %v5290_v63  ;;  %v4600_v45 = vunpack.i.l.bf16 %v5550_v27 }
 0x172   :  { %1830 = vmatpush.msrb.mxu2 %v1254_v6  ;;  %1853 = vmatpush.msrb.mxu3 %v1255_v44  ;;  %v4596_v6 = vunpack.i.h.bf16 %v5548_v23  ;;  %v4595_v44 = vunpack.i.l.bf16 %v5548_v23 }
 0x175   :  { %v5597_v1 = vpop.permute.xlu2 %4678 }
 0x176   :  { %v5590_v47 = vpop.permute.xlu0 %4643  ;;  %v5592_v3 = vpop.permute.xlu1 %4623 }
 0x177   :  { %v6982_v33 = vunpack.i.h.bf16 %v5592_v3  ;;  %v4625_v36 = vunpack.i.l.bf16 %v5592_v3 }
 0x179   :  { %v1137_v9 = vsel %vm1130_vm5, %v4586_v25, %v4625_v36  ;;  %v1138_v10 = vsel %vm1130_vm5, %v4625_v36, %v6982_v33  ;;  %v6991_v36 = vunpack.i.h.bf16 %v5448_v58  ;;  %v4601_v33 = vunpack.i.h.bf16 %v5550_v27 }
 0x17a   :  { %1831 = vmatpush.msrb.mxu2 %v1137_v9  ;;  %1854 = vmatpush.msrb.mxu3 %v1138_v10  ;;  %v988_v9 = vsel %vm981_vm2, %v6990_v21, %v4590_v16  ;;  %v989_v10 = vsel %vm981_vm2, %v4590_v16, %v6987_v31  ;;  %v872_v31 = vsel %vm864_vm6, %v4595_v44, %v4596_v6 }
 0x17b   :  { %v871_v16 = vsel %vm864_vm6, %v6991_v36, %v4595_v44  ;;  %v7002_v36 = vunpack.i.h.bf16 %v5336_v28  ;;  %v754_v44 = vsel %vm747_vm7, %v4561_v49, %v4600_v45  ;;  %v1369_v28 = vsel %vm1364_vm3, %v4535_v53, %v4655_v12 }
 0x17c   :  { %1832 = vmatpush.msrb.mxu2 %v5218_v8  ;;  %1855 = vmatpush.msrb.mxu3 %v5227_v18 }
 0x17d   :  { %v5637_v14 = vpop.permute.xlu2 %4698 }
 0x17e   :  { %v5631_v8 = vpop.permute.xlu0 %4648  ;;  %v5633_v18 = vpop.permute.xlu1 %4638  ;;  %1833 = vmatpush.msrb.mxu2 %v988_v9  ;;  %1856 = vmatpush.msrb.mxu3 %v989_v10  ;;  %v4605_v9 = vunpack.i.l.bf16 %v5575_v38  ;;  %v5648_v10 = vld [vmem:[#allocation10 + $0x8] sm:$0xff] }
 0x17f   :  { %v4650_v30 = vunpack.i.l.bf16 %v5631_v8  ;;  %4408 = vmatmul.msk.f32.gmra.mxu2 %vm1676_vm9, %v5648_v10  ;;  %4410 = vmatmul.msk.f32.gmra.mxu3 %vm1676_vm9, %v5648_v10 }
 0x180   :  { %1834 = vmatpush.msrb.mxu2 %v871_v16  ;;  %1857 = vmatpush.msrb.mxu3 %v872_v31  ;;  %v755_v31 = vsel %vm747_vm7, %v4600_v45, %v4601_v33  ;;  %v637_v15 = vsel %vm630_vm8, %v4566_v11, %v4605_v9  ;;  %v4630_v16 = vunpack.i.l.bf16 %v5454_v20 }
 0x181   :  { %v1486_v21 = vsel %vm1481_vm1, %v4530_v62, %v4650_v30  ;;  %v1487_v13 = vsel %vm1481_vm1, %v4650_v30, %v7002_v36  ;;  %v1370_v62 = vsel %vm1364_vm3, %v4655_v12, %v7003_v43  ;;  %4404 = vmatmul.msk.f32.gmra.mxu0 %vm1676_vm9, %v5648_v10  ;;  %4406 = vmatmul.msk.f32.gmra.mxu1 %vm1676_vm9, %v5648_v10  ;;  %v7004_v12 = vunpack.i.l.bf16 %v5450_v59 }
 0x182   :  { %1782 = vmatpush.msrb.mxu0 %v1486_v21  ;;  %1805 = vmatpush.msrb.mxu1 %v1487_v13  ;;  %v638_v13 = vsel %vm630_vm8, %v4605_v9, %v4606_v55  ;;  %v7005_v9 = vunpack.i.l.bf16 %v5414_v41  ;;  %v1136_v59 = vsel %vm1130_vm5, %v4665_v52, %v4586_v25  ;;  %v4640_v41 = vunpack.i.l.bf16 %v5633_v18 }
 0x183   :  { %1835 = vmatpush.msrb.mxu2 %v754_v44  ;;  %1858 = vmatpush.msrb.mxu3 %v755_v31  ;;  %v986_v25 = vsel %vm981_vm2, %v7006_v37, %v4630_v16  ;;  %v7007_v43 = vunpack.i.h.bf16 %v5290_v63  ;;  %v7010_v63 = vunpack.i.l.bf16 %v5365_v46 }
 0x184   :  { %1783 = vmatpush.msrb.mxu0 %v1369_v28  ;;  %1806 = vmatpush.msrb.mxu1 %v1370_v62  ;;  %v1135_v44 = vsel %vm1130_vm5, %v7005_v9, %v4665_v52 }
 0x185   :  { %1836 = vmatpush.msrb.mxu2 %v637_v15  ;;  %1859 = vmatpush.msrb.mxu3 %v638_v13  ;;  %v5683_v53 = vpop.permute.xlu2 %4703  ;;  %v987_v62 = vsel %vm981_vm2, %v4630_v16, %v7007_v43  ;;  %v7009_v13 = vunpack.i.h.bf16 %v5448_v58  ;;  %v752_v52 = vsel %vm747_vm7, %v7010_v63, %v4640_v41  ;;  %v4670_v63 = vunpack.i.l.bf16 %v5582_v34 }
 0x186   :  { %v5673_v30 = vpop.permute.xlu0 %4658  ;;  %v5675_v45 = vpop.permute.xlu1 %4673  ;;  %v6993_v43 = vunpack.i.h.bf16 %v5683_v53 }
 0x187   :  { %v4660_v50 = vunpack.i.l.bf16 %v5673_v30  ;;  %4415 = vmatmul.msk.f32.vlgmr.msrb.gmra.mxu2 %vm1676_vm9, %v5599_v5  ;;  %4417 = vmatmul.msk.f32.vlgmr.msrb.gmra.mxu3 %vm1676_vm9, %v5599_v5  ;;  %v870_v42 = vsel %vm864_vm6, %v4635_v39, %v7009_v13 }
 0x189   :  { %v1252_v21 = vsel %vm1247_vm4, %v7004_v12, %v4660_v50  ;;  %v1253_v36 = vsel %vm1247_vm4, %v4660_v50, %v4581_v57  ;;  %v753_v50 = vsel %vm747_vm7, %v4640_v41, %v4561_v49  ;;  %v4661_v41 = vunpack.i.h.bf16 %v5673_v30 }
 0x18a   :  { %1784 = vmatpush.msrb.mxu0 %v1252_v21  ;;  %1807 = vmatpush.msrb.mxu1 %v1253_v36  ;;  %v4651_v21 = vunpack.i.h.bf16 %v5631_v8 }
 0x18c   :  { %1785 = vmatpush.msrb.mxu0 %v1135_v44  ;;  %1808 = vmatpush.msrb.mxu1 %v1136_v59  ;;  %v6995_v59 = vunpack.i.h.bf16 %v5637_v14 }
 0x18d   :  { %v5710_v28 = vpop.permute.xlu2 %4718 }
 0x18e   :  { %v5703_v57 = vpop.permute.xlu1 %4683  ;;  %1786 = vmatpush.msrb.mxu0 %v5200_v61  ;;  %1809 = vmatpush.msrb.mxu1 %v5207_v2  ;;  %v5707_v31 = vpop.permute.xlu0 %4693  ;;  %v4645_v61 = vunpack.i.l.bf16 %v5590_v47  ;;  %v7008_v2 = vunpack.i.l.bf16 %v5332_v24  ;;  %v7011_v24 = vunpack.i.l.bf16 %v5391_v7  ;;  %v4720_v30 = vunpack.i.l.bf16 %v5710_v28 }
 0x18f   :  { %4416 = vmatmul.msk.f32.gmra.mxu2 %vm1676_vm9, %v5648_v10  ;;  %v6996_v46 = vunpack.i.h.bf16 %v5707_v31  ;;  %v4695_v49 = vunpack.i.l.bf16 %v5707_v31  ;;  %4418 = vmatmul.msk.f32.gmra.mxu3 %vm1676_vm9, %v5648_v10 }
 0x190   :  { %1787 = vmatpush.msrb.mxu0 %v986_v25  ;;  %1810 = vmatpush.msrb.mxu1 %v987_v62  ;;  %v869_v15 = vsel %vm864_vm6, %v7008_v2, %v4635_v39  ;;  %v635_v12 = vsel %vm630_vm8, %v7011_v24, %v4645_v61  ;;  %v636_v58 = vsel %vm630_vm8, %v4645_v61, %v4566_v11  ;;  %v4656_v11 = vunpack.i.h.bf16 %v5521_v35 }
 0x191   :  { %v4700_v39 = vunpack.i.l.bf16 %v5637_v14  ;;  %v4705_v62 = vunpack.i.l.bf16 %v5683_v53  ;;  %v1376_v2 = vsel %vm1364_vm3, %v4695_v49, %v6996_v46  ;;  %v756_v23 = vsel %vm747_vm7, %v4601_v33, %v4720_v30 }
 0x192   :  { %1788 = vmatpush.msrb.mxu0 %v869_v15  ;;  %1811 = vmatpush.msrb.mxu1 %v870_v42  ;;  %v1375_v61 = vsel %vm1364_vm3, %v4656_v11, %v4695_v49  ;;  %v4666_v15 = vunpack.i.h.bf16 %v5558_v60 }
 0x193   :  { %v1258_v13 = vsel %vm1247_vm4, %v4661_v41, %v4700_v39  ;;  %v1259_v42 = vsel %vm1247_vm4, %v4700_v39, %v6995_v59  ;;  %v1142_v49 = vsel %vm1130_vm5, %v4705_v62, %v6993_v43  ;;  %v4676_v39 = vunpack.i.h.bf16 %v5675_v45 }
 0x194   :  { %1789 = vmatpush.msrb.mxu0 %v752_v52  ;;  %1812 = vmatpush.msrb.mxu1 %v753_v50  ;;  %v6994_v50 = vunpack.i.h.bf16 %v5582_v34 }
 0x195   :  { %v5744_v9 = vpop.permute.xlu2 %1473 }
 0x196   :  { %1790 = vmatpush.msrb.mxu0 %v635_v12  ;;  %1813 = vmatpush.msrb.mxu1 %v636_v58  ;;  %v5738_v36 = vpop.permute.xlu0 %4708  ;;  %v5740_v16 = vpop.permute.xlu1 %4688  ;;  %v1141_v58 = vsel %vm1130_vm5, %v4666_v15, %v4705_v62 }
 0x197   :  { %v6997_v7 = vunpack.i.h.bf16 %v5740_v16  ;;  %v4690_v44 = vunpack.i.l.bf16 %v5740_v16  ;;  %4411 = vmatmul.msk.f32.vlgmr.msrb.gmra.mxu0 %vm1676_vm9, %v5599_v5  ;;  %4413 = vmatmul.msk.f32.vlgmr.msrb.gmra.mxu1 %vm1676_vm9, %v5599_v5 }
 0x199   :  { %v1492_v37 = vsel %vm1481_vm1, %v4651_v21, %v4690_v44  ;;  %v1493_v25 = vsel %vm1481_vm1, %v4690_v44, %v6997_v7  ;;  %v4631_v44 = vunpack.i.h.bf16 %v5454_v20 }
 0x19a   :  { %1920 = vmatpush.msra.mxu2 %v1492_v37  ;;  %1943 = vmatpush.msra.mxu3 %v1493_v25  ;;  %v4675_v37 = vunpack.i.l.bf16 %v5675_v45  ;;  %v4636_v25 = vunpack.i.h.bf16 %v5481_v29 }
 0x19b   :  { %v992_v62 = vsel %vm981_vm2, %v4631_v44, %v4670_v63 }
 0x19c   :  { %1921 = vmatpush.msra.mxu2 %v1375_v61  ;;  %1944 = vmatpush.msra.mxu3 %v1376_v2  ;;  %v6999_v61 = vunpack.i.h.bf16 %v5597_v1  ;;  %v4680_v2 = vunpack.i.l.bf16 %v5597_v1 }
 0x19d   :  { %v5783_v24 = vpop.permute.xlu2 %1239 }
 0x19e   :  { %v5780_v52 = vpop.permute.xlu0 %4713  ;;  %1922 = vmatpush.msra.mxu2 %v1258_v13  ;;  %1945 = vmatpush.msra.mxu3 %v1259_v42  ;;  %v4641_v13 = vunpack.i.h.bf16 %v5633_v18  ;;  %v993_v42 = vsel %vm981_vm2, %v4670_v63, %v6994_v50  ;;  %v4646_v63 = vunpack.i.h.bf16 %v5590_v47  ;;  %v759_v59 = vsel %vm747_vm7, %v4680_v2, %v6999_v61 }
 0x19f   :  { %v5785_v12 = vpop.permute.xlu1 %4723  ;;  %4412 = vmatmul.msk.f32.gmra.mxu0 %vm1676_vm9, %v5648_v10  ;;  %4414 = vmatmul.msk.f32.gmra.mxu1 %vm1676_vm9, %v5648_v10 }
 0x1a0   :  { %1923 = vmatpush.msra.mxu2 %v1141_v58  ;;  %1946 = vmatpush.msra.mxu3 %v1142_v49  ;;  %v875_v58 = vsel %vm864_vm6, %v4636_v25, %v4675_v37  ;;  %v876_v49 = vsel %vm864_vm6, %v4675_v37, %v4676_v39  ;;  %v758_v50 = vsel %vm747_vm7, %v4641_v13, %v4680_v2 }
 0x1a1   :  { %v757_v29 = vsel %vm747_vm7, %v4720_v30, %v4641_v13  ;;  %v7019_v30 = vunpack.i.h.bf16 %v5637_v14 }
 0x1a2   :  { %1924 = vmatpush.msra.mxu2 %v5252_v32  ;;  %1947 = vmatpush.msra.mxu3 %v5264_v40  ;;  %v6998_v32 = vunpack.i.h.bf16 %v5703_v57  ;;  %v4685_v40 = vunpack.i.l.bf16 %v5703_v57 }
 0x1a4   :  { %1925 = vmatpush.msra.mxu2 %v992_v62  ;;  %1948 = vmatpush.msra.mxu3 %v993_v42  ;;  %v641_v37 = vsel %vm630_vm8, %v4646_v63, %v4685_v40 }
 0x1a5   :  { %v4749_v62 = vpop.permute.xlu2 %4748 }
 0x1a6   :  { %v5820_v43 = vpop.permute.xlu0 %4733  ;;  %1926 = vmatpush.msra.mxu2 %v875_v58  ;;  %1949 = vmatpush.msra.mxu3 %v876_v49  ;;  %v4751_v46 = vunpack.i.h.bf16 %v4749_v62  ;;  %v4750_v7 = vunpack.i.l.bf16 %v4749_v62  ;;  %v642_v58 = vsel %vm630_vm8, %v4685_v40, %v6998_v32  ;;  %v7013_v32 = vunpack.i.h.bf16 %v5421_v0 }
 0x1a7   :  { %v5823_v42 = vpop.permute.xlu1 %1356  ;;  %v4735_v2 = vunpack.i.l.bf16 %v5820_v43 }
 0x1a8   :  { %1927 = vmatpush.msra.mxu2 %v758_v50  ;;  %1950 = vmatpush.msra.mxu3 %v759_v59  ;;  %v1497_v49 = vsel %vm1481_vm1, %v4750_v7, %v4751_v46 }
 0x1a9   :  { %v1373_v61 = vsel %vm1364_vm3, %v7013_v32, %v4735_v2  ;;  %v7014_v32 = vunpack.i.h.bf16 %v5577_v48  ;;  %v4715_v48 = vunpack.i.l.bf16 %v5780_v52 }
 0x1aa   :  { %1928 = vmatpush.msra.mxu2 %v641_v37  ;;  %1951 = vmatpush.msra.mxu3 %v642_v58  ;;  %v7012_v37 = vunpack.i.h.bf16 %v5395_v17  ;;  %v1374_v17 = vsel %vm1364_vm3, %v4735_v2, %v4656_v11  ;;  %v7015_v2 = vunpack.i.h.bf16 %v5592_v3 }
 0x1ab   :  { %4423 = vmatmul.msk.f32.vlgmr.msra.gmra.mxu2 %vm1676_vm9, %v5599_v5  ;;  %4425 = vmatmul.msk.f32.vlgmr.msra.gmra.mxu3 %vm1676_vm9, %v5599_v5 }
 0x1ac   :  { %2035 = vmatpush.msrb.mxu3 %v1497_v49 }
 0x1ae   :  { %v5842_v59 = vpop.permute.xlu0 %4743 }
 0x1af   :  { %v5844_v50 = vpop.permute.xlu1 %4728 }
 0x1b0   :  { %v4731_v62 = vunpack.i.h.bf16 %v5844_v50  ;;  %v4730_v40 = vunpack.i.l.bf16 %v5844_v50 }
 0x1b2   :  { %v1490_v46 = vsel %vm1481_vm1, %v7012_v37, %v4730_v40  ;;  %v1491_v58 = vsel %vm1481_vm1, %v4730_v40, %v4651_v21  ;;  %v1496_v49 = vsel %vm1481_vm1, %v4731_v62, %v4750_v7  ;;  %v4745_v7 = vunpack.i.l.bf16 %v5842_v59 }
 0x1b3   :  { %1874 = vmatpush.msra.mxu0 %v1490_v46  ;;  %1897 = vmatpush.msra.mxu1 %v1491_v58  ;;  %v1495_v47 = vsel %vm1481_vm1, %v5744_v9, %v4731_v62  ;;  %v4716_v62 = vunpack.i.h.bf16 %v5780_v52  ;;  %v7020_v52 = vunpack.i.h.bf16 %v5683_v53  ;;  %v7021_v53 = vunpack.i.h.bf16 %v5582_v34 }
 0x1b4   :  { %2012 = vmatpush.msrb.mxu2 %v1496_v49  ;;  %4426 = vmatmul.msk.f32.gmra.mxu3 %vm1676_vm9, %v5648_v10  ;;  %v1139_v40 = vsel %vm1130_vm5, %v7015_v2, %v4745_v7  ;;  %v1140_v37 = vsel %vm1130_vm5, %v4745_v7, %v4666_v15  ;;  %v7016_v49 = vunpack.i.h.bf16 %v5512_v54  ;;  %v874_v54 = vsel %vm864_vm6, %v4715_v48, %v4636_v25 }
 0x1b5   :  { %1875 = vmatpush.msra.mxu0 %v1373_v61  ;;  %1898 = vmatpush.msra.mxu1 %v1374_v17  ;;  %v4710_v61 = vunpack.i.l.bf16 %v5738_v36  ;;  %v4746_v25 = vunpack.i.h.bf16 %v5842_v59 }
 0x1b6   :  { %v4759_v8 = vpop.permute.xlu0 %4758  ;;  %4424 = vmatmul.msk.f32.gmra.mxu2 %vm1676_vm9, %v5648_v10 }
 0x1b7   :  { %v5868_v21 = vpop.permute.xlu1 %4738  ;;  %v4761_v3 = vunpack.i.h.bf16 %v4759_v8  ;;  %v990_v60 = vsel %vm981_vm2, %v7016_v49, %v4710_v61  ;;  %v991_v15 = vsel %vm981_vm2, %v4710_v61, %v4631_v44  ;;  %v4760_v17 = vunpack.i.l.bf16 %v4759_v8 }
 0x1b8   :  { %v4740_v0 = vunpack.i.l.bf16 %v5868_v21  ;;  %v4741_v7 = vunpack.i.h.bf16 %v5868_v21 }
 0x1ba   :  { %v1256_v35 = vsel %vm1247_vm4, %v7014_v32, %v4740_v0  ;;  %v1257_v11 = vsel %vm1247_vm4, %v4740_v0, %v4661_v41  ;;  %v4736_v41 = vunpack.i.h.bf16 %v5820_v43  ;;  %v1262_v21 = vsel %vm1247_vm4, %v4741_v7, %v4760_v17 }
 0x1bb   :  { %1876 = vmatpush.msra.mxu0 %v1256_v35  ;;  %1899 = vmatpush.msra.mxu1 %v1257_v11  ;;  %v1263_v35 = vsel %vm1247_vm4, %v4760_v17, %v4761_v3  ;;  %v4711_v11 = vunpack.i.h.bf16 %v5738_v36  ;;  %v4721_v3 = vunpack.i.h.bf16 %v5710_v28 }
 0x1bd   :  { %1877 = vmatpush.msra.mxu0 %v1139_v40  ;;  %1900 = vmatpush.msra.mxu1 %v1140_v37 }
 0x1bf   :  { %v4764_v46 = vpop.permute.xlu0 %4763  ;;  %1878 = vmatpush.msra.mxu0 %v5229_v19  ;;  %1901 = vmatpush.msra.mxu1 %v5242_v26  ;;  %v4754_v58 = vpop.permute.xlu1 %4753  ;;  %v4725_v19 = vunpack.i.l.bf16 %v5785_v12  ;;  %v873_v26 = vsel %vm864_vm6, %v4596_v6, %v4715_v48 }
 0x1c0   :  { %v4756_v0 = vunpack.i.h.bf16 %v4754_v58  ;;  %v4755_v32 = vunpack.i.l.bf16 %v4754_v58  ;;  %v4766_v20 = vunpack.i.h.bf16 %v4764_v46  ;;  %v4765_v43 = vunpack.i.l.bf16 %v4764_v46  ;;  %v4774_v6 = vpop.permute.xlu2 %4773 }
 0x1c1   :  { %1879 = vmatpush.msra.mxu0 %v990_v60  ;;  %1902 = vmatpush.msra.mxu1 %v991_v15  ;;  %v639_v27 = vsel %vm630_vm8, %v4606_v55, %v4725_v19  ;;  %v640_v33 = vsel %vm630_vm8, %v4725_v19, %v4646_v63  ;;  %v7017_v55 = vunpack.i.h.bf16 %v5740_v16  ;;  %v4776_v36 = vunpack.i.h.bf16 %v4774_v6 }
 0x1c2   :  { %v1379_v44 = vsel %vm1364_vm3, %v4736_v41, %v4755_v32  ;;  %v1380_v8 = vsel %vm1364_vm3, %v4755_v32, %v4756_v0  ;;  %v1145_v13 = vsel %vm1130_vm5, %v4746_v25, %v4765_v43  ;;  %v1146_v59 = vsel %vm1130_vm5, %v4765_v43, %v4766_v20 }
 0x1c3   :  { %1880 = vmatpush.msra.mxu0 %v873_v26  ;;  %1903 = vmatpush.msra.mxu1 %v874_v54  ;;  %v1494_v38 = vsel %vm1481_vm1, %v7017_v55, %v5744_v9  ;;  %v4775_v63 = vunpack.i.l.bf16 %v4774_v6  ;;  %v7018_v16 = vunpack.i.h.bf16 %v5707_v31  ;;  %v1378_v9 = vsel %vm1364_vm3, %v5823_v42, %v4736_v41  ;;  %v2953_v6 = vld [vmem:[#allocation11 + $0x1f8] sm:$0xff] }
 0x1c4   :  { %2013 = vmatpush.msrb.mxu2 %v1379_v44  ;;  %2036 = vmatpush.msrb.mxu3 %v1380_v8  ;;  %v4726_v19 = vunpack.i.h.bf16 %v5785_v12  ;;  %v7022_v43 = vunpack.i.h.bf16 %v5597_v1  ;;  %v2905_v1 = vld [vmem:[#allocation11 + $0x78] sm:$0xff]  ;;  %vm4084_vm1 = vcmask 261120  }
 0x1c5   :  { %1881 = vmatpush.msra.mxu0 %v756_v23  ;;  %1904 = vmatpush.msra.mxu1 %v757_v29  ;;  %v1377_v50 = vsel %vm1364_vm3, %v7018_v16, %v5823_v42  ;;  %v879_v31 = vsel %vm864_vm6, %v4716_v62, %v4775_v63  ;;  %v880_v42 = vsel %vm864_vm6, %v4775_v63, %v4776_v36  ;;  %v7023_v23 = vunpack.i.h.bf16 %v5703_v57  ;;  %v2921_v57 = vld [vmem:[#allocation11 + $0xf8] sm:$0xff]  ;;  %v2916_v36 = vld [vmem:[#allocation11 + $0xd0] sm:$0xff] }
 0x1c6   :  { %2014 = vmatpush.msrb.mxu2 %v1262_v21  ;;  %2037 = vmatpush.msrb.mxu3 %v1263_v35  ;;  %v2936_v21 = vld [vmem:[#allocation11 + $0x170] sm:$0xff]  ;;  %v2933_v55 = vld [vmem:[#allocation11 + $0x158] sm:$0xff] }
 0x1c7   :  { %v4769_v18 = vpop.permute.xlu0 %4768  ;;  %1882 = vmatpush.msra.mxu0 %v639_v27  ;;  %1905 = vmatpush.msra.mxu1 %v640_v33  ;;  %v1123_v40 = vpop.permute.xlu1 %1122  ;;  %v2952_v35 = vld [vmem:[#allocation11 + $0x1f0] sm:$0xff]  ;;  %v2903_v27 = vld [vmem:[#allocation11 + $0x68] sm:$0xff] }
 0x1c8   :  { %v4771_v61 = vunpack.i.h.bf16 %v4769_v18  ;;  %v4770_v2 = vunpack.i.l.bf16 %v4769_v18  ;;  %2015 = vmatpush.msrb.mxu2 %v1145_v13  ;;  %2038 = vmatpush.msrb.mxu3 %v1146_v59  ;;  %v4784_v46 = vpop.permute.xlu2 %4783  ;;  %v1143_v41 = vsel %vm1130_vm5, %v7020_v52, %v1123_v40  ;;  %v1144_v14 = vsel %vm1130_vm5, %v1123_v40, %v4746_v25  ;;  %v2904_v25 = vld [vmem:[#allocation11 + $0x70] sm:$0xff]  ;;  %v2919_v33 = vld [vmem:[#allocation11 + $0xe8] sm:$0xff]  ;;  %v2902_v13 = vld [vmem:[#allocation11 + $0x60] sm:$0xff] }
 0x1c9   :  { %4419 = vmatmul.msk.f32.vlgmr.msra.gmra.mxu0 %vm1676_vm9, %v5599_v5  ;;  %4421 = vmatmul.msk.f32.vlgmr.msra.gmra.mxu1 %vm1676_vm9, %v5599_v5  ;;  %v4785_v28 = vunpack.i.l.bf16 %v4784_v46  ;;  %v2935_v18 = vld [vmem:[#allocation11 + $0x168] sm:$0xff]  ;;  %v2918_v59 = vld [vmem:[#allocation11 + $0xe0] sm:$0xff]  ;;  %v2917_v40 = vld [vmem:[#allocation11 + $0xd8] sm:$0xff] }
 0x1ca   :  { %1966 = vmatpush.msrb.mxu0 %v1494_v38  ;;  %1989 = vmatpush.msrb.mxu1 %v1495_v47  ;;  %v996_v37 = vsel %vm981_vm2, %v4711_v11, %v4770_v2  ;;  %v997_v48 = vsel %vm981_vm2, %v4770_v2, %v4771_v61  ;;  %v2950_v61 = vld [vmem:[#allocation11 + $0x1e0] sm:$0xff]  ;;  %v2901_v2 = vld [vmem:[#allocation11 + $0x58] sm:$0xff]  ;;  %v2900_v47 = vld [vmem:[#allocation11 + $0x50] sm:$0xff] }
 0x1cb   :  { %2016 = vmatpush.msrb.mxu2 %v5328_v22  ;;  %2039 = vmatpush.msrb.mxu3 %v5387_v4  ;;  %v1260_v22 = vsel %vm1247_vm4, %v7019_v30, %v5783_v24  ;;  %v1261_v4 = vsel %vm1247_vm4, %v5783_v24, %v4741_v7  ;;  %v4786_v7 = vunpack.i.h.bf16 %v4784_v46  ;;  %v645_v34 = vsel %vm630_vm8, %v4726_v19, %v4785_v28  ;;  %v2949_v38 = vld [vmem:[#allocation11 + $0x1d8] sm:$0xff]  ;;  %v2930_v46 = vld [vmem:[#allocation11 + $0x140] sm:$0xff] }
 0x1cc   :  { %1967 = vmatpush.msrb.mxu0 %v1377_v50  ;;  %1990 = vmatpush.msrb.mxu1 %v1378_v9  ;;  %v2899_v50 = vld [vmem:[#allocation11 + $0x48] sm:$0xff]  ;;  %v2946_v52 = vld [vmem:[#allocation11 + $0x1c0] sm:$0xff] }
 0x1cd   :  { %2017 = vmatpush.msrb.mxu2 %v996_v37  ;;  %2040 = vmatpush.msrb.mxu3 %v997_v48  ;;  %v646_v26 = vsel %vm630_vm8, %v4785_v28, %v4786_v7  ;;  %v2932_v37 = vld [vmem:[#allocation11 + $0x150] sm:$0xff]  ;;  %v2915_v9 = vld [vmem:[#allocation11 + $0xc8] sm:$0xff] }
 0x1ce   :  { %1968 = vmatpush.msrb.mxu0 %v1260_v22  ;;  %1991 = vmatpush.msrb.mxu1 %v1261_v4  ;;  %v2948_v48 = vld [vmem:[#allocation11 + $0x1d0] sm:$0xff]  ;;  %v2947_v4 = vld [vmem:[#allocation11 + $0x1c8] sm:$0xff] }
 0x1cf   :  { %2018 = vmatpush.msrb.mxu2 %v879_v31  ;;  %2041 = vmatpush.msrb.mxu3 %v880_v42  ;;  %v4779_v24 = vpop.permute.xlu0 %4778  ;;  %v2898_v31 = vld [vmem:[#allocation11 + $0x40] sm:$0xff]  ;;  %v2911_v7 = vld [vmem:[#allocation11 + $0xa8] sm:$0xff] }
 0x1d0   :  { %1969 = vmatpush.msrb.mxu0 %v1143_v41  ;;  %1992 = vmatpush.msrb.mxu1 %v1144_v14  ;;  %v974_v58 = vpop.permute.xlu1 %973  ;;  %v4781_v49 = vunpack.i.h.bf16 %v4779_v24  ;;  %v4780_v60 = vunpack.i.l.bf16 %v4779_v24  ;;  %v623_v20 = vpop.permute.xlu2 %622  ;;  %v2914_v42 = vld [vmem:[#allocation11 + $0xc0] sm:$0xff]  ;;  %v2897_v41 = vld [vmem:[#allocation11 + $0x38] sm:$0xff]  ;;  %v2927_v28 = vld [vmem:[#allocation11 + $0x128] sm:$0xff] }
 0x1d1   :  { %4420 = vmatmul.msk.f32.gmra.mxu0 %vm1676_vm9, %v5648_v10  ;;  %4422 = vmatmul.msk.f32.gmra.mxu1 %vm1676_vm9, %v5648_v10  ;;  %v994_v15 = vsel %vm981_vm2, %v7021_v53, %v974_v58  ;;  %v995_v17 = vsel %vm981_vm2, %v974_v58, %v4711_v11  ;;  %v643_v29 = vsel %vm630_vm8, %v7023_v23, %v623_v20  ;;  %v2934_v11 = vld [vmem:[#allocation11 + $0x160] sm:$0xff]  ;;  %v2913_v14 = vld [vmem:[#allocation11 + $0xb8] sm:$0xff]  ;;  %v2896_v58 = vld [vmem:[#allocation11 + $0x30] sm:$0xff]  ;;  %vm4365_vm2 = vcmask 50176  }
 0x1d2   :  { %1970 = vmatpush.msrb.mxu0 %v5273_v51  ;;  %1993 = vmatpush.msrb.mxu1 %v5282_v56  ;;  %v762_v0 = vsel %vm747_vm7, %v4721_v3, %v4780_v60  ;;  %v763_v32 = vsel %vm747_vm7, %v4780_v60, %v4781_v49  ;;  %v644_v45 = vsel %vm630_vm8, %v623_v20, %v4726_v19  ;;  %v2945_v24 = vld [vmem:[#allocation11 + $0x1b8] sm:$0xff]  ;;  %v2912_v49 = vld [vmem:[#allocation11 + $0xb0] sm:$0xff]  ;;  %v2910_v19 = vld [vmem:[#allocation11 + $0xa0] sm:$0xff] }
 0x1d3   :  { %2019 = vmatpush.msrb.mxu2 %v762_v0  ;;  %2042 = vmatpush.msrb.mxu3 %v763_v32  ;;  %v2928_v60 = vld [vmem:[#allocation11 + $0x130] sm:$0xff]  ;;  %v2943_v0 = vld [vmem:[#allocation11 + $0x1a8] sm:$0xff]  ;;  %v2894_v32 = vld [vmem:[#allocation11 + $0x20] sm:$0xff] }
 0x1d4   :  { %1971 = vmatpush.msrb.mxu0 %v994_v15  ;;  %1994 = vmatpush.msrb.mxu1 %v995_v17  ;;  %v2944_v53 = vld [vmem:[#allocation11 + $0x1b0] sm:$0xff]  ;;  %v2895_v17 = vld [vmem:[#allocation11 + $0x28] sm:$0xff] }
 0x1d5   :  { %2020 = vmatpush.msrb.mxu2 %v645_v34  ;;  %2043 = vmatpush.msrb.mxu3 %v646_v26  ;;  %v2926_v34 = vld [vmem:[#allocation11 + $0x120] sm:$0xff]  ;;  %v2908_v23 = vld [vmem:[#allocation11 + $0x90] sm:$0xff] }
 0x1d6   :  { %4431 = vmatmul.msk.f32.vlgmr.msrb.gmra.mxu2 %vm1676_vm9, %v5599_v5  ;;  %4433 = vmatmul.msk.f32.vlgmr.msrb.gmra.mxu3 %vm1676_vm9, %v5599_v5  ;;  %v2942_v26 = vld [vmem:[#allocation11 + $0x1a0] sm:$0xff] }
 0x1d7   :  { %v857_v54 = vpop.permute.xlu0 %856  ;;  %3462 = vmatpush.msra.mxu3 %v2953_v6  ;;  %v2939_v6 = vld [vmem:[#allocation11 + $0x188] sm:$0xff] }
 0x1d8   :  { %v740_v51 = vpop.permute.xlu1 %739  ;;  %v877_v56 = vsel %vm864_vm6, %v4676_v39, %v857_v54  ;;  %v878_v12 = vsel %vm864_vm6, %v857_v54, %v4716_v62  ;;  %v2937_v39 = vld [vmem:[#allocation11 + $0x178] sm:$0xff]  ;;  %v2931_v62 = vld [vmem:[#allocation11 + $0x148] sm:$0xff] }
 0x1d9   :  { %1972 = vmatpush.msrb.mxu0 %v877_v56  ;;  %1995 = vmatpush.msrb.mxu1 %v878_v12  ;;  %v760_v44 = vsel %vm747_vm7, %v7022_v43, %v740_v51  ;;  %v761_v8 = vsel %vm747_vm7, %v740_v51, %v4721_v3  ;;  %v2929_v3 = vld [vmem:[#allocation11 + $0x138] sm:$0xff] }
 0x1da   :  { %3442 = vmatpush.msra.mxu2 %v2937_v39  ;;  %3463 = vmatpush.msra.mxu3 %v2952_v35  ;;  %v2893_v51 = vld [vmem:[#allocation11 + $0x18] sm:$0xff]  ;;  %v2923_v39 = vld [vmem:[#allocation11 + $0x108] sm:$0xff] }
 0x1db   :  { %1973 = vmatpush.msrb.mxu0 %v760_v44  ;;  %1996 = vmatpush.msrb.mxu1 %v761_v8  ;;  %v2909_v56 = vld [vmem:[#allocation11 + $0x98] sm:$0xff]  ;;  %v2892_v8 = vld [vmem:[#allocation11 + $0x10] sm:$0xff] }
 0x1dc   :  { %3443 = vmatpush.msra.mxu2 %v2936_v21  ;;  %v2925_v43 = vld [vmem:[#allocation11 + $0x118] sm:$0xff] }
 0x1dd   :  { %1974 = vmatpush.msrb.mxu0 %v643_v29  ;;  %1997 = vmatpush.msrb.mxu1 %v644_v45  ;;  %v2941_v44 = vld [vmem:[#allocation11 + $0x198] sm:$0xff]  ;;  %v2924_v29 = vld [vmem:[#allocation11 + $0x110] sm:$0xff] }
 0x1de   :  { %4427 = vmatmul.msk.f32.vlgmr.msrb.gmra.mxu0 %vm1676_vm9, %v5599_v5  ;;  %4429 = vmatmul.msk.f32.vlgmr.msrb.gmra.mxu1 %vm1676_vm9, %v5599_v5  ;;  %v2920_v5 = vld [vmem:[#allocation11 + $0xf0] sm:$0xff] }
 0x1df   :  { %4432 = vmatmul.msk.f32.gmra.mxu2 %vm1676_vm9, %v5648_v10  ;;  %4434 = vmatmul.msk.f32.gmra.mxu3 %vm1676_vm9, %v5648_v10  ;;  %v2940_v45 = vld [vmem:[#allocation11 + $0x190] sm:$0xff] }
 0x1e0   :  { %3402 = vmatpush.msra.mxu0 %v2905_v1  ;;  %3422 = vmatpush.msra.mxu1 %v2921_v57  ;;  %v2891_v1 = vld [vmem:[#allocation11 + $0x8] sm:$0xff] }
 0x1e1   :  { %3444 = vmatpush.msra.mxu2 %v2935_v18  ;;  %v2907_v57 = vld [vmem:[#allocation11 + $0x88] sm:$0xff]  ;;  %v2922_v18 = vld [vmem:[#allocation11 + $0x100] sm:$0xff] }
 0x1e2   :  { %3403 = vmatpush.msra.mxu0 %v2904_v25  ;;  %3423 = vmatpush.msra.mxu1 %v2920_v5 }
 0x1e3   :  { %3445 = vmatpush.msra.mxu2 %v2934_v11  ;;  %v2938_v11 = vld [vmem:[#allocation11 + $0x180] sm:$0xff] }
 0x1e4   :  { %3404 = vmatpush.msra.mxu0 %v2903_v27  ;;  %3424 = vmatpush.msra.mxu1 %v2919_v33  ;;  %v2890_v27 = vld [vmem:[#allocation11] sm:$0xff] }
 0x1e5   :  { %3446 = vmatpush.msra.mxu2 %v2933_v55  ;;  %v2906_v33 = vld [vmem:[#allocation11 + $0x80] sm:$0xff] }
 0x1e6   :  { %4428 = vmatmul.msk.f32.gmra.mxu0 %vm1676_vm9, %v5648_v10  ;;  %4430 = vmatmul.msk.f32.gmra.mxu1 %vm1676_vm9, %v5648_v10  ;;  %v2951_v10 = vld [vmem:[#allocation11 + $0x1e8] sm:$0xff] }
 0x1e7   :  { %3464 = vmatpush.msra.mxu3 %v2951_v10  ;;  %3405 = vmatpush.msra.mxu0 %v2902_v13 }
 0x1e8   :  { %3425 = vmatpush.msra.mxu1 %v2918_v59  ;;  %3447 = vmatpush.msra.mxu2 %v2932_v37 }
 0x1e9   :  { %3465 = vmatpush.msra.mxu3 %v2950_v61  ;;  %3406 = vmatpush.msra.mxu0 %v2901_v2 }
 0x1ea   :  { %3426 = vmatpush.msra.mxu1 %v2917_v40  ;;  %v6007_v30 = vpop.f32.mrf.mxu0  ;;  %3448 = vmatpush.msra.mxu2 %v2931_v62 }
 0x1eb   :  { %3466 = vmatpush.msra.mxu3 %v2949_v38  ;;  %3407 = vmatpush.msra.mxu0 %v2900_v47  ;;  %v6009_v22 = vpop.f32.mrf.mxu1  ;;  %v2051_v21 = vmax.f32 %v6007_v30, 0.0 }
 0x1ec   :  { %v6003_v63 = vpop.f32.mrf.mxu2  ;;  %3427 = vmatpush.msra.mxu1 %v2916_v36  ;;  %3449 = vmatpush.msra.mxu2 %v2930_v46  ;;  %v2052_v10 = vmax.f32 %v6009_v22, 0.0 }
 0x1ed   :  { %v6005_v16 = vpop.f32.mrf.mxu3  ;;  %3467 = vmatpush.msra.mxu3 %v2948_v48  ;;  %3408 = vmatpush.msra.mxu0 %v2899_v50  ;;  %v2053_v5 = vmax.f32 %v6003_v63, 0.0  ;;  %v6024_v47 = vmin.f32 %v2051_v21, 1.0 }
 0x1ee   :  { %3428 = vmatpush.msra.mxu1 %v2915_v9  ;;  %3450 = vmatpush.msra.mxu2 %v2929_v3  ;;  %v2054_v35 = vmax.f32 %v6005_v16, 0.0  ;;  %v6029_v16 = vmin.f32 %v2052_v10, 1.0 }
 0x1ef   :  { %3468 = vmatpush.msra.mxu3 %v2947_v4  ;;  %3409 = vmatpush.msra.mxu0 %v2898_v31  ;;  %v6021_v61 = vmin.f32 %v2053_v5, 1.0  ;;  %v2226_v3 = vrot.slane %v6024_v47, 2 }
 0x1f0   :  { %3429 = vmatpush.msra.mxu1 %v2914_v42  ;;  %3451 = vmatpush.msra.mxu2 %v2928_v60  ;;  %v6026_v37 = vmin.f32 %v2054_v35, 1.0  ;;  %v2271_v10 = vrot.slane %v6029_v16, 3 }
 0x1f1   :  { %3469 = vmatpush.msra.mxu3 %v2946_v52  ;;  %3410 = vmatpush.msra.mxu0 %v2897_v41  ;;  %v2117_v4 = vrot.slane %v6021_v61, 7  ;;  %v2182_v52 = vrot.slane %v6024_v47, 1 }
 0x1f2   :  { %3430 = vmatpush.msra.mxu1 %v2913_v14  ;;  %3452 = vmatpush.msra.mxu2 %v2927_v28  ;;  %v2118_v14 = vrot.slane %v6026_v37, 7 }
 0x1f3   :  { %3470 = vmatpush.msra.mxu3 %v2945_v24  ;;  %3411 = vmatpush.msra.mxu0 %v2896_v58  ;;  %v2230_v24 = vrot.slane %v6021_v61, 1 }
 0x1f4   :  { %3431 = vmatpush.msra.mxu1 %v2912_v49  ;;  %3453 = vmatpush.msra.mxu2 %v2926_v34 }
 0x1f5   :  { %3471 = vmatpush.msra.mxu3 %v2944_v53  ;;  %3412 = vmatpush.msra.mxu0 %v2895_v17  ;;  %v2183_v53 = vrot.slane %v6029_v16, 1  ;;  %v2158_v17 = vsel %vm2157_vm10, %v6024_v47, %v2117_v4 }
 0x1f6   :  { %3432 = vmatpush.msra.mxu1 %v2911_v7  ;;  %3454 = vmatpush.msra.mxu2 %v2925_v43  ;;  %v2231_v43 = vrot.slane %v6026_v37, 1 }
 0x1f7   :  { %3472 = vmatpush.msra.mxu3 %v2943_v0  ;;  %3413 = vmatpush.msra.mxu0 %v2894_v32  ;;  %v2210_v32 = vsel %vm2157_vm10, %v2182_v52, %v6021_v61  ;;  %v2985_v52 = vld [vmem:[#allocation11 + $0x2f8] sm:$0xff] }
 0x1f8   :  { %3433 = vmatpush.msra.mxu1 %v2910_v19  ;;  %3455 = vmatpush.msra.mxu2 %v2924_v29  ;;  %v2159_v19 = vsel %vm2157_vm10, %v6029_v16, %v2118_v14  ;;  %v2274_v29 = vrot.slane %v6021_v61, 2  ;;  %v3001_v14 = vld [vmem:[#allocation11 + $0x378] sm:$0xff] }
 0x1f9   :  { %3473 = vmatpush.msra.mxu3 %v2942_v26  ;;  %3414 = vmatpush.msra.mxu0 %v2893_v51 }
 0x1fa   :  { %3434 = vmatpush.msra.mxu1 %v2909_v56  ;;  %3456 = vmatpush.msra.mxu2 %v2923_v39 }
 0x1fb   :  { %3474 = vmatpush.msra.mxu3 %v2941_v44  ;;  %3415 = vmatpush.msra.mxu0 %v2892_v8 }
 0x1fc   :  { %3435 = vmatpush.msra.mxu1 %v2908_v23  ;;  %3457 = vmatpush.msra.mxu2 %v2922_v18  ;;  %v2270_v23 = vrot.slane %v6024_v47, 3 }
 0x1fd   :  { %3475 = vmatpush.msra.mxu3 %v2940_v45  ;;  %3416 = vmatpush.msra.mxu0 %v2891_v1 }
 0x1fe   :  { %v1703_v12 = vpop.f32.mrf.mxu0  ;;  %v6015_v20 = vpop.f32.mrf.mxu1  ;;  %3436 = vmatpush.msra.mxu1 %v2907_v57  ;;  %3522 = vmatpush.msrb.mxu2 %v3001_v14 }
 0x1ff   :  { %3476 = vmatpush.msra.mxu3 %v2939_v6  ;;  %3417 = vmatpush.msra.mxu0 %v2890_v27  ;;  %v2067_v2 = vmax.f32 %v1703_v12, 0.0  ;;  %v2068_v48 = vmax.f32 %v6015_v20, 0.0  ;;  %v2211_v12 = vsel %vm2157_vm10, %v2183_v53, %v6026_v37  ;;  %v2227_v20 = vrot.slane %v6029_v16, 2 }
 0x200   :  { %3437 = vmatpush.msra.mxu1 %v2906_v33 }
 0x201   :  { %3477 = vmatpush.msra.mxu3 %v2938_v11  ;;  %v6034_v30 = vmin.f32 %v2067_v2, 1.0  ;;  %v6044_v41 = vmin.f32 %v2068_v48, 1.0  ;;  %v2255_v33 = vsel %vm2157_vm10, %v2227_v20, %v2231_v43  ;;  %v2967_v20 = vld [vmem:[#allocation11 + $0x268] sm:$0xff] }
 0x202   :  { %v6011_v15 = vpop.f32.mrf.mxu2  ;;  %v6013_v54 = vpop.f32.mrf.mxu3  ;;  %3502 = vmatpush.msrb.mxu1 %v2985_v52  ;;  %v2983_v43 = vld [vmem:[#allocation11 + $0x2e8] sm:$0xff]  ;;  %v2363_v52 = vrot.slane %v6026_v37, 4 }
 0x203   :  { %v2069_v40 = vmax.f32 %v6011_v15, 0.0  ;;  %v2070_v50 = vmax.f32 %v6013_v54, 0.0  ;;  %v2254_v54 = vsel %vm2157_vm10, %v2226_v3, %v2230_v24 }
 0x205   :  { %v6036_v22 = vmin.f32 %v2069_v40, 1.0  ;;  %v6049_v58 = vmin.f32 %v2070_v50, 1.0  ;;  %v2298_v40 = vsel %vm2157_vm10, %v2270_v23, %v2274_v29  ;;  %v2403_v29 = vrot.slane %v6029_v16, 6 }
 0x20a   :  { %v1838_v25 = vpop.f32.mrf.mxu2  ;;  %v1861_v59 = vpop.f32.mrf.mxu3 }
 0x20b   :  { %v2057_v13 = vmax.f32 %v1838_v25, 0.0  ;;  %v2058_v62 = vmax.f32 %v1861_v59, 0.0 }
 0x20d   :  { %v6032_v9 = vmin.f32 %v2057_v13, 1.0  ;;  %v6051_v49 = vmin.f32 %v2058_v62, 1.0  ;;  %v2275_v13 = vrot.slane %v6026_v37, 2 }
 0x20f   :  { %v2129_v60 = vrot.slane %v6032_v9, 5  ;;  %v2190_v0 = vrot.slane %v6032_v9, 6  ;;  %v2130_v56 = vrot.slane %v6051_v49, 5  ;;  %v2191_v8 = vrot.slane %v6051_v49, 6 }
 0x210   :  { %v2234_v39 = vrot.slane %v6032_v9, 7  ;;  %v2235_v27 = vrot.slane %v6051_v49, 7 }
 0x212   :  { %v1841_v46 = vpop.f32.mrf.mxu2  ;;  %v6077_v45 = vpop.f32.mrf.mxu3 }
 0x213   :  { %v2073_v15 = vmax.f32 %v1841_v46, 0.0  ;;  %v2074_v59 = vmax.f32 %v6077_v45, 0.0  ;;  %v2969_v46 = vld [vmem:[#allocation11 + $0x278] sm:$0xff] }
 0x214   :  { %v1792_v55 = vpop.f32.mrf.mxu0  ;;  %v1815_v38 = vpop.f32.mrf.mxu1  ;;  %3482 = vmatpush.msrb.mxu0 %v2969_v46  ;;  %v2446_v46 = vrot.slane %v6024_v47, 7  ;;  %v2993_v45 = vld [vmem:[#allocation11 + $0x338] sm:$0xff] }
 0x215   :  { %v2055_v36 = vmax.f32 %v1792_v55, 0.0  ;;  %v2056_v63 = vmax.f32 %v1815_v38, 0.0  ;;  %v6072_v44 = vmin.f32 %v2073_v15, 1.0  ;;  %v3017_v15 = vld [vmem:[#allocation11 + $0x3f8] sm:$0xff] }
 0x216   :  { %3542 = vmatpush.msrb.mxu3 %v3017_v15  ;;  %v2450_v15 = vrot.slane %v6021_v61, 6 }
 0x217   :  { %v6039_v31 = vmin.f32 %v2055_v36, 1.0  ;;  %v6041_v42 = vmin.f32 %v2056_v63, 1.0  ;;  %v2314_v36 = vrot.slane %v6024_v47, 4  ;;  %v2318_v63 = vrot.slane %v6021_v61, 3 }
 0x219   :  { %v2123_v7 = vrot.slane %v6039_v31, 6  ;;  %v2124_v28 = vrot.slane %v6041_v42, 6  ;;  %v2186_v34 = vrot.slane %v6039_v31, 7  ;;  %v2187_v26 = vrot.slane %v6041_v42, 7 }
 0x21a   :  { %v2256_v6 = vsel %vm2160_vm11, %v2254_v54, %v6039_v31  ;;  %v2278_v18 = vrot.slane %v6039_v31, 1  ;;  %v6117_v4 = vsel %vm2160_vm11, %v2255_v33, %v6041_v42  ;;  %v2279_v24 = vrot.slane %v6041_v42, 1 }
 0x21b   :  { %v2161_v1 = vsel %vm2160_vm11, %v2158_v17, %v2123_v7  ;;  %v2162_v57 = vsel %vm2160_vm11, %v2159_v19, %v2124_v28  ;;  %v2212_v21 = vsel %vm2160_vm11, %v2210_v32, %v2186_v34  ;;  %v2213_v35 = vsel %vm2160_vm11, %v2211_v12, %v2187_v26  ;;  %v2968_v32 = vld [vmem:[#allocation11 + $0x270] sm:$0xff] }
 0x21c   :  { %v1795_v51 = vpop.f32.mrf.mxu0  ;;  %v6084_v5 = vpop.f32.mrf.mxu1  ;;  %v6095_v11 = vsel %vm2163_vm12, %v2161_v1, %v2129_v60  ;;  %v6098_v2 = vsel %vm2163_vm12, %v2162_v57, %v2130_v56  ;;  %v6103_v38 = vsel %vm2163_vm12, %v2212_v21, %v2190_v0  ;;  %v6110_v50 = vsel %vm2163_vm12, %v2213_v35, %v2191_v8  ;;  %v2984_v19 = vld [vmem:[#allocation11 + $0x2f0] sm:$0xff]  ;;  %3483 = vmatpush.msrb.mxu0 %v2968_v32  ;;  %v2999_v57 = vld [vmem:[#allocation11 + $0x368] sm:$0xff] }
 0x21d   :  { %v2071_v25 = vmax.f32 %v1795_v51, 0.0  ;;  %v2072_v55 = vmax.f32 %v6084_v5, 0.0  ;;  %v6113_v62 = vsel %vm2163_vm12, %v2256_v6, %v2234_v39  ;;  %v6120_v3 = vsel %vm2160_vm11, %v2298_v40, %v2278_v18  ;;  %v3000_v34 = vld [vmem:[#allocation11 + $0x370] sm:$0xff]  ;;  %3503 = vmatpush.msrb.mxu1 %v2984_v19  ;;  %v3015_v39 = vld [vmem:[#allocation11 + $0x3e8] sm:$0xff]  ;;  %v2966_v6 = vld [vmem:[#allocation11 + $0x260] sm:$0xff] }
 0x21e   :  { %v6124_v60 = vsel %vm2157_vm10, %v2271_v10, %v2275_v13  ;;  %v2322_v53 = vrot.slane %v6039_v31, 2  ;;  %v2326_v17 = vrot.slane %v6032_v9, 1  ;;  %v2315_v7 = vrot.slane %v6029_v16, 4  ;;  %v3016_v12 = vld [vmem:[#allocation11 + $0x3f0] sm:$0xff]  ;;  %3523 = vmatpush.msrb.mxu2 %v3000_v34  ;;  %3484 = vmatpush.msrb.mxu0 %v2967_v20  ;;  %v2982_v18 = vld [vmem:[#allocation11 + $0x2e0] sm:$0xff] }
 0x21f   :  { %v6107_v48 = vmin.f32 %v2071_v25, 1.0  ;;  %v2402_v28 = vrot.slane %v6024_v47, 6  ;;  %v2406_v0 = vrot.slane %v6021_v61, 5  ;;  %v6132_v26 = vsel %vm2157_vm10, %v2314_v36, %v2318_v63  ;;  %3543 = vmatpush.msrb.mxu3 %v3016_v12  ;;  %3504 = vmatpush.msrb.mxu1 %v2983_v43  ;;  %v2998_v10 = vld [vmem:[#allocation11 + $0x360] sm:$0xff]  ;;  %v2997_v12 = vld [vmem:[#allocation11 + $0x358] sm:$0xff]  ;;  %v2992_v5 = vld [vmem:[#allocation11 + $0x330] sm:$0xff] }
 0x220   :  { %v2319_v54 = vrot.slane %v6026_v37, 3  ;;  %v2410_v51 = vrot.slane %v6039_v31, 4  ;;  %v2414_v56 = vrot.slane %v6032_v9, 3  ;;  %v2358_v8 = vrot.slane %v6024_v47, 5  ;;  %v3014_v13 = vld [vmem:[#allocation11 + $0x3e0] sm:$0xff]  ;;  %3524 = vmatpush.msrb.mxu2 %v2999_v57  ;;  %3485 = vmatpush.msrb.mxu0 %v2966_v6 }
 0x221   :  { %v2430_v23 = vsel %vm2157_vm10, %v2402_v28, %v2406_v0  ;;  %v2407_v1 = vrot.slane %v6026_v37, 5  ;;  %v2362_v25 = vrot.slane %v6021_v61, 4  ;;  %v2411_v35 = vrot.slane %v6041_v42, 4  ;;  %3544 = vmatpush.msrb.mxu3 %v3015_v39  ;;  %3505 = vmatpush.msrb.mxu1 %v2982_v18  ;;  %v2981_v61 = vld [vmem:[#allocation11 + $0x2d8] sm:$0xff] }
 0x222   :  { %v2432_v21 = vsel %vm2160_vm11, %v2430_v23, %v2410_v51  ;;  %v2415_v33 = vrot.slane %v6051_v49, 3  ;;  %v2359_v40 = vrot.slane %v6029_v16, 5  ;;  %v2454_v28 = vrot.slane %v6039_v31, 5  ;;  %3525 = vmatpush.msrb.mxu2 %v2998_v10 }
 0x223   :  { %v6147_v36 = vsel %vm2163_vm12, %v2432_v21, %v2414_v56  ;;  %v2431_v63 = vsel %vm2157_vm10, %v2403_v29, %v2407_v1  ;;  %v2458_v32 = vrot.slane %v6032_v9, 4  ;;  %v2447_v19 = vrot.slane %v6029_v16, 7  ;;  %3545 = vmatpush.msrb.mxu3 %v3014_v13  ;;  %v2965_v56 = vld [vmem:[#allocation11 + $0x258] sm:$0xff]  ;;  %3506 = vmatpush.msrb.mxu1 %v2981_v61  ;;  %v2964_v21 = vld [vmem:[#allocation11 + $0x250] sm:$0xff]  ;;  %v2994_v61 = vld [vmem:[#allocation11 + $0x340] sm:$0xff] }
 0x224   :  { %v2433_v14 = vsel %vm2160_vm11, %v2431_v63, %v2411_v35  ;;  %v2451_v47 = vrot.slane %v6026_v37, 6  ;;  %v2323_v20 = vrot.slane %v6041_v42, 2  ;;  %v2474_v43 = vsel %vm2157_vm10, %v2446_v46, %v2450_v15  ;;  %3486 = vmatpush.msrb.mxu0 %v2965_v56  ;;  %v3013_v1 = vld [vmem:[#allocation11 + $0x3d8] sm:$0xff]  ;;  %3526 = vmatpush.msrb.mxu2 %v2997_v12  ;;  %v2980_v35 = vld [vmem:[#allocation11 + $0x2d0] sm:$0xff]  ;;  %v2963_v63 = vld [vmem:[#allocation11 + $0x248] sm:$0xff] }
 0x225   :  { %v6156_v0 = vsel %vm2163_vm12, %v2433_v14, %v2415_v33  ;;  %v2455_v23 = vrot.slane %v6041_v42, 5  ;;  %v2459_v29 = vrot.slane %v6051_v49, 4  ;;  %v2343_v37 = vsel %vm2157_vm10, %v2315_v7, %v2319_v54  ;;  %3546 = vmatpush.msrb.mxu3 %v3013_v1  ;;  %v2996_v33 = vld [vmem:[#allocation11 + $0x350] sm:$0xff]  ;;  %3507 = vmatpush.msrb.mxu1 %v2980_v35  ;;  %v2979_v46 = vld [vmem:[#allocation11 + $0x2c8] sm:$0xff]  ;;  %v2978_v56 = vld [vmem:[#allocation11 + $0x2c0] sm:$0xff] }
 0x226   :  { %v2366_v57 = vrot.slane %v6039_v31, 3  ;;  %v2476_v39 = vsel %vm2160_vm11, %v2474_v43, %v2454_v28  ;;  %v2475_v6 = vsel %vm2157_vm10, %v2447_v19, %v2451_v47  ;;  %v2386_v18 = vsel %vm2157_vm10, %v2358_v8, %v2362_v25  ;;  %3487 = vmatpush.msrb.mxu0 %v2964_v21  ;;  %v3012_v54 = vld [vmem:[#allocation11 + $0x3d0] sm:$0xff]  ;;  %3527 = vmatpush.msrb.mxu2 %v2996_v33  ;;  %v2995_v25 = vld [vmem:[#allocation11 + $0x348] sm:$0xff]  ;;  %v3010_v12 = vld [vmem:[#allocation11 + $0x3c0] sm:$0xff] }
 0x227   :  { %v2367_v10 = vrot.slane %v6041_v42, 3  ;;  %v6176_v13 = vsel %vm2163_vm12, %v2476_v39, %v2458_v32  ;;  %v2477_v16 = vsel %vm2160_vm11, %v2475_v6, %v2455_v23  ;;  %v2387_v14 = vsel %vm2157_vm10, %v2359_v40, %v2363_v52  ;;  %3547 = vmatpush.msrb.mxu3 %v3012_v54  ;;  %v3011_v28 = vld [vmem:[#allocation11 + $0x3c8] sm:$0xff]  ;;  %v2962_v32 = vld [vmem:[#allocation11 + $0x240] sm:$0xff]  ;;  %3508 = vmatpush.msrb.mxu1 %v2979_v46 }
 0x228   :  { %v6181_v15 = vsel %vm2163_vm12, %v2477_v16, %v2459_v29  ;;  %v2492_v8 = vrot.slane %v6036_v22, 7  ;;  %v2301_v19 = vsel %vm2160_vm11, %v6124_v60, %v2279_v24  ;;  %v2344_v40 = vsel %vm2160_vm11, %v6132_v26, %v2322_v53  ;;  %3488 = vmatpush.msrb.mxu0 %v2963_v63  ;;  %3528 = vmatpush.msrb.mxu2 %v2995_v25  ;;  %v2961_v53 = vld [vmem:[#allocation11 + $0x238] sm:$0xff]  ;;  %v2959_v33 = vld [vmem:[#allocation11 + $0x228] sm:$0xff] }
 0x229   :  { %v2327_v52 = vrot.slane %v6051_v49, 1  ;;  %v2370_v47 = vrot.slane %v6032_v9, 2  ;;  %v2345_v42 = vsel %vm2160_vm11, %v2343_v37, %v2323_v20  ;;  %v2388_v24 = vsel %vm2160_vm11, %v2386_v18, %v2366_v57  ;;  %3548 = vmatpush.msrb.mxu3 %v3011_v28  ;;  %v2977_v26 = vld [vmem:[#allocation11 + $0x2b8] sm:$0xff]  ;;  %3509 = vmatpush.msrb.mxu1 %v2978_v56  ;;  %v2960_v37 = vld [vmem:[#allocation11 + $0x230] sm:$0xff]  ;;  %v2975_v18 = vld [vmem:[#allocation11 + $0x2a8] sm:$0xff] }
 0x22a   :  { %v2371_v31 = vrot.slane %v6051_v49, 2  ;;  %v6200_v60 = vmin.f32 %v2074_v59, 1.0  ;;  %v2389_v20 = vsel %vm2160_vm11, %v2387_v14, %v2367_v10  ;;  %v2498_v43 = vrot.slane %v6107_v48, 6  ;;  %3489 = vmatpush.msrb.mxu0 %v2962_v32  ;;  %v3009_v59 = vld [vmem:[#allocation11 + $0x3b8] sm:$0xff]  ;;  %3529 = vmatpush.msrb.mxu2 %v2994_v61  ;;  %v2976_v57 = vld [vmem:[#allocation11 + $0x2b0] sm:$0xff]  ;;  %v2991_v63 = vld [vmem:[#allocation11 + $0x328] sm:$0xff] }
 0x22b   :  { %v6215_v29 = vsel %vm2163_vm12, %v6120_v3, %v6032_v9  ;;  %v6219_v1 = vsel %vm2163_vm12, %v2301_v19, %v6051_v49  ;;  %3549 = vmatpush.msrb.mxu3 %v3010_v12  ;;  %v6230_v3 = vsel %vm2163_vm12, %v2344_v40, %v2326_v17  ;;  %v6233_v39 = vsel %vm2163_vm12, %v2345_v42, %v2327_v52  ;;  %v3007_v46 = vld [vmem:[#allocation11 + $0x3a8] sm:$0xff]  ;;  %v2958_v42 = vld [vmem:[#allocation11 + $0x220] sm:$0xff] }
 0x22c   :  { %v6236_v49 = vsel %vm2163_vm12, %v2388_v24, %v2370_v47  ;;  %3490 = vmatpush.msrb.mxu0 %v2961_v53  ;;  %3510 = vmatpush.msrb.mxu1 %v2977_v26  ;;  %v6242_v35 = vsel %vm2163_vm12, %v2389_v20, %v2371_v31  ;;  %v2504_v9 = vrot.slane %v6072_v44, 5  ;;  %v2493_v54 = vrot.slane %v6049_v58, 7  ;;  %v2974_v24 = vld [vmem:[#allocation11 + $0x2a0] sm:$0xff]  ;;  %v2955_v52 = vld [vmem:[#allocation11 + $0x208] sm:$0xff] }
 0x22d   :  { %3530 = vmatpush.msrb.mxu2 %v2993_v45  ;;  %3550 = vmatpush.msrb.mxu3 %v3009_v59  ;;  %v2550_v25 = vrot.slane %v6034_v30, 1  ;;  %v2551_v28 = vrot.slane %v6044_v41, 1  ;;  %v2594_v61 = vrot.slane %v6034_v30, 2  ;;  %v2990_v31 = vld [vmem:[#allocation11 + $0x320] sm:$0xff]  ;;  %v2554_v26 = vrot.slane %v6107_v48, 7  ;;  %v3003_v40 = vld [vmem:[#allocation11 + $0x388] sm:$0xff] }
 0x22e   :  { %v1930_v34 = vpop.f32.mrf.mxu2  ;;  %v6161_v51 = vpop.f32.mrf.mxu3  ;;  %3491 = vmatpush.msrb.mxu0 %v2960_v37  ;;  %3511 = vmatpush.msrb.mxu1 %v2976_v57  ;;  %v2533_v53 = vsel %vm2157_vm10, %v6044_v41, %v2493_v54  ;;  %v3006_v45 = vld [vmem:[#allocation11 + $0x3a0] sm:$0xff]  ;;  %v2595_v37 = vrot.slane %v6044_v41, 2  ;;  %v2599_v57 = vrot.slane %v6049_v58, 1  ;;  %v2505_v54 = vrot.slane %v6200_v60, 5 }
 0x22f   :  { %v2061_v7 = vmax.f32 %v1930_v34, 0.0  ;;  %v2062_v34 = vmax.f32 %v6161_v51, 0.0  ;;  %v6206_v51 = vsel %vm2163_vm12, %v6117_v4, %v2235_v27  ;;  %v2532_v27 = vsel %vm2157_vm10, %v6034_v30, %v2492_v8  ;;  %3531 = vmatpush.msrb.mxu2 %v2992_v5  ;;  %v2957_v5 = vld [vmem:[#allocation11 + $0x218] sm:$0xff] }
 0x230   :  { %v6225_v4 = vmin.f32 %v2072_v55, 1.0  ;;  %v3008_v55 = vld [vmem:[#allocation11 + $0x3b0] sm:$0xff]  ;;  %3492 = vmatpush.msrb.mxu0 %v2959_v33  ;;  %3512 = vmatpush.msrb.mxu1 %v2975_v18  ;;  %v2578_v59 = vsel %vm2157_vm10, %v2550_v25, %v6036_v22  ;;  %v3005_v25 = vld [vmem:[#allocation11 + $0x398] sm:$0xff] }
 0x231   :  { %v6210_v23 = vmin.f32 %v2061_v7, 1.0  ;;  %v6238_v6 = vmin.f32 %v2062_v34, 1.0  ;;  %v2534_v7 = vsel %vm2160_vm11, %v2532_v27, %v2498_v43  ;;  %3551 = vmatpush.msrb.mxu3 %v3008_v55  ;;  %3532 = vmatpush.msrb.mxu2 %v2991_v63  ;;  %v2598_v43 = vrot.slane %v6036_v22, 1  ;;  %v2973_v55 = vld [vmem:[#allocation11 + $0x298] sm:$0xff] }
 0x232   :  { %v2499_v56 = vrot.slane %v6225_v4, 6  ;;  %v2555_v20 = vrot.slane %v6225_v4, 7  ;;  %3493 = vmatpush.msrb.mxu0 %v2958_v42  ;;  %3513 = vmatpush.msrb.mxu1 %v2974_v24  ;;  %v2579_v27 = vsel %vm2157_vm10, %v2551_v28, %v6049_v58  ;;  %v6276_v18 = vsel %vm2163_vm12, %v2534_v7, %v2504_v9  ;;  %v2956_v28 = vld [vmem:[#allocation11 + $0x210] sm:$0xff] }
 0x233   :  { %v2141_v21 = vrot.slane %v6210_v23, 3  ;;  %v2198_v10 = vrot.slane %v6210_v23, 4  ;;  %v2142_v14 = vrot.slane %v6238_v6, 3  ;;  %3552 = vmatpush.msrb.mxu3 %v3007_v46  ;;  %3533 = vmatpush.msrb.mxu2 %v2990_v31  ;;  %v2422_v33 = vrot.slane %v6210_v23, 1  ;;  %v2972_v42 = vld [vmem:[#allocation11 + $0x290] sm:$0xff] }
 0x234   :  { %v2558_v63 = vrot.slane %v6072_v44, 6  ;;  %3494 = vmatpush.msrb.mxu0 %v2957_v5  ;;  %3514 = vmatpush.msrb.mxu1 %v2973_v55  ;;  %v2535_v24 = vsel %vm2160_vm11, %v2533_v53, %v2499_v56  ;;  %v2559_v31 = vrot.slane %v6200_v60, 6  ;;  %v2988_v9 = vld [vmem:[#allocation11 + $0x310] sm:$0xff]  ;;  %v2580_v5 = vsel %vm2160_vm11, %v2578_v59, %v2554_v26  ;;  %v2971_v56 = vld [vmem:[#allocation11 + $0x288] sm:$0xff] }
 0x235   :  { %3553 = vmatpush.msrb.mxu3 %v3006_v45  ;;  %v2622_v45 = vsel %vm2157_vm10, %v2594_v61, %v2598_v43  ;;  %v3004_v7 = vld [vmem:[#allocation11 + $0x390] sm:$0xff]  ;;  %v2581_v55 = vsel %vm2160_vm11, %v2579_v27, %v2555_v20  ;;  %v2987_v53 = vld [vmem:[#allocation11 + $0x308] sm:$0xff]  ;;  %v2466_v61 = vrot.slane %v6210_v23, 2  ;;  %v2602_v43 = vrot.slane %v6072_v44, 7 }
 0x236   :  { %3495 = vmatpush.msrb.mxu0 %v2956_v28  ;;  %3515 = vmatpush.msrb.mxu1 %v2972_v42  ;;  %v2624_v26 = vsel %vm2160_vm11, %v2622_v45, %v6107_v48  ;;  %v2638_v20 = vrot.slane %v6034_v30, 3  ;;  %v2642_v59 = vrot.slane %v6036_v22, 2  ;;  %v6302_v28 = vsel %vm2163_vm12, %v2580_v5, %v2558_v63  ;;  %v2970_v42 = vld [vmem:[#allocation11 + $0x280] sm:$0xff] }
 0x237   :  { %v6245_v17 = vpop.f32.mrf.mxu3  ;;  %3554 = vmatpush.msrb.mxu3 %v3005_v25  ;;  %v6293_v25 = vsel %vm2163_vm12, %v2535_v24, %v2505_v54  ;;  %v2954_v54 = vld [vmem:[#allocation11 + $0x200] sm:$0xff]  ;;  %v2639_v45 = vrot.slane %v6044_v41, 3  ;;  %v2643_v63 = vrot.slane %v6049_v58, 2  ;;  %v2647_v5 = vrot.slane %v6225_v4, 1 }
 0x238   :  { %v2078_v47 = vmax.f32 %v6245_v17, 0.0  ;;  %v2989_v17 = vld [vmem:[#allocation11 + $0x318] sm:$0xff]  ;;  %3496 = vmatpush.msrb.mxu0 %v2955_v52  ;;  %3516 = vmatpush.msrb.mxu1 %v2971_v56  ;;  %v2986_v24 = vld [vmem:[#allocation11 + $0x300] sm:$0xff]  ;;  %v2646_v52 = vrot.slane %v6107_v48, 1  ;;  %v2686_v56 = vrot.slane %v6036_v22, 3  ;;  %v2666_v32 = vsel %vm2157_vm10, %v2638_v20, %v2642_v59 }
 0x239   :  { %v1933_v12 = vpop.f32.mrf.mxu2  ;;  %3534 = vmatpush.msrb.mxu2 %v2989_v17  ;;  %v2623_v17 = vsel %vm2157_vm10, %v2595_v37, %v2599_v57  ;;  %3555 = vmatpush.msrb.mxu3 %v3004_v7  ;;  %v6305_v37 = vsel %vm2163_vm12, %v2581_v55, %v2559_v31  ;;  %v2603_v57 = vrot.slane %v6200_v60, 7  ;;  %v3002_v7 = vld [vmem:[#allocation11 + $0x380] sm:$0xff]  ;;  %v2682_v55 = vrot.slane %v6034_v30, 4 }
 0x23a   :  { %v2077_v46 = vmax.f32 %v1933_v12, 0.0  ;;  %v6283_v34 = vmin.f32 %v2078_v47, 1.0  ;;  %v2423_v12 = vrot.slane %v6238_v6, 1  ;;  %3497 = vmatpush.msrb.mxu0 %v2954_v54  ;;  %3517 = vmatpush.msrb.mxu1 %v2970_v42  ;;  %v2668_v59 = vsel %vm2160_vm11, %v2666_v32, %v2646_v52 }
 0x23b   :  { %3535 = vmatpush.msrb.mxu2 %v2988_v9  ;;  %3556 = vmatpush.msrb.mxu3 %v3003_v40  ;;  %v6314_v40 = vsel %vm2163_vm12, %v2624_v26, %v2602_v43  ;;  %v2710_v43 = vsel %vm2157_vm10, %v2682_v55, %v2686_v56  ;;  %v2683_v20 = vrot.slane %v6044_v41, 4  ;;  %v2687_v32 = vrot.slane %v6049_v58, 3 }
 0x23c   :  { %v6299_v27 = vmin.f32 %v2077_v46, 1.0  ;;  %v2625_v46 = vsel %vm2160_vm11, %v2623_v17, %v6225_v4  ;;  %v7035_v8 = vrot.slane %v6283_v34, 4 }
 0x23d   :  { %3536 = vmatpush.msrb.mxu2 %v2987_v53  ;;  %3557 = vmatpush.msrb.mxu3 %v3002_v7  ;;  %v6325_v42 = vsel %vm2163_vm12, %v2625_v46, %v2603_v57  ;;  %v2667_v7 = vsel %vm2157_vm10, %v2639_v45, %v2643_v63  ;;  %v6348_v45 = vsel %vm2163_vm12, %v2668_v59, %v6072_v44 }
 0x23e   :  { %v2669_v63 = vsel %vm2160_vm11, %v2667_v7, %v2647_v5  ;;  %v6371_v7 = vsel %vm2157_vm10, %v2683_v20, %v2687_v32 }
 0x23f   :  { %3537 = vmatpush.msrb.mxu2 %v2986_v24  ;;  %v2694_v24 = vrot.slane %v6072_v44, 1 }
 0x246   :  { %v1884_v9 = vpop.f32.mrf.mxu0  ;;  %v1907_v31 = vpop.f32.mrf.mxu1 }
 0x247   :  { %v2059_v53 = vmax.f32 %v1884_v9, 0.0  ;;  %v2060_v17 = vmax.f32 %v1907_v31, 0.0  ;;  %v2690_v31 = vrot.slane %v6107_v48, 2 }
 0x249   :  { %v6327_v16 = vmin.f32 %v2059_v53, 1.0  ;;  %v6329_v9 = vmin.f32 %v2060_v17, 1.0  ;;  %v2712_v55 = vsel %vm2160_vm11, %v2710_v43, %v2690_v31  ;;  %v6364_v31 = vsel %vm2163_vm12, %v2669_v63, %v6200_v60 }
 0x24b   :  { %v2135_v26 = vrot.slane %v6327_v16, 4  ;;  %v2136_v57 = vrot.slane %v6329_v9, 4  ;;  %v2194_v46 = vrot.slane %v6327_v16, 5  ;;  %v2195_v52 = vrot.slane %v6329_v9, 5 }
 0x24c   :  { %v2238_v54 = vrot.slane %v6327_v16, 6  ;;  %v2239_v19 = vrot.slane %v6329_v9, 6  ;;  %v2282_v43 = vrot.slane %v6327_v16, 7  ;;  %v2374_v32 = vrot.slane %v6327_v16, 1 }
 0x24d   :  { %v2167_v17 = vsel %vm2166_vm13, %v6095_v11, %v2135_v26  ;;  %v2168_v59 = vsel %vm2166_vm13, %v6098_v2, %v2136_v57  ;;  %v2216_v5 = vsel %vm2166_vm13, %v6103_v38, %v2194_v46  ;;  %v6367_v11 = vsel %vm2163_vm12, %v2712_v55, %v2694_v24 }
 0x24e   :  { %v1887_v56 = vpop.f32.mrf.mxu0  ;;  %v1910_v53 = vpop.f32.mrf.mxu1  ;;  %v6376_v2 = vsel %vm2169_vm14, %v2167_v17, %v2141_v21  ;;  %v2217_v38 = vsel %vm2166_vm13, %v6110_v50, %v2195_v52  ;;  %v2283_v57 = vrot.slane %v6329_v9, 7  ;;  %v6384_v24 = vsel %vm2169_vm14, %v2168_v59, %v2142_v14 }
 0x24f   :  { %v2075_v47 = vmax.f32 %v1887_v56, 0.0  ;;  %v2076_v56 = vmax.f32 %v1910_v53, 0.0  ;;  %v6389_v20 = vsel %vm2169_vm14, %v2216_v5, %v2198_v10  ;;  %v2260_v46 = vsel %vm2166_vm13, %v6113_v62, %v2238_v54 }
 0x250   :  { %v2261_v21 = vsel %vm2166_vm13, %v6206_v51, %v2239_v19  ;;  %v2304_v50 = vsel %vm2166_vm13, %v6215_v29, %v2282_v43  ;;  %v2418_v17 = vrot.slane %v6327_v16, 2  ;;  %v2419_v14 = vrot.slane %v6329_v9, 2 }
 0x251   :  { %v6395_v53 = vmin.f32 %v2075_v47, 1.0  ;;  %v2375_v10 = vrot.slane %v6329_v9, 1  ;;  %v2462_v52 = vrot.slane %v6327_v16, 3  ;;  %v2463_v62 = vrot.slane %v6329_v9, 3 }
 0x252   :  { %v6405_v54 = vmin.f32 %v2076_v56, 1.0  ;;  %v2305_v51 = vsel %vm2166_vm13, %v6219_v1, %v2283_v57  ;;  %v2436_v29 = vsel %vm2166_vm13, %v6147_v36, %v2418_v17  ;;  %v2437_v19 = vsel %vm2166_vm13, %v6156_v0, %v2419_v14 }
 0x253   :  { %v6416_v47 = vsel %vm2169_vm14, %v2436_v29, %v2422_v33  ;;  %v6421_v63 = vsel %vm2169_vm14, %v2437_v19, %v2423_v12  ;;  %v2480_v55 = vsel %vm2166_vm13, %v6176_v13, %v2462_v52  ;;  %v2481_v1 = vsel %vm2166_vm13, %v6181_v15, %v2463_v62 }
 0x254   :  { %v2348_v36 = vsel %vm2166_vm13, %v6230_v3, %v6327_v16  ;;  %v2349_v0 = vsel %vm2166_vm13, %v6233_v39, %v6329_v9  ;;  %v6436_v33 = vsel %vm2169_vm14, %v2480_v55, %v2466_v61  ;;  %v7024_v12 = vrot.slane %v6238_v6, 2 }
 0x255   :  { %v7025_v15 = vrot.slane %v6238_v6, 4  ;;  %v2392_v3 = vsel %vm2166_vm13, %v6236_v49, %v2374_v32  ;;  %v2393_v39 = vsel %vm2166_vm13, %v6242_v35, %v2375_v10  ;;  %v2510_v16 = vrot.slane %v6395_v53, 4 }
 0x256   :  { %v6441_v13 = vsel %vm2169_vm14, %v2481_v1, %v7024_v12  ;;  %v7026_v61 = vrot.slane %v6210_v23, 5  ;;  %v7027_v5 = vrot.slane %v6238_v6, 5  ;;  %v7028_v56 = vrot.slane %v6210_v23, 6 }
 0x257   :  { %v2219_v59 = vsel %vm2169_vm14, %v2217_v38, %v7025_v15  ;;  %v2511_v49 = vrot.slane %v6405_v54, 4  ;;  %v7029_v35 = vrot.slane %v6238_v6, 6  ;;  %v6485_v52 = vsel %vm2169_vm14, %v2392_v3, %v6210_v23 }
 0x258   :  { %v6454_v9 = vsel %vm2169_vm14, %v2260_v46, %v7026_v61  ;;  %v6459_v43 = vsel %vm2169_vm14, %v2261_v21, %v7027_v5  ;;  %v6464_v38 = vsel %vm2169_vm14, %v2304_v50, %v7028_v56  ;;  %v7030_v46 = vrot.slane %v6210_v23, 7 }
 0x259   :  { %v6470_v57 = vsel %vm2169_vm14, %v2305_v51, %v7029_v35  ;;  %v7031_v21 = vrot.slane %v6238_v6, 7  ;;  %v2562_v50 = vrot.slane %v6395_v53, 5  ;;  %v2022_v32 = vpop.f32.mrf.mxu2  ;;  %v2045_v10 = vpop.f32.mrf.mxu3  ;;  %v6489_v62 = vsel %vm2169_vm14, %v2393_v39, %v6238_v6 }
 0x25a   :  { %v6475_v17 = vsel %vm2169_vm14, %v2348_v36, %v7030_v46  ;;  %v2563_v51 = vrot.slane %v6405_v54, 5  ;;  %v2606_v29 = vrot.slane %v6395_v53, 6  ;;  %v2065_v19 = vmax.f32 %v2022_v32, 0.0 }
 0x25b   :  { %v6480_v14 = vsel %vm2169_vm14, %v2349_v0, %v7031_v21  ;;  %v2066_v55 = vmax.f32 %v2045_v10, 0.0  ;;  %v1976_v1 = vpop.f32.mrf.mxu0  ;;  %v1999_v36 = vpop.f32.mrf.mxu1  ;;  %v2538_v0 = vsel %vm2166_vm13, %v6276_v18, %v2510_v16  ;;  %v2607_v12 = vrot.slane %v6405_v54, 6 }
 0x25c   :  { %v2063_v15 = vmax.f32 %v1976_v1, 0.0  ;;  %v2064_v23 = vmax.f32 %v1999_v36, 0.0  ;;  %v2539_v3 = vsel %vm2166_vm13, %v6293_v25, %v2511_v49  ;;  %v2650_v6 = vrot.slane %v6395_v53, 7 }
 0x25d   :  { %v6499_v39 = vmin.f32 %v2065_v19, 1.0  ;;  %v6501_v61 = vmin.f32 %v2066_v55, 1.0  ;;  %v2584_v5 = vsel %vm2166_vm13, %v6302_v28, %v2562_v50  ;;  %v2651_v56 = vrot.slane %v6405_v54, 7 }
 0x25e   :  { %v6506_v35 = vmin.f32 %v2063_v15, 1.0  ;;  %v6508_v18 = vmin.f32 %v2064_v23, 1.0  ;;  %v2585_v16 = vsel %vm2166_vm13, %v6305_v37, %v2563_v51  ;;  %v2628_v25 = vsel %vm2166_vm13, %v6314_v40, %v2606_v29 }
 0x25f   :  { %v2153_v49 = vrot.slane %v6499_v39, 1  ;;  %v2154_v46 = vrot.slane %v6501_v61, 1  ;;  %v2206_v21 = vrot.slane %v6499_v39, 2  ;;  %v2207_v28 = vrot.slane %v6501_v61, 2 }
 0x260   :  { %v2147_v50 = vrot.slane %v6506_v35, 2  ;;  %v2148_v32 = vrot.slane %v6508_v18, 2  ;;  %v2202_v10 = vrot.slane %v6506_v35, 3  ;;  %v2203_v19 = vrot.slane %v6508_v18, 3 }
 0x261   :  { %v7032_v37 = vrot.slane %v6299_v27, 3  ;;  %v7033_v51 = vrot.slane %v6283_v34, 3  ;;  %v7034_v55 = vrot.slane %v6299_v27, 4  ;;  %v2629_v36 = vsel %vm2166_vm13, %v6325_v42, %v2607_v12  ;;  %v3033_v42 = vld [vmem:[#allocation11 + $0x478] sm:$0xff] }
 0x262   :  { %v6539_v15 = vpop.f32.mrf.mxu2  ;;  %v2173_v23 = vsel %vm2172_vm15, %v6376_v2, %v2147_v50  ;;  %v3049_v12 = vld [vmem:[#allocation11 + $0x4f8] sm:$0xff]  ;;  %v6553_v2 = vsel %vm2169_vm14, %v2585_v16, %v7035_v8  ;;  %v3032_v8 = vld [vmem:[#allocation11 + $0x470] sm:$0xff] }
 0x263   :  { %v6525_v40 = vsel %vm2169_vm14, %v2538_v0, %v7032_v37  ;;  %v6530_v29 = vsel %vm2169_vm14, %v2539_v3, %v7033_v51  ;;  %v6535_v1 = vsel %vm2169_vm14, %v2584_v5, %v7034_v55  ;;  %v2174_v0 = vsel %vm2172_vm15, %v6384_v24, %v2148_v32  ;;  %v2048_v51 = vpop.f32.mrf.mxu3  ;;  %v1979_v26 = vpop.f32.mrf.mxu0  ;;  %v3081_v32 = vld [vmem:[#allocation11 + $0x5f8] sm:$0xff]  ;;  %v3048_v16 = vld [vmem:[#allocation11 + $0x4f0] sm:$0xff] }
 0x264   :  { %v2220_v3 = vsel %vm2172_vm15, %v6389_v20, %v2202_v10  ;;  %v2221_v37 = vsel %vm2172_vm15, %v2219_v59, %v2203_v19  ;;  %v2176_v5 = vsel %vm2175_vm0, %v2173_v23, %v2153_v49  ;;  %v2177_v55 = vsel %vm2175_vm0, %v2174_v0, %v2154_v46  ;;  %v2002_v20 = vpop.f32.mrf.mxu1  ;;  %v3065_v46 = vld [vmem:[#allocation11 + $0x578] sm:$0xff] }
 0x265   :  { %v7036_v24 = vrot.slane %v6299_v27, 5  ;;  %3418 = vmatmul.f32.vlgmr.msra.gmra.mxu0 %v2176_v5  ;;  %3438 = vmatmul.f32.vlgmr.msra.gmra.mxu1 %v2177_v55  ;;  %v2222_v59 = vsel %vm2175_vm0, %v2220_v3, %v2206_v21  ;;  %v2223_v49 = vsel %vm2175_vm0, %v2221_v37, %v2207_v28  ;;  %v2246_v10 = vrot.slane %v6506_v35, 4  ;;  %v3064_v55 = vld [vmem:[#allocation11 + $0x570] sm:$0xff] }
 0x266   :  { %v2247_v19 = vrot.slane %v6508_v18, 4  ;;  %3458 = vmatmul.f32.vlgmr.msra.gmra.mxu2 %v2222_v59  ;;  %3478 = vmatmul.f32.vlgmr.msra.gmra.mxu3 %v2223_v49  ;;  %v2672_v21 = vsel %vm2166_vm13, %v6348_v45, %v2650_v6  ;;  %v2673_v28 = vsel %vm2166_vm13, %v6364_v31, %v2651_v56  ;;  %v2695_v0 = vrot.slane %v6200_v60, 1  ;;  %v3031_v49 = vld [vmem:[#allocation11 + $0x468] sm:$0xff] }
 0x267   :  { %v6558_v50 = vsel %vm2169_vm14, %v2628_v25, %v7036_v24  ;;  %v7037_v25 = vrot.slane %v6283_v34, 5  ;;  %v2081_v3 = vmax.f32 %v6539_v15, 0.0  ;;  %v2082_v37 = vmax.f32 %v2048_v51, 0.0  ;;  %3562 = vmatpush.msra.mxu0 %v3033_v42  ;;  %3582 = vmatpush.msra.mxu1 %v3049_v12  ;;  %v3080_v24 = vld [vmem:[#allocation11 + $0x5f0] sm:$0xff]  ;;  %v3047_v45 = vld [vmem:[#allocation11 + $0x4e8] sm:$0xff] }
 0x268   :  { %v2079_v5 = vmax.f32 %v1979_v26, 0.0  ;;  %v2250_v59 = vrot.slane %v6499_v39, 3  ;;  %3602 = vmatpush.msra.mxu2 %v3065_v46  ;;  %3622 = vmatpush.msra.mxu3 %v3081_v32  ;;  %v2251_v6 = vrot.slane %v6501_v61, 3  ;;  %v2290_v31 = vrot.slane %v6506_v35, 5  ;;  %v3063_v26 = vld [vmem:[#allocation11 + $0x568] sm:$0xff]  ;;  %v3030_v32 = vld [vmem:[#allocation11 + $0x460] sm:$0xff] }
 0x269   :  { %v6567_v23 = vsel %vm2169_vm14, %v2629_v36, %v7037_v25  ;;  %v2080_v36 = vmax.f32 %v2002_v20, 0.0  ;;  %v2291_v56 = vrot.slane %v6508_v18, 5  ;;  %3563 = vmatpush.msra.mxu0 %v3032_v8  ;;  %3583 = vmatpush.msra.mxu1 %v3048_v16  ;;  %v3079_v15 = vld [vmem:[#allocation11 + $0x5e8] sm:$0xff]  ;;  %v2264_v51 = vsel %vm2172_vm15, %v6454_v9, %v2246_v10  ;;  %v3046_v8 = vld [vmem:[#allocation11 + $0x4e0] sm:$0xff] }
 0x26a   :  { %v2265_v42 = vsel %vm2172_vm15, %v6459_v43, %v2247_v19  ;;  %v2294_v12 = vrot.slane %v6499_v39, 4  ;;  %v7038_v20 = vrot.slane %v6299_v27, 6  ;;  %3603 = vmatpush.msra.mxu2 %v3064_v55  ;;  %3623 = vmatpush.msra.mxu3 %v3080_v24  ;;  %v2308_v16 = vsel %vm2172_vm15, %v6464_v38, %v2290_v31  ;;  %v3062_v38 = vld [vmem:[#allocation11 + $0x560] sm:$0xff] }
 0x26b   :  { %v2295_v25 = vrot.slane %v6501_v61, 4  ;;  %v7039_v9 = vrot.slane %v6283_v34, 6  ;;  %v6600_v10 = vsel %vm2166_vm13, %v6367_v11, %v6395_v53  ;;  %v6602_v19 = vmin.f32 %v2081_v3, 1.0  ;;  %3564 = vmatpush.msra.mxu0 %v3031_v49  ;;  %3584 = vmatpush.msra.mxu1 %v3047_v45  ;;  %v3078_v24 = vld [vmem:[#allocation11 + $0x5e0] sm:$0xff] }
 0x26c   :  { %v6587_v46 = vsel %vm2169_vm14, %v2672_v21, %v7038_v20  ;;  %v6604_v21 = vmin.f32 %v2082_v37, 1.0  ;;  %v6606_v55 = vmin.f32 %v2079_v5, 1.0  ;;  %v2309_v31 = vsel %vm2172_vm15, %v6470_v57, %v2291_v56  ;;  %3604 = vmatpush.msra.mxu2 %v3063_v26  ;;  %3624 = vmatpush.msra.mxu3 %v3079_v15  ;;  %v3029_v56 = vld [vmem:[#allocation11 + $0x458] sm:$0xff] }
 0x26d   :  { %v6595_v43 = vsel %vm2169_vm14, %v2673_v28, %v7039_v9  ;;  %v6610_v28 = vmin.f32 %v2080_v36, 1.0  ;;  %v2266_v11 = vsel %vm2175_vm0, %v2264_v51, %v2250_v59  ;;  %v2267_v3 = vsel %vm2175_vm0, %v2265_v42, %v2251_v6  ;;  %3565 = vmatpush.msra.mxu0 %v3030_v32  ;;  %3585 = vmatpush.msra.mxu1 %v3046_v8  ;;  %v3045_v59 = vld [vmem:[#allocation11 + $0x4d8] sm:$0xff] }
 0x26e   :  { %v2334_v37 = vrot.slane %v6506_v35, 6  ;;  %v2310_v5 = vsel %vm2175_vm0, %v2308_v16, %v2294_v12  ;;  %v2338_v49 = vrot.slane %v6499_v39, 5  ;;  %v2335_v45 = vrot.slane %v6508_v18, 6  ;;  %3605 = vmatpush.msra.mxu2 %v3062_v38  ;;  %3625 = vmatpush.msra.mxu3 %v3078_v24  ;;  %v3061_v51 = vld [vmem:[#allocation11 + $0x558] sm:$0xff]  ;;  %v3044_v16 = vld [vmem:[#allocation11 + $0x4d0] sm:$0xff] }
 0x26f   :  { %v2426_v57 = vrot.slane %v6499_v39, 7  ;;  %v2311_v36 = vsel %vm2175_vm0, %v2309_v31, %v2295_v25  ;;  %v2440_v6 = vsel %vm2172_vm15, %v6416_v47, %v6506_v35  ;;  %v2427_v26 = vrot.slane %v6501_v61, 7  ;;  %3498 = vmatmul.f32.vlgmr.msrb.gmra.mxu0 %v2266_v11  ;;  %3518 = vmatmul.f32.vlgmr.msrb.gmra.mxu1 %v2267_v3  ;;  %v3077_v42 = vld [vmem:[#allocation11 + $0x5d8] sm:$0xff]  ;;  %v3028_v47 = vld [vmem:[#allocation11 + $0x450] sm:$0xff] }
 0x270   :  { %v2441_v15 = vsel %vm2172_vm15, %v6421_v63, %v6508_v18  ;;  %v2470_v20 = vrot.slane %v6506_v35, 1  ;;  %v2471_v32 = vrot.slane %v6508_v18, 1  ;;  %v2522_v8 = vrot.slane %v6606_v55, 2  ;;  %3538 = vmatmul.f32.vlgmr.msrb.gmra.mxu2 %v2310_v5  ;;  %3558 = vmatmul.f32.vlgmr.msrb.gmra.mxu3 %v2311_v36  ;;  %v3060_v24 = vld [vmem:[#allocation11 + $0x550] sm:$0xff]  ;;  %v3027_v36 = vld [vmem:[#allocation11 + $0x448] sm:$0xff] }
 0x271   :  { %v6628_v12 = vsel %vm2175_vm0, %v2440_v6, %v2426_v57  ;;  %v6634_v25 = vsel %vm2175_vm0, %v2441_v15, %v2427_v26  ;;  %v2528_v63 = vrot.slane %v6602_v19, 1  ;;  %v2523_v9 = vrot.slane %v6610_v28, 2  ;;  %3566 = vmatpush.msra.mxu0 %v3029_v56  ;;  %3586 = vmatpush.msra.mxu1 %v3045_v59  ;;  %v3076_v31 = vld [vmem:[#allocation11 + $0x5d0] sm:$0xff]  ;;  %v3043_v6 = vld [vmem:[#allocation11 + $0x4c8] sm:$0xff] }
 0x272   :  { %v2529_v38 = vrot.slane %v6604_v21, 1  ;;  %v2484_v11 = vsel %vm2172_vm15, %v6436_v33, %v2470_v20  ;;  %v2485_v3 = vsel %vm2172_vm15, %v6441_v13, %v2471_v32  ;;  %v2542_v5 = vsel %vm2172_vm15, %v6525_v40, %v2522_v8  ;;  %3606 = vmatpush.msra.mxu2 %v3061_v51  ;;  %3626 = vmatpush.msra.mxu3 %v3077_v42  ;;  %v3059_v40 = vld [vmem:[#allocation11 + $0x548] sm:$0xff]  ;;  %v3026_v32 = vld [vmem:[#allocation11 + $0x440] sm:$0xff] }
 0x273   :  { %v2570_v57 = vrot.slane %v6606_v55, 3  ;;  %v6648_v56 = vsel %vm2175_vm0, %v2484_v11, %v6499_v39  ;;  %v6652_v59 = vsel %vm2175_vm0, %v2485_v3, %v6501_v61  ;;  %v6655_v33 = vsel %vm2175_vm0, %v2542_v5, %v2528_v63  ;;  %3567 = vmatpush.msra.mxu0 %v3028_v47  ;;  %3587 = vmatpush.msra.mxu1 %v3044_v16  ;;  %v3075_v26 = vld [vmem:[#allocation11 + $0x5c8] sm:$0xff]  ;;  %v3042_v8 = vld [vmem:[#allocation11 + $0x4c0] sm:$0xff]  ;;  %v3025_v3 = vld [vmem:[#allocation11 + $0x438] sm:$0xff] }
 0x274   :  { %v2574_v13 = vrot.slane %v6602_v19, 2  ;;  %v2543_v15 = vsel %vm2172_vm15, %v6530_v29, %v2523_v9  ;;  %v2571_v42 = vrot.slane %v6610_v28, 3  ;;  %v2575_v20 = vrot.slane %v6604_v21, 2  ;;  %3607 = vmatpush.msra.mxu2 %v3060_v24  ;;  %3627 = vmatpush.msra.mxu3 %v3076_v31  ;;  %v3074_v9 = vld [vmem:[#allocation11 + $0x5c0] sm:$0xff]  ;;  %v3041_v5 = vld [vmem:[#allocation11 + $0x4b8] sm:$0xff] }
 0x275   :  { %v2588_v51 = vsel %vm2172_vm15, %v6535_v1, %v2570_v57  ;;  %v6665_v63 = vsel %vm2175_vm0, %v2543_v15, %v2529_v38  ;;  %v2614_v16 = vrot.slane %v6606_v55, 4  ;;  %v2618_v29 = vrot.slane %v6602_v19, 3  ;;  %3568 = vmatpush.msra.mxu0 %v3027_v36  ;;  %3588 = vmatpush.msra.mxu1 %v3043_v6  ;;  %v3058_v1 = vld [vmem:[#allocation11 + $0x540] sm:$0xff]  ;;  %v3073_v15 = vld [vmem:[#allocation11 + $0x5b8] sm:$0xff] }
 0x276   :  { %v6668_v47 = vsel %vm2175_vm0, %v2588_v51, %v2574_v13  ;;  %v2589_v24 = vsel %vm2172_vm15, %v6553_v2, %v2571_v42  ;;  %v2615_v31 = vrot.slane %v6610_v28, 4  ;;  %v2619_v11 = vrot.slane %v6604_v21, 3  ;;  %3608 = vmatpush.msra.mxu2 %v3059_v40  ;;  %3628 = vmatpush.msra.mxu3 %v3075_v26  ;;  %v3057_v13 = vld [vmem:[#allocation11 + $0x538] sm:$0xff] }
 0x277   :  { %v2658_v38 = vrot.slane %v6606_v55, 5  ;;  %v6678_v57 = vsel %vm2175_vm0, %v2589_v24, %v2575_v20  ;;  %v2632_v36 = vsel %vm2172_vm15, %v6558_v50, %v2614_v16  ;;  %v2662_v6 = vrot.slane %v6602_v19, 4  ;;  %3569 = vmatpush.msra.mxu0 %v3026_v32  ;;  %3589 = vmatpush.msra.mxu1 %v3042_v8  ;;  %v3024_v50 = vld [vmem:[#allocation11 + $0x430] sm:$0xff] }
 0x278   :  { %v2659_v2 = vrot.slane %v6610_v28, 5  ;;  %v6685_v51 = vsel %vm2175_vm0, %v2632_v36, %v2618_v29  ;;  %v2633_v40 = vsel %vm2172_vm15, %v6567_v23, %v2615_v31  ;;  %v2663_v42 = vrot.slane %v6604_v21, 4  ;;  %3609 = vmatpush.msra.mxu2 %v3058_v1  ;;  %3629 = vmatpush.msra.mxu3 %v3074_v9  ;;  %v3040_v20 = vld [vmem:[#allocation11 + $0x4b0] sm:$0xff] }
 0x279   :  { %v2676_v26 = vsel %vm2172_vm15, %v6587_v46, %v2658_v38  ;;  %v6693_v32 = vsel %vm2175_vm0, %v2633_v40, %v2619_v11  ;;  %v2702_v23 = vrot.slane %v6606_v55, 6  ;;  %3570 = vmatpush.msra.mxu0 %v3025_v3  ;;  %3590 = vmatpush.msra.mxu1 %v3041_v5  ;;  %v3056_v46 = vld [vmem:[#allocation11 + $0x530] sm:$0xff]  ;;  %v2378_v1 = vrot.slane %v6506_v35, 7  ;;  %v3039_v38 = vld [vmem:[#allocation11 + $0x4a8] sm:$0xff] }
 0x27a   :  { %v6696_v8 = vsel %vm2175_vm0, %v2676_v26, %v2662_v6  ;;  %v2677_v16 = vsel %vm2172_vm15, %v6595_v43, %v2659_v2  ;;  %v3072_v29 = vld [vmem:[#allocation11 + $0x5b0] sm:$0xff]  ;;  %v2706_v24 = vrot.slane %v6602_v19, 5  ;;  %v7040_v31 = vrot.slane %v6299_v27, 7  ;;  %3610 = vmatpush.msra.mxu2 %v3057_v13  ;;  %3630 = vmatpush.msra.mxu3 %v3073_v15  ;;  %v3023_v43 = vld [vmem:[#allocation11 + $0x428] sm:$0xff]  ;;  %v3022_v13 = vld [vmem:[#allocation11 + $0x420] sm:$0xff] }
 0x27b   :  { %v6703_v9 = vsel %vm2175_vm0, %v2677_v16, %v2663_v42  ;;  %v2352_v3 = vsel %vm2172_vm15, %v6475_v17, %v2334_v37  ;;  %v2339_v5 = vrot.slane %v6501_v61, 5  ;;  %v2726_v6 = vrot.slane %v6034_v30, 5  ;;  %3571 = vmatpush.msra.mxu0 %v3024_v50  ;;  %3591 = vmatpush.msra.mxu1 %v3040_v20  ;;  %v3055_v2 = vld [vmem:[#allocation11 + $0x528] sm:$0xff]  ;;  %v3038_v15 = vld [vmem:[#allocation11 + $0x4a0] sm:$0xff] }
 0x27c   :  { %v2718_v11 = vsel %vm2169_vm14, %v6600_v10, %v7040_v31  ;;  %v3071_v40 = vld [vmem:[#allocation11 + $0x5a8] sm:$0xff]  ;;  %v2353_v10 = vsel %vm2172_vm15, %v6480_v14, %v2335_v45  ;;  %v2730_v37 = vrot.slane %v6036_v22, 4  ;;  %3611 = vmatpush.msra.mxu2 %v3056_v46  ;;  %3631 = vmatpush.msra.mxu3 %v3072_v29  ;;  %v2382_v26 = vrot.slane %v6499_v39, 6  ;;  %v3054_v20 = vld [vmem:[#allocation11 + $0x520] sm:$0xff]  ;;  %v3037_v31 = vld [vmem:[#allocation11 + $0x498] sm:$0xff] }
 0x27d   :  { %v2720_v36 = vsel %vm2172_vm15, %v2718_v11, %v2702_v23  ;;  %v2379_v42 = vrot.slane %v6508_v18, 7  ;;  %v7042_v50 = vrot.slane %v6225_v4, 2  ;;  %v2727_v45 = vrot.slane %v6044_v41, 5  ;;  %3572 = vmatpush.msra.mxu0 %v3023_v43  ;;  %3592 = vmatpush.msra.mxu1 %v3039_v38  ;;  %v3070_v16 = vld [vmem:[#allocation11 + $0x5a0] sm:$0xff] }
 0x27e   :  { %v6722_v35 = vsel %vm2175_vm0, %v2720_v36, %v2706_v24  ;;  %v6736_v23 = vsel %vm2175_vm0, %v2352_v3, %v2338_v49  ;;  %v2396_v46 = vsel %vm2172_vm15, %v6485_v52, %v2378_v1  ;;  %v2734_v29 = vrot.slane %v6107_v48, 3  ;;  %3612 = vmatpush.msra.mxu2 %v3055_v2  ;;  %3632 = vmatpush.msra.mxu3 %v3071_v40  ;;  %v3053_v52 = vld [vmem:[#allocation11 + $0x518] sm:$0xff]  ;;  %v3036_v2 = vld [vmem:[#allocation11 + $0x490] sm:$0xff] }
 0x27f   :  { %7041 = vst [vmem:[#allocation22_spill] sm:$0xff] %v6722_v35  ;;  %v2713_v14 = vsel %vm2160_vm11, %v6371_v7, %v7042_v50  ;;  %v2731_v24 = vrot.slane %v6049_v58, 4  ;;  %v3021_v7 = vld [vmem:[#allocation11 + $0x418] sm:$0xff]  ;;  %v6743_v11 = vsel %vm2175_vm0, %v2353_v10, %v2339_v5  ;;  %v2754_v43 = vsel %vm2157_vm10, %v2726_v6, %v2730_v37  ;;  %3573 = vmatpush.msra.mxu0 %v3022_v13  ;;  %v3020_v6 = vld [vmem:[#allocation11 + $0x410] sm:$0xff] }
 0x280   :  { %v2735_v39 = vrot.slane %v6225_v4, 3  ;;  %v2770_v49 = vrot.slane %v6034_v30, 6  ;;  %3593 = vmatpush.msra.mxu1 %v3038_v15  ;;  %v3069_v1 = vld [vmem:[#allocation11 + $0x598] sm:$0xff]  ;;  %v2715_v38 = vsel %vm2163_vm12, %v2713_v14, %v2695_v0  ;;  %v2774_v36 = vrot.slane %v6036_v22, 5  ;;  %3613 = vmatpush.msra.mxu2 %v3054_v20  ;;  %v3052_v13 = vld [vmem:[#allocation11 + $0x510] sm:$0xff]  ;;  %v3019_v20 = vld [vmem:[#allocation11 + $0x408] sm:$0xff] }
 0x281   :  { %v2755_v3 = vsel %vm2157_vm10, %v2727_v45, %v2731_v24  ;;  %v2778_v5 = vrot.slane %v6107_v48, 4  ;;  %3633 = vmatpush.msra.mxu3 %v3070_v16  ;;  %v6755_v40 = vsel %vm2175_vm0, %v2396_v46, %v2382_v26  ;;  %v2717_v10 = vsel %vm2166_vm13, %v2715_v38, %v6405_v54  ;;  %3574 = vmatpush.msra.mxu0 %v3021_v7  ;;  %v3068_v15 = vld [vmem:[#allocation11 + $0x590] sm:$0xff]  ;;  %v3035_v16 = vld [vmem:[#allocation11 + $0x488] sm:$0xff] }
 0x282   :  { %v2738_v37 = vrot.slane %v6072_v44, 2  ;;  %v2742_v0 = vrot.slane %v6395_v53, 1  ;;  %3594 = vmatpush.msra.mxu1 %v3037_v31  ;;  %v2756_v50 = vsel %vm2160_vm11, %v2754_v43, %v2734_v29  ;;  %v2739_v14 = vrot.slane %v6200_v60, 2  ;;  %3614 = vmatpush.msra.mxu2 %v3053_v52  ;;  %v3051_v29 = vld [vmem:[#allocation11 + $0x508] sm:$0xff] }
 0x283   :  { %v2743_v45 = vrot.slane %v6405_v54, 1  ;;  %v2798_v26 = vsel %vm2157_vm10, %v2770_v49, %v2774_v36  ;;  %3634 = vmatpush.msra.mxu3 %v3069_v1  ;;  %v2757_v46 = vsel %vm2160_vm11, %v2755_v3, %v2735_v39  ;;  %v2782_v24 = vrot.slane %v6072_v44, 3  ;;  %3575 = vmatpush.msra.mxu0 %v3020_v6  ;;  %v3067_v43 = vld [vmem:[#allocation11 + $0x588] sm:$0xff]  ;;  %v3018_v39 = vld [vmem:[#allocation11 + $0x400] sm:$0xff] }
 0x284   :  { %v2771_v7 = vrot.slane %v6044_v41, 6  ;;  %v2775_v31 = vrot.slane %v6049_v58, 5  ;;  %3595 = vmatpush.msra.mxu1 %v3036_v2  ;;  %v2703_v38 = vrot.slane %v6610_v28, 6  ;;  %v2786_v49 = vrot.slane %v6395_v53, 2  ;;  %3615 = vmatpush.msra.mxu2 %v3052_v13  ;;  %v3034_v3 = vld [vmem:[#allocation11 + $0x480] sm:$0xff] }
 0x285   :  { %v2800_v52 = vsel %vm2160_vm11, %v2798_v26, %v2778_v5  ;;  %v2779_v1 = vrot.slane %v6225_v4, 4  ;;  %3635 = vmatpush.msra.mxu3 %v3068_v15  ;;  %v2397_v36 = vsel %vm2172_vm15, %v6489_v62, %v2379_v42  ;;  %v2707_v6 = vrot.slane %v6604_v21, 5  ;;  %3576 = vmatpush.msra.mxu0 %v3019_v20  ;;  %v3050_v5 = vld [vmem:[#allocation11 + $0x500] sm:$0xff] }
 0x286   :  { %v2758_v2 = vsel %vm2163_vm12, %v2756_v50, %v2738_v37  ;;  %v2799_v17 = vsel %vm2157_vm10, %v2771_v7, %v2775_v31  ;;  %3596 = vmatpush.msra.mxu1 %v3035_v16  ;;  %v3066_v26 = vld [vmem:[#allocation11 + $0x580] sm:$0xff]  ;;  %v2383_v13 = vrot.slane %v6501_v61, 6  ;;  %v7043_v15 = vrot.slane %v6283_v34, 7  ;;  %3616 = vmatpush.msra.mxu2 %v3051_v29  ;;  %v3113_v16 = vld [vmem:[#allocation11 + $0x6f8] sm:$0xff] }
 0x287   :  { %v2760_v18 = vsel %vm2166_vm13, %v2758_v2, %v2742_v0  ;;  %v2759_v62 = vsel %vm2163_vm12, %v2757_v46, %v2739_v14  ;;  %3636 = vmatpush.msra.mxu3 %v3067_v43  ;;  %v2790_v37 = vrot.slane %v6299_v27, 1  ;;  %v2802_v50 = vsel %vm2163_vm12, %v2800_v52, %v2782_v24  ;;  %3577 = vmatpush.msra.mxu0 %v3018_v39  ;;  %v3097_v14 = vld [vmem:[#allocation11 + $0x678] sm:$0xff]  ;;  %v3144_v39 = vld [vmem:[#allocation11 + $0x7f0] sm:$0xff]  ;;  %v3095_v2 = vld [vmem:[#allocation11 + $0x668] sm:$0xff] }
 0x288   :  { %v2719_v35 = vsel %vm2169_vm14, %v2717_v10, %v7043_v15  ;;  %v2761_v42 = vsel %vm2166_vm13, %v2759_v62, %v2743_v45  ;;  %v2783_v20 = vrot.slane %v6200_v60, 3  ;;  %3597 = vmatpush.msra.mxu1 %v3034_v3  ;;  %v2804_v10 = vsel %vm2166_vm13, %v2802_v50, %v2786_v49  ;;  %3617 = vmatpush.msra.mxu2 %v3050_v5  ;;  %v3145_v31 = vld [vmem:[#allocation11 + $0x7f8] sm:$0xff]  ;;  %v3111_v5 = vld [vmem:[#allocation11 + $0x6e8] sm:$0xff]  ;;  %v3110_v50 = vld [vmem:[#allocation11 + $0x6e0] sm:$0xff] }
 0x289   :  { %v2721_v61 = vsel %vm2172_vm15, %v2719_v35, %v2703_v38  ;;  %v2801_v0 = vsel %vm2160_vm11, %v2799_v17, %v2779_v1  ;;  %3637 = vmatpush.msra.mxu3 %v3066_v26  ;;  %v2787_v46 = vrot.slane %v6405_v54, 2  ;;  %v2814_v24 = vrot.slane %v6034_v30, 7  ;;  %3578 = vmatmul.f32.vlgmr.msra.gmra.mxu0 %v6736_v23  ;;  %v3129_v17 = vld [vmem:[#allocation11 + $0x778] sm:$0xff]  ;;  %v3096_v30 = vld [vmem:[#allocation11 + $0x670] sm:$0xff]  ;;  %v3127_v15 = vld [vmem:[#allocation11 + $0x768] sm:$0xff] }
 0x28a   :  { %v6794_v45 = vsel %vm2175_vm0, %v2721_v61, %v2707_v6  ;;  %v2818_v7 = vrot.slane %v6036_v22, 6  ;;  %3598 = vmatmul.f32.vlgmr.msra.gmra.mxu1 %v6743_v11  ;;  %v2399_v35 = vsel %vm2175_vm0, %v2397_v36, %v2383_v13  ;;  %v2762_v29 = vsel %vm2169_vm14, %v2760_v18, %v6299_v27  ;;  %3618 = vmatmul.f32.vlgmr.msra.gmra.mxu2 %v6755_v40  ;;  %v3112_v22 = vld [vmem:[#allocation11 + $0x6f0] sm:$0xff]  ;;  %v3143_v18 = vld [vmem:[#allocation11 + $0x7e8] sm:$0xff] }
 0x28b   :  { %v2763_v43 = vsel %vm2169_vm14, %v2761_v42, %v6283_v34  ;;  %v2791_v38 = vrot.slane %v6283_v34, 1  ;;  %3638 = vmatmul.f32.vlgmr.msra.gmra.mxu3 %v2399_v35  ;;  %v2806_v23 = vsel %vm2169_vm14, %v2804_v10, %v2790_v37  ;;  %v2803_v11 = vsel %vm2163_vm12, %v2801_v0, %v2783_v20  ;;  %3642 = vmatpush.msrb.mxu0 %v3097_v14  ;;  %v3128_v1 = vld [vmem:[#allocation11 + $0x770] sm:$0xff]  ;;  %v3094_v37 = vld [vmem:[#allocation11 + $0x660] sm:$0xff]  ;;  %v3109_v35 = vld [vmem:[#allocation11 + $0x6d8] sm:$0xff] }
 0x28c   :  { %v2815_v49 = vrot.slane %v6044_v41, 7  ;;  %v2819_v52 = vrot.slane %v6049_v58, 6  ;;  %3662 = vmatpush.msrb.mxu1 %v3113_v16  ;;  %v2746_v3 = vrot.slane %v6606_v55, 7  ;;  %v2747_v36 = vrot.slane %v6610_v28, 7  ;;  %3682 = vmatpush.msrb.mxu2 %v3129_v17  ;;  %v3126_v14 = vld [vmem:[#allocation11 + $0x760] sm:$0xff] }
 0x28d   :  { %v2822_v40 = vrot.slane %v6107_v48, 5  ;;  %v2826_v6 = vrot.slane %v6072_v44, 4  ;;  %3702 = vmatpush.msrb.mxu3 %v3145_v31  ;;  %v2750_v41 = vrot.slane %v6602_v19, 6  ;;  %v2751_v58 = vrot.slane %v6604_v21, 6  ;;  %3643 = vmatpush.msrb.mxu0 %v3096_v30  ;;  %v3141_v30 = vld [vmem:[#allocation11 + $0x7d8] sm:$0xff] }
 0x28e   :  { %v2805_v26 = vsel %vm2166_vm13, %v2803_v11, %v2787_v46  ;;  %v2842_v13 = vsel %vm2157_vm10, %v2814_v24, %v2818_v7  ;;  %3663 = vmatpush.msrb.mxu1 %v3112_v22  ;;  %v2764_v48 = vsel %vm2172_vm15, %v2762_v29, %v2746_v3  ;;  %v2765_v44 = vsel %vm2172_vm15, %v2763_v43, %v2747_v36  ;;  %v3093_v7 = vld [vmem:[#allocation11 + $0x658] sm:$0xff]  ;;  %v3092_v11 = vld [vmem:[#allocation11 + $0x650] sm:$0xff]  ;;  %v3091_v36 = vld [vmem:[#allocation11 + $0x648] sm:$0xff] }
 0x28f   :  { %v2830_v62 = vrot.slane %v6395_v53, 3  ;;  %v2823_v42 = vrot.slane %v6225_v4, 5  ;;  %3683 = vmatpush.msrb.mxu2 %v3128_v1  ;;  %3703 = vmatpush.msrb.mxu3 %v3144_v39  ;;  %v6825_v20 = vsel %vm2175_vm0, %v2764_v48, %v2750_v41  ;;  %v6828_v61 = vsel %vm2175_vm0, %v2765_v44, %v2751_v58  ;;  %v3142_v53 = vld [vmem:[#allocation11 + $0x7e0] sm:$0xff]  ;;  %v3125_v43 = vld [vmem:[#allocation11 + $0x758] sm:$0xff]  ;;  %v3140_v39 = vld [vmem:[#allocation11 + $0x7d0] sm:$0xff] }
 0x290   :  { %v2794_v10 = vrot.slane %v6602_v19, 7  ;;  %v2843_v0 = vsel %vm2157_vm10, %v2815_v49, %v2819_v52  ;;  %3644 = vmatpush.msrb.mxu0 %v3095_v2  ;;  %3664 = vmatpush.msrb.mxu1 %v3111_v5  ;;  %v2808_v4 = vsel %vm2172_vm15, %v2806_v23, %v6606_v55  ;;  %v2795_v16 = vrot.slane %v6604_v21, 7  ;;  %v3108_v49 = vld [vmem:[#allocation11 + $0x6d0] sm:$0xff]  ;;  %v3123_v5 = vld [vmem:[#allocation11 + $0x748] sm:$0xff]  ;;  %v3090_v58 = vld [vmem:[#allocation11 + $0x640] sm:$0xff] }
 0x291   :  { %v2807_v46 = vsel %vm2169_vm14, %v2805_v26, %v2791_v38  ;;  %v2844_v24 = vsel %vm2160_vm11, %v2842_v13, %v2822_v40  ;;  %3684 = vmatpush.msrb.mxu2 %v3127_v15  ;;  %3704 = vmatpush.msrb.mxu3 %v3143_v18  ;;  %v2827_v29 = vrot.slane %v6200_v60, 4  ;;  %v2831_v22 = vrot.slane %v6405_v54, 3  ;;  %v3124_v60 = vld [vmem:[#allocation11 + $0x750] sm:$0xff]  ;;  %v3107_v54 = vld [vmem:[#allocation11 + $0x6c8] sm:$0xff]  ;;  %v3106_v26 = vld [vmem:[#allocation11 + $0x6c0] sm:$0xff] }
 0x292   :  { %v6838_v17 = vsel %vm2175_vm0, %v2808_v4, %v2794_v10  ;;  %v2809_v31 = vsel %vm2172_vm15, %v2807_v46, %v6610_v28  ;;  %3645 = vmatpush.msrb.mxu0 %v3094_v37  ;;  %3665 = vmatpush.msrb.mxu1 %v3110_v50  ;;  %v2845_v23 = vsel %vm2160_vm11, %v2843_v0, %v2823_v42  ;;  %v2834_v52 = vrot.slane %v6299_v27, 2  ;;  %v3139_v27 = vld [vmem:[#allocation11 + $0x7c8] sm:$0xff]  ;;  %v3122_v15 = vld [vmem:[#allocation11 + $0x740] sm:$0xff]  ;;  %v3089_v44 = vld [vmem:[#allocation11 + $0x638] sm:$0xff] }
 0x293   :  { %v6844_v38 = vsel %vm2175_vm0, %v2809_v31, %v2795_v16  ;;  %3685 = vmatpush.msrb.mxu2 %v3126_v14  ;;  %3705 = vmatpush.msrb.mxu3 %v3142_v53  ;;  %v2846_v1 = vsel %vm2163_vm12, %v2844_v24, %v2826_v6  ;;  %v2835_v40 = vrot.slane %v6283_v34, 2  ;;  %v2847_v2 = vsel %vm2163_vm12, %v2845_v23, %v2827_v29  ;;  %v3138_v34 = vld [vmem:[#allocation11 + $0x7c0] sm:$0xff]  ;;  %v3121_v37 = vld [vmem:[#allocation11 + $0x738] sm:$0xff]  ;;  %v3088_v0 = vld [vmem:[#allocation11 + $0x630] sm:$0xff] }
 0x294   :  { %3646 = vmatpush.msrb.mxu0 %v3093_v7  ;;  %3666 = vmatpush.msrb.mxu1 %v3109_v35  ;;  %v2848_v3 = vsel %vm2166_vm13, %v2846_v1, %v2830_v62  ;;  %v2838_v6 = vrot.slane %v6606_v55, 1  ;;  %v2849_v41 = vsel %vm2166_vm13, %v2847_v2, %v2831_v22  ;;  %v2839_v48 = vrot.slane %v6610_v28, 1  ;;  %v3105_v55 = vld [vmem:[#allocation11 + $0x6b8] sm:$0xff]  ;;  %v3104_v28 = vld [vmem:[#allocation11 + $0x6b0] sm:$0xff]  ;;  %v3087_v4 = vld [vmem:[#allocation11 + $0x628] sm:$0xff] }
 0x295   :  { %3686 = vmatpush.msrb.mxu2 %v3125_v43  ;;  %3706 = vmatpush.msrb.mxu3 %v3141_v30  ;;  %v2850_v13 = vsel %vm2169_vm14, %v2848_v3, %v2834_v52  ;;  %v2851_v42 = vsel %vm2169_vm14, %v2849_v41, %v2835_v40  ;;  %v3137_v50 = vld [vmem:[#allocation11 + $0x7b8] sm:$0xff]  ;;  %v3136_v53 = vld [vmem:[#allocation11 + $0x7b0] sm:$0xff]  ;;  %v3103_v16 = vld [vmem:[#allocation11 + $0x6a8] sm:$0xff] }
 0x296   :  { %3647 = vmatpush.msrb.mxu0 %v3092_v11  ;;  %3667 = vmatpush.msrb.mxu1 %v3108_v49  ;;  %v2852_v18 = vsel %vm2172_vm15, %v2850_v13, %v2838_v6  ;;  %v2853_v10 = vsel %vm2172_vm15, %v2851_v42, %v2839_v48  ;;  %v3119_v46 = vld [vmem:[#allocation11 + $0x728] sm:$0xff]  ;;  %v3086_v7 = vld [vmem:[#allocation11 + $0x620] sm:$0xff]  ;;  %v3085_v29 = vld [vmem:[#allocation11 + $0x618] sm:$0xff] }
 0x297   :  { %3687 = vmatpush.msrb.mxu2 %v3124_v60  ;;  %3707 = vmatpush.msrb.mxu3 %v3140_v39  ;;  %v6860_v62 = vsel %vm2175_vm0, %v2852_v18, %v6602_v19  ;;  %v6866_v14 = vsel %vm2175_vm0, %v2853_v10, %v6604_v21  ;;  %v3120_v19 = vld [vmem:[#allocation11 + $0x730] sm:$0xff]  ;;  %v3135_v24 = vld [vmem:[#allocation11 + $0x7a8] sm:$0xff]  ;;  %v3102_v35 = vld [vmem:[#allocation11 + $0x6a0] sm:$0xff] }
 0x298   :  { %3648 = vmatpush.msrb.mxu0 %v3091_v36  ;;  %3668 = vmatpush.msrb.mxu1 %v3107_v54  ;;  %v3118_v21 = vld [vmem:[#allocation11 + $0x720] sm:$0xff]  ;;  %v3101_v43 = vld [vmem:[#allocation11 + $0x698] sm:$0xff]  ;;  %v3084_v23 = vld [vmem:[#allocation11 + $0x610] sm:$0xff] }
 0x299   :  { %3688 = vmatpush.msrb.mxu2 %v3123_v5  ;;  %3708 = vmatpush.msrb.mxu3 %v3139_v27  ;;  %v3134_v31 = vld [vmem:[#allocation11 + $0x7a0] sm:$0xff]  ;;  %v3117_v30 = vld [vmem:[#allocation11 + $0x718] sm:$0xff]  ;;  %v3100_v11 = vld [vmem:[#allocation11 + $0x690] sm:$0xff] }
 0x29a   :  { %3649 = vmatpush.msrb.mxu0 %v3090_v58  ;;  %3669 = vmatpush.msrb.mxu1 %v3106_v26  ;;  %v3133_v22 = vld [vmem:[#allocation11 + $0x798] sm:$0xff]  ;;  %v3116_v49 = vld [vmem:[#allocation11 + $0x710] sm:$0xff]  ;;  %v3083_v1 = vld [vmem:[#allocation11 + $0x608] sm:$0xff] }
 0x29b   :  { %3689 = vmatpush.msrb.mxu2 %v3122_v15  ;;  %3709 = vmatpush.msrb.mxu3 %v3138_v34  ;;  %v3132_v52 = vld [vmem:[#allocation11 + $0x790] sm:$0xff]  ;;  %v3099_v60 = vld [vmem:[#allocation11 + $0x688] sm:$0xff]  ;;  %v3082_v36 = vld [vmem:[#allocation11 + $0x600] sm:$0xff] }
 0x29c   :  { %3650 = vmatpush.msrb.mxu0 %v3089_v44  ;;  %3670 = vmatpush.msrb.mxu1 %v3105_v55  ;;  %v3115_v39 = vld [vmem:[#allocation11 + $0x708] sm:$0xff]  ;;  %v3098_v54 = vld [vmem:[#allocation11 + $0x680] sm:$0xff]  ;;  %v3161_v5 = vld [vmem:[#allocation11 + $0x878] sm:$0xff] }
 0x29d   :  { %3690 = vmatpush.msrb.mxu2 %v3121_v37  ;;  %3710 = vmatpush.msrb.mxu3 %v3137_v50  ;;  %v3131_v3 = vld [vmem:[#allocation11 + $0x788] sm:$0xff]  ;;  %v3114_v40 = vld [vmem:[#allocation11 + $0x700] sm:$0xff]  ;;  %v3177_v27 = vld [vmem:[#allocation11 + $0x8f8] sm:$0xff] }
 0x29e   :  { %3651 = vmatpush.msrb.mxu0 %v3088_v0  ;;  %3671 = vmatpush.msrb.mxu1 %v3104_v28  ;;  %v3130_v2 = vld [vmem:[#allocation11 + $0x780] sm:$0xff]  ;;  %v3193_v6 = vld [vmem:[#allocation11 + $0x978] sm:$0xff]  ;;  %v3160_v58 = vld [vmem:[#allocation11 + $0x870] sm:$0xff] }
 0x29f   :  { %3691 = vmatpush.msrb.mxu2 %v3120_v19  ;;  %3711 = vmatpush.msrb.mxu3 %v3136_v53  ;;  %v3209_v41 = vld [vmem:[#allocation11 + $0x9f8] sm:$0xff]  ;;  %v3176_v26 = vld [vmem:[#allocation11 + $0x8f0] sm:$0xff]  ;;  %v3159_v34 = vld [vmem:[#allocation11 + $0x868] sm:$0xff] }
 0x2a0   :  { %3652 = vmatpush.msrb.mxu0 %v3087_v4  ;;  %3672 = vmatpush.msrb.mxu1 %v3103_v16  ;;  %v3192_v13 = vld [vmem:[#allocation11 + $0x970] sm:$0xff]  ;;  %v3175_v18 = vld [vmem:[#allocation11 + $0x8e8] sm:$0xff]  ;;  %v3158_v48 = vld [vmem:[#allocation11 + $0x860] sm:$0xff] }
 0x2a1   :  { %3692 = vmatpush.msrb.mxu2 %v3119_v46  ;;  %3712 = vmatpush.msrb.mxu3 %v3135_v24  ;;  %v3208_v15 = vld [vmem:[#allocation11 + $0x9f0] sm:$0xff]  ;;  %v3206_v44 = vld [vmem:[#allocation11 + $0x9e0] sm:$0xff]  ;;  %v3157_v55 = vld [vmem:[#allocation11 + $0x858] sm:$0xff] }
 0x2a2   :  { %3653 = vmatpush.msrb.mxu0 %v3086_v7  ;;  %3673 = vmatpush.msrb.mxu1 %v3102_v35  ;;  %v3173_v42 = vld [vmem:[#allocation11 + $0x8d8] sm:$0xff]  ;;  %v3156_v10 = vld [vmem:[#allocation11 + $0x850] sm:$0xff]  ;;  %v3155_v53 = vld [vmem:[#allocation11 + $0x848] sm:$0xff] }
 0x2a3   :  { %3693 = vmatpush.msrb.mxu2 %v3118_v21  ;;  %3713 = vmatpush.msrb.mxu3 %v3134_v31  ;;  %v3189_v37 = vld [vmem:[#allocation11 + $0x958] sm:$0xff]  ;;  %v3172_v0 = vld [vmem:[#allocation11 + $0x8d0] sm:$0xff]  ;;  %v3171_v4 = vld [vmem:[#allocation11 + $0x8c8] sm:$0xff] }
 0x2a4   :  { %3654 = vmatpush.msrb.mxu0 %v3085_v29  ;;  %3674 = vmatpush.msrb.mxu1 %v3101_v43  ;;  %v3205_v50 = vld [vmem:[#allocation11 + $0x9d8] sm:$0xff]  ;;  %v3188_v28 = vld [vmem:[#allocation11 + $0x950] sm:$0xff]  ;;  %v3187_v16 = vld [vmem:[#allocation11 + $0x948] sm:$0xff] }
 0x2a5   :  { %3694 = vmatpush.msrb.mxu2 %v3117_v30  ;;  %3714 = vmatpush.msrb.mxu3 %v3133_v22  ;;  %v3204_v19 = vld [vmem:[#allocation11 + $0x9d0] sm:$0xff]  ;;  %v3203_v46 = vld [vmem:[#allocation11 + $0x9c8] sm:$0xff]  ;;  %v3154_v24 = vld [vmem:[#allocation11 + $0x840] sm:$0xff] }
 0x2a6   :  { %3655 = vmatpush.msrb.mxu0 %v3084_v23  ;;  %3675 = vmatpush.msrb.mxu1 %v3100_v11  ;;  %v3170_v7 = vld [vmem:[#allocation11 + $0x8c0] sm:$0xff]  ;;  %v3153_v31 = vld [vmem:[#allocation11 + $0x838] sm:$0xff]  ;;  %v3152_v22 = vld [vmem:[#allocation11 + $0x830] sm:$0xff] }
 0x2a7   :  { %3695 = vmatpush.msrb.mxu2 %v3116_v49  ;;  %3715 = vmatpush.msrb.mxu3 %v3132_v52  ;;  %v3186_v35 = vld [vmem:[#allocation11 + $0x940] sm:$0xff]  ;;  %v3169_v29 = vld [vmem:[#allocation11 + $0x8b8] sm:$0xff]  ;;  %v3168_v23 = vld [vmem:[#allocation11 + $0x8b0] sm:$0xff] }
 0x2a8   :  { %3656 = vmatpush.msrb.mxu0 %v3083_v1  ;;  %3676 = vmatpush.msrb.mxu1 %v3099_v60  ;;  %v3202_v21 = vld [vmem:[#allocation11 + $0x9c0] sm:$0xff]  ;;  %v3185_v43 = vld [vmem:[#allocation11 + $0x938] sm:$0xff]  ;;  %v3184_v11 = vld [vmem:[#allocation11 + $0x930] sm:$0xff] }
 0x2a9   :  { %3696 = vmatpush.msrb.mxu2 %v3115_v39  ;;  %3716 = vmatpush.msrb.mxu3 %v3131_v3  ;;  %v3201_v30 = vld [vmem:[#allocation11 + $0x9b8] sm:$0xff]  ;;  %v3200_v49 = vld [vmem:[#allocation11 + $0x9b0] sm:$0xff]  ;;  %v3151_v52 = vld [vmem:[#allocation11 + $0x828] sm:$0xff] }
 0x2aa   :  { %3657 = vmatpush.msrb.mxu0 %v3082_v36  ;;  %3677 = vmatpush.msrb.mxu1 %v3098_v54  ;;  %v3167_v1 = vld [vmem:[#allocation11 + $0x8a8] sm:$0xff]  ;;  %v3150_v3 = vld [vmem:[#allocation11 + $0x820] sm:$0xff] }
 0x2ab   :  { %3697 = vmatpush.msrb.mxu2 %v3114_v40  ;;  %3717 = vmatpush.msrb.mxu3 %v3130_v2  ;;  %v3183_v60 = vld [vmem:[#allocation11 + $0x928] sm:$0xff]  ;;  %v3166_v36 = vld [vmem:[#allocation11 + $0x8a0] sm:$0xff]  ;;  %v3149_v2 = vld [vmem:[#allocation11 + $0x818] sm:$0xff] }
 0x2ac   :  { %3658 = vmatmul.f32.vlgmr.msrb.gmra.mxu0 %v6628_v12  ;;  %3678 = vmatmul.f32.vlgmr.msrb.gmra.mxu1 %v6634_v25  ;;  %v3191_v12 = vld [vmem:[#allocation11 + $0x968] sm:$0xff]  ;;  %v3182_v54 = vld [vmem:[#allocation11 + $0x920] sm:$0xff] }
 0x2ad   :  { %3698 = vmatmul.f32.vlgmr.msrb.gmra.mxu2 %v6648_v56  ;;  %3718 = vmatmul.f32.vlgmr.msrb.gmra.mxu3 %v6652_v59  ;;  %v3207_v25 = vld [vmem:[#allocation11 + $0x9e8] sm:$0xff]  ;;  %v3174_v56 = vld [vmem:[#allocation11 + $0x8e0] sm:$0xff] }
 0x2ae   :  { %3722 = vmatpush.msra.mxu0 %v3161_v5  ;;  %3742 = vmatpush.msra.mxu1 %v3177_v27  ;;  %v3190_v59 = vld [vmem:[#allocation11 + $0x960] sm:$0xff]  ;;  %v3199_v39 = vld [vmem:[#allocation11 + $0x9a8] sm:$0xff]  ;;  %v3165_v5 = vld [vmem:[#allocation11 + $0x898] sm:$0xff] }
 0x2af   :  { %3762 = vmatpush.msra.mxu2 %v3193_v6  ;;  %3782 = vmatpush.msra.mxu3 %v3209_v41  ;;  %v3198_v40 = vld [vmem:[#allocation11 + $0x9a0] sm:$0xff]  ;;  %v3181_v27 = vld [vmem:[#allocation11 + $0x918] sm:$0xff]  ;;  %v3148_v41 = vld [vmem:[#allocation11 + $0x810] sm:$0xff] }
 0x2b0   :  { %3723 = vmatpush.msra.mxu0 %v3160_v58  ;;  %3743 = vmatpush.msra.mxu1 %v3176_v26  ;;  %v3197_v6 = vld [vmem:[#allocation11 + $0x998] sm:$0xff]  ;;  %v3164_v58 = vld [vmem:[#allocation11 + $0x890] sm:$0xff] }
 0x2b1   :  { %3763 = vmatpush.msra.mxu2 %v3192_v13  ;;  %3783 = vmatpush.msra.mxu3 %v3208_v15  ;;  %v3180_v26 = vld [vmem:[#allocation11 + $0x910] sm:$0xff]  ;;  %v3147_v15 = vld [vmem:[#allocation11 + $0x808] sm:$0xff] }
 0x2b2   :  { %3724 = vmatpush.msra.mxu0 %v3159_v34  ;;  %3744 = vmatpush.msra.mxu1 %v3175_v18  ;;  %v3196_v13 = vld [vmem:[#allocation11 + $0x990] sm:$0xff]  ;;  %v3163_v34 = vld [vmem:[#allocation11 + $0x888] sm:$0xff] }
 0x2b3   :  { %3764 = vmatpush.msra.mxu2 %v3191_v12  ;;  %3784 = vmatpush.msra.mxu3 %v3207_v25  ;;  %v3179_v18 = vld [vmem:[#allocation11 + $0x908] sm:$0xff]  ;;  %v3146_v25 = vld [vmem:[#allocation11 + $0x800] sm:$0xff] }
 0x2b4   :  { %3725 = vmatpush.msra.mxu0 %v3158_v48  ;;  %3745 = vmatpush.msra.mxu1 %v3174_v56  ;;  %v3195_v12 = vld [vmem:[#allocation11 + $0x988] sm:$0xff]  ;;  %v3162_v48 = vld [vmem:[#allocation11 + $0x880] sm:$0xff] }
 0x2b5   :  { %3765 = vmatpush.msra.mxu2 %v3190_v59  ;;  %3785 = vmatpush.msra.mxu3 %v3206_v44  ;;  %v3178_v56 = vld [vmem:[#allocation11 + $0x900] sm:$0xff]  ;;  %v3225_v44 = vld [vmem:[#allocation11 + $0xa78] sm:$0xff] }
 0x2b6   :  { %3726 = vmatpush.msra.mxu0 %v3157_v55  ;;  %3746 = vmatpush.msra.mxu1 %v3173_v42  ;;  %v3194_v59 = vld [vmem:[#allocation11 + $0x980] sm:$0xff]  ;;  %v3241_v55 = vld [vmem:[#allocation11 + $0xaf8] sm:$0xff] }
 0x2b7   :  { %3766 = vmatpush.msra.mxu2 %v3189_v37  ;;  %3786 = vmatpush.msra.mxu3 %v3205_v50  ;;  %v3257_v42 = vld [vmem:[#allocation11 + $0xb78] sm:$0xff]  ;;  %v3224_v50 = vld [vmem:[#allocation11 + $0xa70] sm:$0xff] }
 0x2b8   :  { %3727 = vmatpush.msra.mxu0 %v3156_v10  ;;  %3747 = vmatpush.msra.mxu1 %v3172_v0  ;;  %v3273_v37 = vld [vmem:[#allocation11 + $0xbf8] sm:$0xff]  ;;  %v3240_v10 = vld [vmem:[#allocation11 + $0xaf0] sm:$0xff] }
 0x2b9   :  { %3767 = vmatpush.msra.mxu2 %v3188_v28  ;;  %3787 = vmatpush.msra.mxu3 %v3204_v19  ;;  %v3256_v0 = vld [vmem:[#allocation11 + $0xb70] sm:$0xff]  ;;  %v3223_v19 = vld [vmem:[#allocation11 + $0xa68] sm:$0xff] }
 0x2ba   :  { %3728 = vmatpush.msra.mxu0 %v3155_v53  ;;  %3748 = vmatpush.msra.mxu1 %v3171_v4  ;;  %v3272_v28 = vld [vmem:[#allocation11 + $0xbf0] sm:$0xff]  ;;  %v3239_v53 = vld [vmem:[#allocation11 + $0xae8] sm:$0xff]  ;;  %v3222_v4 = vld [vmem:[#allocation11 + $0xa60] sm:$0xff] }
 0x2bb   :  { %3768 = vmatpush.msra.mxu2 %v3187_v16  ;;  %3788 = vmatpush.msra.mxu3 %v3203_v46  ;;  %v3270_v16 = vld [vmem:[#allocation11 + $0xbe0] sm:$0xff]  ;;  %v3221_v46 = vld [vmem:[#allocation11 + $0xa58] sm:$0xff] }
 0x2bc   :  { %3729 = vmatpush.msra.mxu0 %v3154_v24  ;;  %3749 = vmatpush.msra.mxu1 %v3170_v7  ;;  %v3237_v24 = vld [vmem:[#allocation11 + $0xad8] sm:$0xff] }
 0x2bd   :  { %3769 = vmatpush.msra.mxu2 %v3186_v35  ;;  %3789 = vmatpush.msra.mxu3 %v3202_v21  ;;  %v3253_v7 = vld [vmem:[#allocation11 + $0xb58] sm:$0xff]  ;;  %v3220_v21 = vld [vmem:[#allocation11 + $0xa50] sm:$0xff] }
 0x2be   :  { %3730 = vmatpush.msra.mxu0 %v3153_v31  ;;  %3750 = vmatpush.msra.mxu1 %v3169_v29  ;;  %v3269_v35 = vld [vmem:[#allocation11 + $0xbd8] sm:$0xff]  ;;  %v3236_v31 = vld [vmem:[#allocation11 + $0xad0] sm:$0xff] }
 0x2bf   :  { %3770 = vmatpush.msra.mxu2 %v3185_v43  ;;  %3790 = vmatpush.msra.mxu3 %v3201_v30  ;;  %v3252_v29 = vld [vmem:[#allocation11 + $0xb50] sm:$0xff]  ;;  %v3219_v30 = vld [vmem:[#allocation11 + $0xa48] sm:$0xff] }
 0x2c0   :  { %3731 = vmatpush.msra.mxu0 %v3152_v22  ;;  %3751 = vmatpush.msra.mxu1 %v3168_v23  ;;  %v3268_v43 = vld [vmem:[#allocation11 + $0xbd0] sm:$0xff]  ;;  %v3235_v22 = vld [vmem:[#allocation11 + $0xac8] sm:$0xff] }
 0x2c1   :  { %3771 = vmatpush.msra.mxu2 %v3184_v11  ;;  %3791 = vmatpush.msra.mxu3 %v3200_v49  ;;  %v3251_v23 = vld [vmem:[#allocation11 + $0xb48] sm:$0xff]  ;;  %v3218_v49 = vld [vmem:[#allocation11 + $0xa40] sm:$0xff] }
 0x2c2   :  { %3732 = vmatpush.msra.mxu0 %v3151_v52  ;;  %3752 = vmatpush.msra.mxu1 %v3167_v1  ;;  %v3267_v11 = vld [vmem:[#allocation11 + $0xbc8] sm:$0xff]  ;;  %v3234_v52 = vld [vmem:[#allocation11 + $0xac0] sm:$0xff] }
 0x2c3   :  { %3772 = vmatpush.msra.mxu2 %v3183_v60  ;;  %3792 = vmatpush.msra.mxu3 %v3199_v39  ;;  %v3250_v1 = vld [vmem:[#allocation11 + $0xb40] sm:$0xff]  ;;  %v3217_v39 = vld [vmem:[#allocation11 + $0xa38] sm:$0xff] }
 0x2c4   :  { %3733 = vmatpush.msra.mxu0 %v3150_v3  ;;  %3753 = vmatpush.msra.mxu1 %v3166_v36  ;;  %v3266_v60 = vld [vmem:[#allocation11 + $0xbc0] sm:$0xff]  ;;  %v3233_v3 = vld [vmem:[#allocation11 + $0xab8] sm:$0xff] }
 0x2c5   :  { %3773 = vmatpush.msra.mxu2 %v3182_v54  ;;  %3793 = vmatpush.msra.mxu3 %v3198_v40  ;;  %v3249_v36 = vld [vmem:[#allocation11 + $0xb38] sm:$0xff]  ;;  %v3216_v40 = vld [vmem:[#allocation11 + $0xa30] sm:$0xff] }
 0x2c6   :  { %3734 = vmatpush.msra.mxu0 %v3149_v2  ;;  %3754 = vmatpush.msra.mxu1 %v3165_v5  ;;  %v3265_v54 = vld [vmem:[#allocation11 + $0xbb8] sm:$0xff]  ;;  %v3232_v2 = vld [vmem:[#allocation11 + $0xab0] sm:$0xff] }
 0x2c7   :  { %3774 = vmatpush.msra.mxu2 %v3181_v27  ;;  %3794 = vmatpush.msra.mxu3 %v3197_v6  ;;  %v3248_v5 = vld [vmem:[#allocation11 + $0xb30] sm:$0xff]  ;;  %v3215_v6 = vld [vmem:[#allocation11 + $0xa28] sm:$0xff] }
 0x2c8   :  { %3735 = vmatpush.msra.mxu0 %v3148_v41  ;;  %3755 = vmatpush.msra.mxu1 %v3164_v58  ;;  %v3264_v27 = vld [vmem:[#allocation11 + $0xbb0] sm:$0xff]  ;;  %v3231_v41 = vld [vmem:[#allocation11 + $0xaa8] sm:$0xff] }
 0x2c9   :  { %3775 = vmatpush.msra.mxu2 %v3180_v26  ;;  %3795 = vmatpush.msra.mxu3 %v3196_v13  ;;  %v3247_v58 = vld [vmem:[#allocation11 + $0xb28] sm:$0xff]  ;;  %v3214_v13 = vld [vmem:[#allocation11 + $0xa20] sm:$0xff] }
 0x2ca   :  { %3736 = vmatpush.msra.mxu0 %v3147_v15  ;;  %3756 = vmatpush.msra.mxu1 %v3163_v34  ;;  %v3263_v26 = vld [vmem:[#allocation11 + $0xba8] sm:$0xff]  ;;  %v3230_v15 = vld [vmem:[#allocation11 + $0xaa0] sm:$0xff] }
 0x2cb   :  { %3776 = vmatpush.msra.mxu2 %v3179_v18  ;;  %3796 = vmatpush.msra.mxu3 %v3195_v12  ;;  %v3246_v34 = vld [vmem:[#allocation11 + $0xb20] sm:$0xff]  ;;  %v3213_v12 = vld [vmem:[#allocation11 + $0xa18] sm:$0xff] }
 0x2cc   :  { %3737 = vmatpush.msra.mxu0 %v3146_v25  ;;  %3757 = vmatpush.msra.mxu1 %v3162_v48  ;;  %v3262_v18 = vld [vmem:[#allocation11 + $0xba0] sm:$0xff]  ;;  %v3229_v25 = vld [vmem:[#allocation11 + $0xa98] sm:$0xff] }
 0x2cd   :  { %3777 = vmatpush.msra.mxu2 %v3178_v56  ;;  %3797 = vmatpush.msra.mxu3 %v3194_v59  ;;  %v3245_v48 = vld [vmem:[#allocation11 + $0xb18] sm:$0xff]  ;;  %v3212_v59 = vld [vmem:[#allocation11 + $0xa10] sm:$0xff] }
 0x2ce   :  { %3738 = vmatmul.f32.vlgmr.msra.gmra.mxu0 %v6655_v33  ;;  %3758 = vmatmul.f32.vlgmr.msra.gmra.mxu1 %v6665_v63  ;;  %v3255_v33 = vld [vmem:[#allocation11 + $0xb68] sm:$0xff]  ;;  %v3261_v56 = vld [vmem:[#allocation11 + $0xb98] sm:$0xff] }
 0x2cf   :  { %3778 = vmatmul.f32.vlgmr.msra.gmra.mxu2 %v6668_v47  ;;  %3798 = vmatmul.f32.vlgmr.msra.gmra.mxu3 %v6678_v57  ;;  %v3271_v63 = vld [vmem:[#allocation11 + $0xbe8] sm:$0xff]  ;;  %v3238_v47 = vld [vmem:[#allocation11 + $0xae0] sm:$0xff] }
 0x2d0   :  { %3802 = vmatpush.msrb.mxu0 %v3225_v44  ;;  %3822 = vmatpush.msrb.mxu1 %v3241_v55  ;;  %v3254_v57 = vld [vmem:[#allocation11 + $0xb60] sm:$0xff]  ;;  %v3228_v44 = vld [vmem:[#allocation11 + $0xa90] sm:$0xff] }
 0x2d1   :  { %3842 = vmatpush.msrb.mxu2 %v3257_v42  ;;  %3862 = vmatpush.msrb.mxu3 %v3273_v37  ;;  %v3244_v55 = vld [vmem:[#allocation11 + $0xb10] sm:$0xff]  ;;  %v3211_v37 = vld [vmem:[#allocation11 + $0xa08] sm:$0xff] }
 0x2d2   :  { %3803 = vmatpush.msrb.mxu0 %v3224_v50  ;;  %3823 = vmatpush.msrb.mxu1 %v3240_v10  ;;  %v3260_v42 = vld [vmem:[#allocation11 + $0xb90] sm:$0xff]  ;;  %v3227_v50 = vld [vmem:[#allocation11 + $0xa88] sm:$0xff] }
 0x2d3   :  { %3843 = vmatpush.msrb.mxu2 %v3256_v0  ;;  %3863 = vmatpush.msrb.mxu3 %v3272_v28  ;;  %v3243_v10 = vld [vmem:[#allocation11 + $0xb08] sm:$0xff]  ;;  %v3210_v28 = vld [vmem:[#allocation11 + $0xa00] sm:$0xff] }
 0x2d4   :  { %3804 = vmatpush.msrb.mxu0 %v3223_v19  ;;  %3824 = vmatpush.msrb.mxu1 %v3239_v53  ;;  %v3259_v0 = vld [vmem:[#allocation11 + $0xb88] sm:$0xff]  ;;  %v3226_v19 = vld [vmem:[#allocation11 + $0xa80] sm:$0xff] }
 0x2d5   :  { %3844 = vmatpush.msrb.mxu2 %v3255_v33  ;;  %3864 = vmatpush.msrb.mxu3 %v3271_v63  ;;  %v3242_v53 = vld [vmem:[#allocation11 + $0xb00] sm:$0xff]  ;;  %v3289_v63 = vld [vmem:[#allocation11 + $0xc78] sm:$0xff] }
 0x2d6   :  { %3805 = vmatpush.msrb.mxu0 %v3222_v4  ;;  %3825 = vmatpush.msrb.mxu1 %v3238_v47  ;;  %v3258_v33 = vld [vmem:[#allocation11 + $0xb80] sm:$0xff]  ;;  %v3305_v4 = vld [vmem:[#allocation11 + $0xcf8] sm:$0xff] }
 0x2d7   :  { %3845 = vmatpush.msrb.mxu2 %v3254_v57  ;;  %3865 = vmatpush.msrb.mxu3 %v3270_v16  ;;  %v3321_v47 = vld [vmem:[#allocation11 + $0xd78] sm:$0xff]  ;;  %v3288_v16 = vld [vmem:[#allocation11 + $0xc70] sm:$0xff] }
 0x2d8   :  { %3806 = vmatpush.msrb.mxu0 %v3221_v46  ;;  %3826 = vmatpush.msrb.mxu1 %v3237_v24  ;;  %v3337_v57 = vld [vmem:[#allocation11 + $0xdf8] sm:$0xff]  ;;  %v3304_v46 = vld [vmem:[#allocation11 + $0xcf0] sm:$0xff] }
 0x2d9   :  { %3846 = vmatpush.msrb.mxu2 %v3253_v7  ;;  %3866 = vmatpush.msrb.mxu3 %v3269_v35  ;;  %v3320_v24 = vld [vmem:[#allocation11 + $0xd70] sm:$0xff]  ;;  %v3287_v35 = vld [vmem:[#allocation11 + $0xc68] sm:$0xff] }
 0x2da   :  { %3807 = vmatpush.msrb.mxu0 %v3220_v21  ;;  %3827 = vmatpush.msrb.mxu1 %v3236_v31  ;;  %v3336_v7 = vld [vmem:[#allocation11 + $0xdf0] sm:$0xff]  ;;  %v3303_v21 = vld [vmem:[#allocation11 + $0xce8] sm:$0xff]  ;;  %v3286_v31 = vld [vmem:[#allocation11 + $0xc60] sm:$0xff] }
 0x2db   :  { %3847 = vmatpush.msrb.mxu2 %v3252_v29  ;;  %3867 = vmatpush.msrb.mxu3 %v3268_v43  ;;  %v3334_v29 = vld [vmem:[#allocation11 + $0xde0] sm:$0xff]  ;;  %v3285_v43 = vld [vmem:[#allocation11 + $0xc58] sm:$0xff] }
 0x2dc   :  { %3808 = vmatpush.msrb.mxu0 %v3219_v30  ;;  %3828 = vmatpush.msrb.mxu1 %v3235_v22  ;;  %v3301_v30 = vld [vmem:[#allocation11 + $0xcd8] sm:$0xff] }
 0x2dd   :  { %3848 = vmatpush.msrb.mxu2 %v3251_v23  ;;  %3868 = vmatpush.msrb.mxu3 %v3267_v11  ;;  %v3317_v22 = vld [vmem:[#allocation11 + $0xd58] sm:$0xff]  ;;  %v3284_v11 = vld [vmem:[#allocation11 + $0xc50] sm:$0xff] }
 0x2de   :  { %3809 = vmatpush.msrb.mxu0 %v3218_v49  ;;  %3829 = vmatpush.msrb.mxu1 %v3234_v52  ;;  %v3333_v23 = vld [vmem:[#allocation11 + $0xdd8] sm:$0xff]  ;;  %v3300_v49 = vld [vmem:[#allocation11 + $0xcd0] sm:$0xff] }
 0x2df   :  { %3849 = vmatpush.msrb.mxu2 %v3250_v1  ;;  %3869 = vmatpush.msrb.mxu3 %v3266_v60  ;;  %v3316_v52 = vld [vmem:[#allocation11 + $0xd50] sm:$0xff]  ;;  %v3283_v60 = vld [vmem:[#allocation11 + $0xc48] sm:$0xff] }
 0x2e0   :  { %3810 = vmatpush.msrb.mxu0 %v3217_v39  ;;  %3830 = vmatpush.msrb.mxu1 %v3233_v3  ;;  %v3332_v1 = vld [vmem:[#allocation11 + $0xdd0] sm:$0xff]  ;;  %v3299_v39 = vld [vmem:[#allocation11 + $0xcc8] sm:$0xff] }
 0x2e1   :  { %3850 = vmatpush.msrb.mxu2 %v3249_v36  ;;  %3870 = vmatpush.msrb.mxu3 %v3265_v54  ;;  %v3315_v3 = vld [vmem:[#allocation11 + $0xd48] sm:$0xff]  ;;  %v3282_v54 = vld [vmem:[#allocation11 + $0xc40] sm:$0xff] }
 0x2e2   :  { %3811 = vmatpush.msrb.mxu0 %v3216_v40  ;;  %3831 = vmatpush.msrb.mxu1 %v3232_v2  ;;  %v3331_v36 = vld [vmem:[#allocation11 + $0xdc8] sm:$0xff]  ;;  %v3298_v40 = vld [vmem:[#allocation11 + $0xcc0] sm:$0xff] }
 0x2e3   :  { %3851 = vmatpush.msrb.mxu2 %v3248_v5  ;;  %3871 = vmatpush.msrb.mxu3 %v3264_v27  ;;  %v3314_v2 = vld [vmem:[#allocation11 + $0xd40] sm:$0xff]  ;;  %v3281_v27 = vld [vmem:[#allocation11 + $0xc38] sm:$0xff] }
 0x2e4   :  { %3812 = vmatpush.msrb.mxu0 %v3215_v6  ;;  %3832 = vmatpush.msrb.mxu1 %v3231_v41  ;;  %v3330_v5 = vld [vmem:[#allocation11 + $0xdc0] sm:$0xff]  ;;  %v3297_v6 = vld [vmem:[#allocation11 + $0xcb8] sm:$0xff] }
 0x2e5   :  { %3852 = vmatpush.msrb.mxu2 %v3247_v58  ;;  %3872 = vmatpush.msrb.mxu3 %v3263_v26  ;;  %v3313_v41 = vld [vmem:[#allocation11 + $0xd38] sm:$0xff]  ;;  %v3280_v26 = vld [vmem:[#allocation11 + $0xc30] sm:$0xff] }
 0x2e6   :  { %3813 = vmatpush.msrb.mxu0 %v3214_v13  ;;  %3833 = vmatpush.msrb.mxu1 %v3230_v15  ;;  %v3329_v58 = vld [vmem:[#allocation11 + $0xdb8] sm:$0xff]  ;;  %v3296_v13 = vld [vmem:[#allocation11 + $0xcb0] sm:$0xff] }
 0x2e7   :  { %3853 = vmatpush.msrb.mxu2 %v3246_v34  ;;  %3873 = vmatpush.msrb.mxu3 %v3262_v18  ;;  %v3312_v15 = vld [vmem:[#allocation11 + $0xd30] sm:$0xff]  ;;  %v3279_v18 = vld [vmem:[#allocation11 + $0xc28] sm:$0xff] }
 0x2e8   :  { %3814 = vmatpush.msrb.mxu0 %v3213_v12  ;;  %3834 = vmatpush.msrb.mxu1 %v3229_v25  ;;  %v3328_v34 = vld [vmem:[#allocation11 + $0xdb0] sm:$0xff]  ;;  %v3295_v12 = vld [vmem:[#allocation11 + $0xca8] sm:$0xff] }
 0x2e9   :  { %3854 = vmatpush.msrb.mxu2 %v3245_v48  ;;  %3874 = vmatpush.msrb.mxu3 %v3261_v56  ;;  %v3311_v25 = vld [vmem:[#allocation11 + $0xd28] sm:$0xff]  ;;  %v3278_v56 = vld [vmem:[#allocation11 + $0xc20] sm:$0xff] }
 0x2ea   :  { %3815 = vmatpush.msrb.mxu0 %v3212_v59  ;;  %3835 = vmatpush.msrb.mxu1 %v3228_v44  ;;  %v3327_v48 = vld [vmem:[#allocation11 + $0xda8] sm:$0xff]  ;;  %v3294_v59 = vld [vmem:[#allocation11 + $0xca0] sm:$0xff] }
 0x2eb   :  { %3855 = vmatpush.msrb.mxu2 %v3244_v55  ;;  %3875 = vmatpush.msrb.mxu3 %v3260_v42  ;;  %v3310_v44 = vld [vmem:[#allocation11 + $0xd20] sm:$0xff]  ;;  %v3277_v42 = vld [vmem:[#allocation11 + $0xc18] sm:$0xff] }
 0x2ec   :  { %3816 = vmatpush.msrb.mxu0 %v3211_v37  ;;  %3836 = vmatpush.msrb.mxu1 %v3227_v50  ;;  %v3326_v55 = vld [vmem:[#allocation11 + $0xda0] sm:$0xff]  ;;  %v3293_v37 = vld [vmem:[#allocation11 + $0xc98] sm:$0xff] }
 0x2ed   :  { %3856 = vmatpush.msrb.mxu2 %v3243_v10  ;;  %3876 = vmatpush.msrb.mxu3 %v3259_v0  ;;  %v3309_v50 = vld [vmem:[#allocation11 + $0xd18] sm:$0xff]  ;;  %v3276_v0 = vld [vmem:[#allocation11 + $0xc10] sm:$0xff] }
 0x2ee   :  { %3817 = vmatpush.msrb.mxu0 %v3210_v28  ;;  %3837 = vmatpush.msrb.mxu1 %v3226_v19  ;;  %v3325_v10 = vld [vmem:[#allocation11 + $0xd98] sm:$0xff]  ;;  %v3292_v28 = vld [vmem:[#allocation11 + $0xc90] sm:$0xff] }
 0x2ef   :  { %3857 = vmatpush.msrb.mxu2 %v3242_v53  ;;  %3877 = vmatpush.msrb.mxu3 %v3258_v33  ;;  %v3308_v19 = vld [vmem:[#allocation11 + $0xd10] sm:$0xff]  ;;  %v3275_v33 = vld [vmem:[#allocation11 + $0xc08] sm:$0xff] }
 0x2f0   :  { %3818 = vmatmul.f32.vlgmr.msrb.gmra.mxu0 %v6685_v51  ;;  %3838 = vmatmul.f32.vlgmr.msrb.gmra.mxu1 %v6693_v32  ;;  %v3319_v51 = vld [vmem:[#allocation11 + $0xd68] sm:$0xff]  ;;  %v3324_v53 = vld [vmem:[#allocation11 + $0xd90] sm:$0xff] }
 0x2f1   :  { %3858 = vmatmul.f32.vlgmr.msrb.gmra.mxu2 %v6696_v8  ;;  %3878 = vmatmul.f32.vlgmr.msrb.gmra.mxu3 %v6703_v9  ;;  %v3335_v32 = vld [vmem:[#allocation11 + $0xde8] sm:$0xff]  ;;  %v3302_v8 = vld [vmem:[#allocation11 + $0xce0] sm:$0xff] }
 0x2f2   :  { %3882 = vmatpush.msra.mxu0 %v3289_v63  ;;  %3902 = vmatpush.msra.mxu1 %v3305_v4  ;;  %v3318_v9 = vld [vmem:[#allocation11 + $0xd60] sm:$0xff]  ;;  %v3291_v63 = vld [vmem:[#allocation11 + $0xc88] sm:$0xff] }
 0x2f3   :  { %3922 = vmatpush.msra.mxu2 %v3321_v47  ;;  %3942 = vmatpush.msra.mxu3 %v3337_v57  ;;  %v3307_v4 = vld [vmem:[#allocation11 + $0xd08] sm:$0xff]  ;;  %v3274_v57 = vld [vmem:[#allocation11 + $0xc00] sm:$0xff] }
 0x2f4   :  { %3883 = vmatpush.msra.mxu0 %v3288_v16  ;;  %3903 = vmatpush.msra.mxu1 %v3304_v46  ;;  %v3323_v47 = vld [vmem:[#allocation11 + $0xd88] sm:$0xff]  ;;  %v3290_v16 = vld [vmem:[#allocation11 + $0xc80] sm:$0xff] }
 0x2f5   :  { %3923 = vmatpush.msra.mxu2 %v3320_v24  ;;  %3943 = vmatpush.msra.mxu3 %v3336_v7  ;;  %v3306_v46 = vld [vmem:[#allocation11 + $0xd00] sm:$0xff]  ;;  %v3353_v7 = vld [vmem:[#allocation11 + $0xe78] sm:$0xff] }
 0x2f6   :  { %3884 = vmatpush.msra.mxu0 %v3287_v35  ;;  %3904 = vmatpush.msra.mxu1 %v3303_v21  ;;  %v3322_v24 = vld [vmem:[#allocation11 + $0xd80] sm:$0xff]  ;;  %v3369_v35 = vld [vmem:[#allocation11 + $0xef8] sm:$0xff] }
 0x2f7   :  { %3924 = vmatpush.msra.mxu2 %v3319_v51  ;;  %3944 = vmatpush.msra.mxu3 %v3335_v32  ;;  %v7044_v21 = vld [vmem:[#allocation22_spill] sm:$0xff]  ;;  %v3385_v51 = vld [vmem:[#allocation11 + $0xf78] sm:$0xff] }
 0x2f8   :  { %3885 = vmatpush.msra.mxu0 %v3286_v31  ;;  %3905 = vmatpush.msra.mxu1 %v3302_v8  ;;  %v3401_v32 = vld [vmem:[#allocation11 + $0xff8] sm:$0xff]  ;;  %v3352_v31 = vld [vmem:[#allocation11 + $0xe70] sm:$0xff] }
 0x2f9   :  { %3925 = vmatpush.msra.mxu2 %v3318_v9  ;;  %3945 = vmatpush.msra.mxu3 %v3334_v29  ;;  %v3368_v8 = vld [vmem:[#allocation11 + $0xef0] sm:$0xff] }
 0x2fa   :  { %3886 = vmatpush.msra.mxu0 %v3285_v43  ;;  %3906 = vmatpush.msra.mxu1 %v3301_v30  ;;  %v3384_v9 = vld [vmem:[#allocation11 + $0xf70] sm:$0xff]  ;;  %v3351_v43 = vld [vmem:[#allocation11 + $0xe68] sm:$0xff] }
 0x2fb   :  { %3926 = vmatpush.msra.mxu2 %v3317_v22  ;;  %3946 = vmatpush.msra.mxu3 %v3333_v23  ;;  %v3400_v29 = vld [vmem:[#allocation11 + $0xff0] sm:$0xff]  ;;  %v3367_v30 = vld [vmem:[#allocation11 + $0xee8] sm:$0xff]  ;;  %v3350_v23 = vld [vmem:[#allocation11 + $0xe60] sm:$0xff] }
 0x2fc   :  { %3887 = vmatpush.msra.mxu0 %v3284_v11  ;;  %3907 = vmatpush.msra.mxu1 %v3300_v49  ;;  %v3383_v22 = vld [vmem:[#allocation11 + $0xf68] sm:$0xff]  ;;  %v3398_v11 = vld [vmem:[#allocation11 + $0xfe0] sm:$0xff]  ;;  %v3349_v49 = vld [vmem:[#allocation11 + $0xe58] sm:$0xff] }
 0x2fd   :  { %3927 = vmatpush.msra.mxu2 %v3316_v52  ;;  %3947 = vmatpush.msra.mxu3 %v3332_v1  ;;  %v3365_v52 = vld [vmem:[#allocation11 + $0xed8] sm:$0xff] }
 0x2fe   :  { %3888 = vmatpush.msra.mxu0 %v3283_v60  ;;  %3908 = vmatpush.msra.mxu1 %v3299_v39  ;;  %v3381_v1 = vld [vmem:[#allocation11 + $0xf58] sm:$0xff]  ;;  %v3348_v39 = vld [vmem:[#allocation11 + $0xe50] sm:$0xff] }
 0x2ff   :  { %3928 = vmatpush.msra.mxu2 %v3315_v3  ;;  %3948 = vmatpush.msra.mxu3 %v3331_v36  ;;  %v3397_v60 = vld [vmem:[#allocation11 + $0xfd8] sm:$0xff]  ;;  %v3364_v3 = vld [vmem:[#allocation11 + $0xed0] sm:$0xff] }
 0x300   :  { %3889 = vmatpush.msra.mxu0 %v3282_v54  ;;  %3909 = vmatpush.msra.mxu1 %v3298_v40  ;;  %v3380_v36 = vld [vmem:[#allocation11 + $0xf50] sm:$0xff]  ;;  %v3347_v40 = vld [vmem:[#allocation11 + $0xe48] sm:$0xff] }
 0x301   :  { %3929 = vmatpush.msra.mxu2 %v3314_v2  ;;  %3949 = vmatpush.msra.mxu3 %v3330_v5  ;;  %v3396_v54 = vld [vmem:[#allocation11 + $0xfd0] sm:$0xff]  ;;  %v3363_v2 = vld [vmem:[#allocation11 + $0xec8] sm:$0xff] }
 0x302   :  { %3890 = vmatpush.msra.mxu0 %v3281_v27  ;;  %3910 = vmatpush.msra.mxu1 %v3297_v6  ;;  %v3379_v5 = vld [vmem:[#allocation11 + $0xf48] sm:$0xff]  ;;  %v3346_v6 = vld [vmem:[#allocation11 + $0xe40] sm:$0xff] }
 0x303   :  { %3930 = vmatpush.msra.mxu2 %v3313_v41  ;;  %3950 = vmatpush.msra.mxu3 %v3329_v58  ;;  %v3395_v27 = vld [vmem:[#allocation11 + $0xfc8] sm:$0xff]  ;;  %v3362_v41 = vld [vmem:[#allocation11 + $0xec0] sm:$0xff] }
 0x304   :  { %3891 = vmatpush.msra.mxu0 %v3280_v26  ;;  %3911 = vmatpush.msra.mxu1 %v3296_v13  ;;  %v3378_v58 = vld [vmem:[#allocation11 + $0xf40] sm:$0xff]  ;;  %v3345_v13 = vld [vmem:[#allocation11 + $0xe38] sm:$0xff] }
 0x305   :  { %3931 = vmatpush.msra.mxu2 %v3312_v15  ;;  %3951 = vmatpush.msra.mxu3 %v3328_v34  ;;  %v3394_v26 = vld [vmem:[#allocation11 + $0xfc0] sm:$0xff]  ;;  %v3361_v15 = vld [vmem:[#allocation11 + $0xeb8] sm:$0xff] }
 0x306   :  { %3892 = vmatpush.msra.mxu0 %v3279_v18  ;;  %3912 = vmatpush.msra.mxu1 %v3295_v12  ;;  %v3377_v34 = vld [vmem:[#allocation11 + $0xf38] sm:$0xff]  ;;  %v3344_v12 = vld [vmem:[#allocation11 + $0xe30] sm:$0xff] }
 0x307   :  { %3932 = vmatpush.msra.mxu2 %v3311_v25  ;;  %3952 = vmatpush.msra.mxu3 %v3327_v48  ;;  %v3393_v18 = vld [vmem:[#allocation11 + $0xfb8] sm:$0xff]  ;;  %v3360_v25 = vld [vmem:[#allocation11 + $0xeb0] sm:$0xff] }
 0x308   :  { %3893 = vmatpush.msra.mxu0 %v3278_v56  ;;  %3913 = vmatpush.msra.mxu1 %v3294_v59  ;;  %v3376_v48 = vld [vmem:[#allocation11 + $0xf30] sm:$0xff]  ;;  %v3343_v59 = vld [vmem:[#allocation11 + $0xe28] sm:$0xff] }
 0x309   :  { %3933 = vmatpush.msra.mxu2 %v3310_v44  ;;  %3953 = vmatpush.msra.mxu3 %v3326_v55  ;;  %v3392_v56 = vld [vmem:[#allocation11 + $0xfb0] sm:$0xff]  ;;  %v3359_v44 = vld [vmem:[#allocation11 + $0xea8] sm:$0xff] }
 0x30a   :  { %3894 = vmatpush.msra.mxu0 %v3277_v42  ;;  %3914 = vmatpush.msra.mxu1 %v3293_v37  ;;  %v3375_v55 = vld [vmem:[#allocation11 + $0xf28] sm:$0xff]  ;;  %v3342_v37 = vld [vmem:[#allocation11 + $0xe20] sm:$0xff] }
 0x30b   :  { %3934 = vmatpush.msra.mxu2 %v3309_v50  ;;  %3954 = vmatpush.msra.mxu3 %v3325_v10  ;;  %v3391_v42 = vld [vmem:[#allocation11 + $0xfa8] sm:$0xff]  ;;  %v3358_v50 = vld [vmem:[#allocation11 + $0xea0] sm:$0xff] }
 0x30c   :  { %3895 = vmatpush.msra.mxu0 %v3276_v0  ;;  %3915 = vmatpush.msra.mxu1 %v3292_v28  ;;  %v3374_v10 = vld [vmem:[#allocation11 + $0xf20] sm:$0xff]  ;;  %v3341_v28 = vld [vmem:[#allocation11 + $0xe18] sm:$0xff] }
 0x30d   :  { %3935 = vmatpush.msra.mxu2 %v3308_v19  ;;  %3955 = vmatpush.msra.mxu3 %v3324_v53  ;;  %v3390_v0 = vld [vmem:[#allocation11 + $0xfa0] sm:$0xff]  ;;  %v3357_v19 = vld [vmem:[#allocation11 + $0xe98] sm:$0xff] }
 0x30e   :  { %3896 = vmatpush.msra.mxu0 %v3275_v33  ;;  %3916 = vmatpush.msra.mxu1 %v3291_v63  ;;  %v3373_v53 = vld [vmem:[#allocation11 + $0xf18] sm:$0xff]  ;;  %v3340_v63 = vld [vmem:[#allocation11 + $0xe10] sm:$0xff] }
 0x30f   :  { %3936 = vmatpush.msra.mxu2 %v3307_v4  ;;  %3956 = vmatpush.msra.mxu3 %v3323_v47  ;;  %v3389_v33 = vld [vmem:[#allocation11 + $0xf98] sm:$0xff]  ;;  %v3356_v4 = vld [vmem:[#allocation11 + $0xe90] sm:$0xff] }
 0x310   :  { %3897 = vmatpush.msra.mxu0 %v3274_v57  ;;  %3917 = vmatpush.msra.mxu1 %v3290_v16  ;;  %v3372_v47 = vld [vmem:[#allocation11 + $0xf10] sm:$0xff]  ;;  %v3339_v16 = vld [vmem:[#allocation11 + $0xe08] sm:$0xff] }
 0x311   :  { %3937 = vmatpush.msra.mxu2 %v3306_v46  ;;  %3957 = vmatpush.msra.mxu3 %v3322_v24  ;;  %v3388_v57 = vld [vmem:[#allocation11 + $0xf90] sm:$0xff]  ;;  %v3355_v46 = vld [vmem:[#allocation11 + $0xe88] sm:$0xff] }
 0x312   :  { %3898 = vmatmul.f32.vlgmr.msra.gmra.mxu0 %v7044_v21  ;;  %3918 = vmatmul.f32.vlgmr.msra.gmra.mxu1 %v6794_v45  ;;  %v3399_v45 = vld [vmem:[#allocation11 + $0xfe8] sm:$0xff]  ;;  %v3354_v21 = vld [vmem:[#allocation11 + $0xe80] sm:$0xff] }
 0x313   :  { %3938 = vmatmul.f32.vlgmr.msra.gmra.mxu2 %v6825_v20  ;;  %3958 = vmatmul.f32.vlgmr.msra.gmra.mxu3 %v6828_v61  ;;  %v3366_v20 = vld [vmem:[#allocation11 + $0xee0] sm:$0xff]  ;;  %v3371_v24 = vld [vmem:[#allocation11 + $0xf08] sm:$0xff] }
 0x314   :  { %3962 = vmatpush.msrb.mxu0 %v3353_v7  ;;  %3982 = vmatpush.msrb.mxu1 %v3369_v35  ;;  %v3382_v61 = vld [vmem:[#allocation11 + $0xf60] sm:$0xff]  ;;  %v3387_v7 = vld [vmem:[#allocation11 + $0xf88] sm:$0xff] }
 0x315   :  { %4002 = vmatpush.msrb.mxu2 %v3385_v51  ;;  %4022 = vmatpush.msrb.mxu3 %v3401_v32  ;;  %v3338_v35 = vld [vmem:[#allocation11 + $0xe00] sm:$0xff] }
 0x316   :  { %3963 = vmatpush.msrb.mxu0 %v3352_v31  ;;  %3983 = vmatpush.msrb.mxu1 %v3368_v8  ;;  %v3370_v51 = vld [vmem:[#allocation11 + $0xf00] sm:$0xff]  ;;  %v3419_v31 = vpop.f32.mrf.mxu0  ;;  %v3439_v8 = vpop.f32.mrf.mxu1 }
 0x317   :  { %4003 = vmatpush.msrb.mxu2 %v3384_v9  ;;  %4023 = vmatpush.msrb.mxu3 %v3400_v29  ;;  %v3386_v32 = vld [vmem:[#allocation11 + $0xf80] sm:$0xff]  ;;  %v3459_v9 = vpop.f32.mrf.mxu2  ;;  %v3440_v29 = vadd.f32 %v3439_v8, %v3419_v31 }
 0x318   :  { %3964 = vmatpush.msrb.mxu0 %v3351_v43  ;;  %3984 = vmatpush.msrb.mxu1 %v3367_v30  ;;  %v3479_v30 = vpop.f32.mrf.mxu3 }
 0x319   :  { %4004 = vmatpush.msrb.mxu2 %v3383_v22  ;;  %4024 = vmatpush.msrb.mxu3 %v3399_v45  ;;  %v3460_v43 = vadd.f32 %v3459_v9, %v3440_v29  ;;  %v4044_v29 = vld [vmem:[%s6973_s7] sm:$0xff] }
 0x31a   :  { %3965 = vmatpush.msrb.mxu0 %v3350_v23  ;;  %3985 = vmatpush.msrb.mxu1 %v3366_v20 }
 0x31b   :  { %4005 = vmatpush.msrb.mxu2 %v3382_v61  ;;  %4025 = vmatpush.msrb.mxu3 %v3398_v11  ;;  %v3480_v22 = vadd.f32 %v3479_v30, %v3460_v43  ;;  %v4981_v30 = vmov 0.0  }
 0x31c   :  { %3966 = vmatpush.msrb.mxu0 %v3349_v49  ;;  %3986 = vmatpush.msrb.mxu1 %v3365_v52 }
 0x31d   :  { %4006 = vmatpush.msrb.mxu2 %v3381_v1  ;;  %4026 = vmatpush.msrb.mxu3 %v3397_v60 }
 0x31e   :  { %3967 = vmatpush.msrb.mxu0 %v3348_v39  ;;  %3987 = vmatpush.msrb.mxu1 %v3364_v3  ;;  %v3499_v45 = vpop.f32.mrf.mxu0  ;;  %v3519_v20 = vpop.f32.mrf.mxu1 }
 0x31f   :  { %4007 = vmatpush.msrb.mxu2 %v3380_v36  ;;  %4027 = vmatpush.msrb.mxu3 %v3396_v54  ;;  %v3500_v23 = vadd.f32 %v3499_v45, %v3480_v22  ;;  %v3539_v11 = vpop.f32.mrf.mxu2  ;;  %v4057_v36 = vld [vmem:[%s6973_s7 + $0x68] sm:$0xff] }
 0x320   :  { %3968 = vmatpush.msrb.mxu0 %v3347_v40  ;;  %3988 = vmatpush.msrb.mxu1 %v3363_v2  ;;  %v4056_v40 = vld [vmem:[%s6973_s7 + $0x60] sm:$0xff]  ;;  %v4055_v2 = vld [vmem:[%s6973_s7 + $0x58] sm:$0xff] }
 0x321   :  { %4008 = vmatpush.msrb.mxu2 %v3379_v5  ;;  %4028 = vmatpush.msrb.mxu3 %v3395_v27  ;;  %v3520_v61 = vadd.f32 %v3519_v20, %v3500_v23 }
 0x322   :  { %3969 = vmatpush.msrb.mxu0 %v3346_v6  ;;  %3989 = vmatpush.msrb.mxu1 %v3362_v41  ;;  %v4054_v41 = vld [vmem:[%s6973_s7 + $0x50] sm:$0xff] }
 0x323   :  { %4009 = vmatpush.msrb.mxu2 %v3378_v58  ;;  %4029 = vmatpush.msrb.mxu3 %v3394_v26  ;;  %v3540_v49 = vadd.f32 %v3539_v11, %v3520_v61  ;;  %v4053_v26 = vld [vmem:[%s6973_s7 + $0x48] sm:$0xff] }
 0x324   :  { %3970 = vmatpush.msrb.mxu0 %v3345_v13  ;;  %3990 = vmatpush.msrb.mxu1 %v3361_v15  ;;  %v4052_v13 = vld [vmem:[%s6973_s7 + $0x40] sm:$0xff] }
 0x325   :  { %4010 = vmatpush.msrb.mxu2 %v3377_v34  ;;  %4030 = vmatpush.msrb.mxu3 %v3393_v18 }
 0x326   :  { %3971 = vmatpush.msrb.mxu0 %v3344_v12  ;;  %3991 = vmatpush.msrb.mxu1 %v3360_v25  ;;  %v3579_v52 = vpop.f32.mrf.mxu0  ;;  %v3599_v60 = vpop.f32.mrf.mxu1 }
 0x327   :  { %4011 = vmatpush.msrb.mxu2 %v3376_v48  ;;  %4031 = vmatpush.msrb.mxu3 %v3392_v56  ;;  %v3619_v39 = vpop.f32.mrf.mxu2 }
 0x328   :  { %3972 = vmatpush.msrb.mxu0 %v3343_v59  ;;  %3992 = vmatpush.msrb.mxu1 %v3359_v44 }
 0x329   :  { %4012 = vmatpush.msrb.mxu2 %v3375_v55  ;;  %4032 = vmatpush.msrb.mxu3 %v3391_v42 }
 0x32a   :  { %3973 = vmatpush.msrb.mxu0 %v3342_v37  ;;  %3993 = vmatpush.msrb.mxu1 %v3358_v50  ;;  %v4051_v37 = vld [vmem:[%s6973_s7 + $0x38] sm:$0xff]  ;;  %v4050_v50 = vld [vmem:[%s6973_s7 + $0x30] sm:$0xff] }
 0x32b   :  { %4013 = vmatpush.msrb.mxu2 %v3374_v10  ;;  %4033 = vmatpush.msrb.mxu3 %v3390_v0  ;;  %v4049_v0 = vld [vmem:[%s6973_s7 + $0x28] sm:$0xff] }
 0x32c   :  { %3974 = vmatpush.msrb.mxu0 %v3341_v28  ;;  %3994 = vmatpush.msrb.mxu1 %v3357_v19 }
 0x32d   :  { %4014 = vmatpush.msrb.mxu2 %v3373_v53  ;;  %4034 = vmatpush.msrb.mxu3 %v3389_v33 }
 0x32e   :  { %3975 = vmatpush.msrb.mxu0 %v3340_v63  ;;  %3995 = vmatpush.msrb.mxu1 %v3356_v4  ;;  %v3659_v27 = vpop.f32.mrf.mxu0  ;;  %v3679_v15 = vpop.f32.mrf.mxu1 }
 0x32f   :  { %4015 = vmatpush.msrb.mxu2 %v3372_v47  ;;  %4035 = vmatpush.msrb.mxu3 %v3388_v57  ;;  %v4048_v57 = vld [vmem:[%s6973_s7 + $0x20] sm:$0xff] }
 0x330   :  { %3976 = vmatpush.msrb.mxu0 %v3339_v16  ;;  %3996 = vmatpush.msrb.mxu1 %v3355_v46  ;;  %v3699_v34 = vpop.f32.mrf.mxu2  ;;  %v4083_v16 = vld [vmem:[#allocation13 + $0x18] sm:$0xff]  ;;  %v4047_v46 = vld [vmem:[%s6973_s7 + $0x18] sm:$0xff] }
 0x331   :  { %4016 = vmatpush.msrb.mxu2 %v3371_v24  ;;  %4036 = vmatpush.msrb.mxu3 %v3387_v7  ;;  %v4082_v24 = vld [vmem:[#allocation13 + $0x10] sm:$0xff] }
 0x332   :  { %3977 = vmatpush.msrb.mxu0 %v3338_v35  ;;  %3997 = vmatpush.msrb.mxu1 %v3354_v21  ;;  %v4046_v35 = vld [vmem:[%s6973_s7 + $0x10] sm:$0xff]  ;;  %v4081_v21 = vld [vmem:[#allocation13 + $0x8] sm:$0xff] }
 0x333   :  { %4017 = vmatpush.msrb.mxu2 %v3370_v51  ;;  %4037 = vmatpush.msrb.mxu3 %v3386_v32  ;;  %v4045_v51 = vld [vmem:[%s6973_s7 + $0x8] sm:$0xff]  ;;  %v4080_v32 = vld [vmem:[#allocation13] sm:$0xff] }
 0x334   :  { %3978 = vmatmul.f32.vlgmr.msrb.gmra.mxu0 %v6838_v17  ;;  %3998 = vmatmul.f32.vlgmr.msrb.gmra.mxu1 %v6844_v38  ;;  %v3559_v17 = vpop.f32.mrf.mxu3 }
 0x335   :  { %4018 = vmatmul.f32.vlgmr.msrb.gmra.mxu2 %v6860_v62  ;;  %4038 = vmatmul.f32.vlgmr.msrb.gmra.mxu3 %v6866_v14  ;;  %v3560_v38 = vadd.f32 %v3559_v17, %v3540_v49  ;;  %v4059_v62 = vld [vmem:[%s6973_s7 + $0x78] sm:$0xff]  ;;  %v4058_v14 = vld [vmem:[%s6973_s7 + $0x70] sm:$0xff]  ;;  %s4982_s7 = smov 96  }
 0x336   :  { %4060 = vmatpush.msra.mxu0 %v4059_v62  ;;  %4100 = vmatpush.msra.mxu1 %v4083_v16 }
 0x337   :  { %v3580_v1 = vadd.f32 %v3579_v52, %v3560_v38  ;;  %4167 = vmatpush.msra.mxu3 %v4083_v16 }
 0x338   :  { %4061 = vmatpush.msra.mxu0 %v4058_v14  ;;  %4101 = vmatpush.msra.mxu1 %v4082_v24 }
 0x339   :  { %v3600_v3 = vadd.f32 %v3599_v60, %v3580_v1  ;;  %4168 = vmatpush.msra.mxu3 %v4082_v24 }
 0x33a   :  { %4062 = vmatpush.msra.mxu0 %v4057_v36  ;;  %4102 = vmatpush.msra.mxu1 %v4081_v21  ;;  %v4116_v36 = vld [vmem:[#allocation14 + $0x18] sm:$0xff] }
 0x33b   :  { %v3620_v54 = vadd.f32 %v3619_v39, %v3600_v3  ;;  %4169 = vmatpush.msra.mxu3 %v4081_v21  ;;  %4136 = vmatpush.msra.mxu2 %v4116_v36 }
 0x33c   :  { %v3639_v5 = vpop.f32.mrf.mxu3  ;;  %4063 = vmatpush.msra.mxu0 %v4056_v40  ;;  %4103 = vmatpush.msra.mxu1 %v4080_v32  ;;  %v4114_v40 = vld [vmem:[#allocation14 + $0x8] sm:$0xff] }
 0x33d   :  { %v3640_v6 = vadd.f32 %v3639_v5, %v3620_v54  ;;  %4104 = vmatmul.f32.vlgmr.msra.gmra.mxu1 %v4981_v30  ;;  %4170 = vmatpush.msra.mxu3 %v4080_v32  ;;  %v4115_v54 = vld [vmem:[#allocation14 + $0x10] sm:$0xff] }
 0x33e   :  { %4064 = vmatpush.msra.mxu0 %v4055_v2  ;;  %4198 = vmatpush.msrb.mxu1 %v4116_v36  ;;  %v4113_v2 = vld [vmem:[#allocation14] sm:$0xff] }
 0x33f   :  { %v3660_v58 = vadd.f32 %v3659_v27, %v3640_v6  ;;  %4260 = vmatpush.msrb.mxu3 %v4116_v36  ;;  %4137 = vmatpush.msra.mxu2 %v4115_v54 }
 0x340   :  { %4065 = vmatpush.msra.mxu0 %v4054_v41  ;;  %4199 = vmatpush.msrb.mxu1 %v4115_v54 }
 0x341   :  { %v3680_v18 = vadd.f32 %v3679_v15, %v3660_v58  ;;  %4261 = vmatpush.msrb.mxu3 %v4115_v54  ;;  %4138 = vmatpush.msra.mxu2 %v4114_v40 }
 0x342   :  { %4066 = vmatpush.msra.mxu0 %v4053_v26  ;;  %4200 = vmatpush.msrb.mxu1 %v4114_v40 }
 0x343   :  { %v3700_v12 = vadd.f32 %v3699_v34, %v3680_v18  ;;  %4262 = vmatpush.msrb.mxu3 %v4114_v40  ;;  %4139 = vmatpush.msra.mxu2 %v4113_v2 }
 0x344   :  { %4067 = vmatpush.msra.mxu0 %v4052_v13  ;;  %v3719_v25 = vpop.f32.mrf.mxu3  ;;  %4201 = vmatpush.msrb.mxu1 %v4113_v2 }
 0x345   :  { %v3720_v56 = vadd.f32 %v3719_v25, %v3700_v12  ;;  %4229 = vmatpush.msrb.mxu2 %v4083_v16  ;;  %4263 = vmatpush.msrb.mxu3 %v4113_v2 }
 0x346   :  { %4068 = vmatpush.msra.mxu0 %v4051_v37  ;;  %4291 = vmatpush.msra.mxu1 %v4083_v16 }
 0x347   :  { %4230 = vmatpush.msrb.mxu2 %v4082_v24 }
 0x348   :  { %4069 = vmatpush.msra.mxu0 %v4050_v50  ;;  %4292 = vmatpush.msra.mxu1 %v4082_v24 }
 0x349   :  { %4231 = vmatpush.msrb.mxu2 %v4081_v21 }
 0x34a   :  { %4070 = vmatpush.msra.mxu0 %v4049_v0  ;;  %4293 = vmatpush.msra.mxu1 %v4081_v21 }
 0x34b   :  { %v3739_v48 = vpop.f32.mrf.mxu0  ;;  %v3759_v44 = vpop.f32.mrf.mxu1  ;;  %4232 = vmatpush.msrb.mxu2 %v4080_v32 }
 0x34c   :  { %v3740_v59 = vadd.f32 %v3739_v48, %v3720_v56  ;;  %4071 = vmatpush.msra.mxu0 %v4048_v57  ;;  %4294 = vmatpush.msra.mxu1 %v4080_v32 }
 0x34e   :  { %v3760_v42 = vadd.f32 %v3759_v44, %v3740_v59  ;;  %4072 = vmatpush.msra.mxu0 %v4047_v46 }
 0x350   :  { %4073 = vmatpush.msra.mxu0 %v4046_v35 }
 0x352   :  { %v3779_v55 = vpop.f32.mrf.mxu2  ;;  %v3799_v28 = vpop.f32.mrf.mxu3  ;;  %4074 = vmatpush.msra.mxu0 %v4045_v51 }
 0x353   :  { %v3780_v10 = vadd.f32 %v3779_v55, %v3760_v42 }
 0x354   :  { %4075 = vmatpush.msra.mxu0 %v4044_v29 }
 0x355   :  { %v3800_v53 = vadd.f32 %v3799_v28, %v3780_v10 }
 0x36d   :  { %v3819_v19 = vpop.f32.mrf.mxu0  ;;  %v3839_v63 = vpop.f32.mrf.mxu1 }
 0x36e   :  { %v3820_v33 = vadd.f32 %v3819_v19, %v3800_v53 }
 0x370   :  { %v3840_v47 = vadd.f32 %v3839_v63, %v3820_v33 }
 0x374   :  { %v3859_v4 = vpop.f32.mrf.mxu2  ;;  %v3879_v31 = vpop.f32.mrf.mxu3 }
 0x375   :  { %v3860_v7 = vadd.f32 %v3859_v4, %v3840_v47 }
 0x377   :  { %v3880_v9 = vadd.f32 %v3879_v31, %v3860_v7 }
 0x38f   :  { %v3899_v8 = vpop.f32.mrf.mxu0  ;;  %v3919_v22 = vpop.f32.mrf.mxu1 }
 0x390   :  { %v3900_v43 = vadd.f32 %v3899_v8, %v3880_v9 }
 0x392   :  { %v3920_v23 = vadd.f32 %v3919_v22, %v3900_v43 }
 0x396   :  { %v3939_v45 = vpop.f32.mrf.mxu2  ;;  %v3959_v61 = vpop.f32.mrf.mxu3 }
 0x397   :  { %v3940_v20 = vadd.f32 %v3939_v45, %v3920_v23 }
 0x399   :  { %v3960_v11 = vadd.f32 %v3959_v61, %v3940_v20 }
 0x3b1   :  { %v3979_v49 = vpop.f32.mrf.mxu0  ;;  %v3999_v52 = vpop.f32.mrf.mxu1 }
 0x3b2   :  { %v3980_v17 = vadd.f32 %v3979_v49, %v3960_v11 }
 0x3b4   :  { %v4000_v38 = vadd.f32 %v3999_v52, %v3980_v17 }
 0x3b8   :  { %v4019_v1 = vpop.f32.mrf.mxu2  ;;  %v4039_v14 = vpop.f32.mrf.mxu3 }
 0x3b9   :  { %v4020_v62 = vadd.f32 %v4019_v1, %v4000_v38 }
 0x3ba   :  { %v4105_v5 = vpop.f32.mrf.mxu1 }
 0x3bb   :  { %v4040_v60 = vadd.f32 %v4039_v14, %v4020_v62  ;;  %v4339_v14 = vld [vmem:[%s6974_s8 + $0x18] sm:$0xff] }
 0x3bd   :  { %v4042_v39 = vmax.f32 %v4040_v60, 0.0  ;;  %v4338_v60 = vld [vmem:[%s6974_s8 + $0x10] sm:$0xff] }
 0x3bf   :  { %v4043_v3 = vmin.f32 %v4042_v39, 1.0  ;;  %v4337_v39 = vld [vmem:[%s6974_s8 + $0x8] sm:$0xff] }
 0x3c1   :  { %4076 = vmatmul.f32.vlgmr.msra.gmra.mxu0 %v4043_v3  ;;  %v4336_v3 = vld [vmem:[%s6974_s8] sm:$0xff] }
 0x43e   :  { %v6936_v27 = vpop.f32.mrf.mxu0 }
 0x43f   :  { %v4106_v6 = vadd.f32 %v4105_v5, %v6936_v27  ;;  %4118 = vrot.lane.b32.xlu0 %v6936_v27, %s4982_s7  ;;  %v4212_v41 = vrot.slane %v6936_v27, 4  ;;  %v4150_v58 = vrot.slane %v6936_v27, 2  ;;  %v4274_v34 = vrot.slane %v6936_v27, 6 }
 0x441   :  { %v4108_v26 = vmul.f32 0.5, %v4106_v6  ;;  %4242 = vrot.lane.b32.xlu2 %v4212_v41, %s4982_s7  ;;  %4180 = vrot.lane.b32.xlu1 %v4150_v58, %s4982_s7 }
 0x443   :  { %v4109_v13 = vadd.f32 0.5, %v4108_v26 }
 0x445   :  { %v4110_v15 = vmax.f32 %v4109_v13, 0.0 }
 0x447   :  { %v4111_v18 = vmin.f32 %v4110_v15, 1.0  ;;  %4304 = vrot.lane.b32.xlu0 %v4274_v34, %s4982_s7 }
 0x449   :  { %v4112_v12 = vmul.f32 0.0, %v4111_v18 }
 0x44b   :  { %4435 = vmatmul.msk.f32.vlgmr.msra.gmra.mxu2 %vm4084_vm1, %v4112_v12 }
 0x44c   :  { %4322 = vmatpush.msra.mxu2 %v4116_v36 }
 0x44e   :  { %4323 = vmatpush.msra.mxu2 %v4115_v54 }
 0x450   :  { %4324 = vmatpush.msra.mxu2 %v4114_v40 }
 0x452   :  { %4325 = vmatpush.msra.mxu2 %v4113_v2 }
 0x49b   :  { %v4243_v29 = vpop.permute.xlu2 %4242 }
 0x4b1   :  { %v4119_v25 = vpop.permute.xlu0 %4118 }
 0x4b3   :  { %v4181_v63 = vpop.permute.xlu1 %4180 }
 0x4b9   :  { %v4305_v36 = vpop.permute.xlu0 %4304 }
 0x4ce   :  { %v4141_v48 = vpop.f32.mrf.mxu2 }
 0x4cf   :  { %v4142_v56 = vadd.f32 %v4141_v48, %v4119_v25 }
 0x4d1   :  { %v4436_v59 = vclamps-f32 %v4142_v56, 1.0 }
 0x4d3   :  { %v4146_v44 = vmul.f32 %v4436_v59, %v4111_v18 }
 0x4d5   :  { %v4147_v55 = vsub.f32 0.0, %v4146_v44 }
 0x4d7   :  { %v4148_v42 = vadd.f32 %v4147_v55, %v4112_v12 }
 0x4d9   :  { %v4149_v37 = vadd.f32 %v4436_v59, %v4148_v42 }
 0x4db   :  { %4437 = vmatmul.msk.f32.vlgmr.msra.gmra.mxu3 %vm4084_vm1, %v4149_v37 }
 0x4dc   :  { %4355 = vmatpush.msra.mxu3 %v4339_v14 }
 0x4de   :  { %4356 = vmatpush.msra.mxu3 %v4338_v60 }
 0x4e0   :  { %4357 = vmatpush.msra.mxu3 %v4337_v39 }
 0x4e2   :  { %4358 = vmatpush.msra.mxu3 %v4336_v3 }
 0x55e   :  { %v4172_v50 = vpop.f32.mrf.mxu3 }
 0x55f   :  { %v4173_v10 = vadd.f32 %v4172_v50, %v4150_v58 }
 0x561   :  { %v4175_v0 = vmul.f32 0.5, %v4173_v10 }
 0x563   :  { %v4176_v28 = vadd.f32 0.5, %v4175_v0 }
 0x565   :  { %v4177_v19 = vmax.f32 %v4176_v28, 0.0 }
 0x567   :  { %v4178_v53 = vmin.f32 %v4177_v19, 1.0 }
 0x569   :  { %v4179_v33 = vmul.f32 %v4178_v53, %v4149_v37 }
 0x56b   :  { %4438 = vmatmul.msk.f32.vlgmr.msrb.gmra.mxu1 %vm4084_vm1, %v4179_v33 }
 0x5e8   :  { %v4203_v4 = vpop.f32.mrf.mxu1 }
 0x5e9   :  { %v4204_v47 = vadd.f32 %v4203_v4, %v4181_v63 }
 0x5eb   :  { %v4439_v57 = vclamps-f32 %v4204_v47, 1.0 }
 0x5ed   :  { %v4208_v16 = vmul.f32 %v4439_v57, %v4178_v53 }
 0x5ef   :  { %v4209_v46 = vsub.f32 0.0, %v4208_v16 }
 0x5f1   :  { %v4210_v24 = vadd.f32 %v4209_v46, %v4179_v33 }
 0x5f3   :  { %v4211_v7 = vadd.f32 %v4439_v57, %v4210_v24 }
 0x5f5   :  { %4440 = vmatmul.msk.f32.vlgmr.msrb.gmra.mxu2 %vm4084_vm1, %v4211_v7 }
 0x678   :  { %v4234_v35 = vpop.f32.mrf.mxu2 }
 0x679   :  { %v4235_v21 = vadd.f32 %v4234_v35, %v4212_v41 }
 0x67b   :  { %v4237_v51 = vmul.f32 0.5, %v4235_v21 }
 0x67d   :  { %v4238_v32 = vadd.f32 0.5, %v4237_v51 }
 0x67f   :  { %v4239_v31 = vmax.f32 %v4238_v32, 0.0 }
 0x681   :  { %v4240_v8 = vmin.f32 %v4239_v31, 1.0 }
 0x683   :  { %v4241_v9 = vmul.f32 %v4240_v8, %v4211_v7 }
 0x685   :  { %4441 = vmatmul.msk.f32.vlgmr.msrb.gmra.mxu3 %vm4084_vm1, %v4241_v9 }
 0x708   :  { %v4265_v43 = vpop.f32.mrf.mxu3 }
 0x709   :  { %v4266_v30 = vadd.f32 %v4265_v43, %v4243_v29 }
 0x70b   :  { %v4442_v22 = vclamps-f32 %v4266_v30, 1.0 }
 0x70d   :  { %v4270_v45 = vmul.f32 %v4442_v22, %v4240_v8 }
 0x70f   :  { %v4271_v23 = vsub.f32 0.0, %v4270_v45 }
 0x711   :  { %v4272_v20 = vadd.f32 %v4271_v23, %v4241_v9 }
 0x713   :  { %v4273_v61 = vadd.f32 %v4442_v22, %v4272_v20 }
 0x715   :  { %4443 = vmatmul.msk.f32.vlgmr.msra.gmra.mxu1 %vm4084_vm1, %v4273_v61 }
 0x792   :  { %v4296_v11 = vpop.f32.mrf.mxu1 }
 0x793   :  { %v4297_v49 = vadd.f32 %v4296_v11, %v4274_v34 }
 0x795   :  { %v4299_v17 = vmul.f32 0.5, %v4297_v49 }
 0x797   :  { %v4300_v52 = vadd.f32 0.5, %v4299_v17 }
 0x799   :  { %v4301_v38 = vmax.f32 %v4300_v52, 0.0 }
 0x79b   :  { %v4302_v1 = vmin.f32 %v4301_v38, 1.0 }
 0x79d   :  { %v4303_v62 = vmul.f32 %v4302_v1, %v4273_v61 }
 0x79f   :  { %4444 = vmatmul.msk.f32.vlgmr.msra.gmra.mxu2 %vm4084_vm1, %v4303_v62 }
 0x822   :  { %v4327_v54 = vpop.f32.mrf.mxu2 }
 0x823   :  { %v4328_v40 = vadd.f32 %v4327_v54, %v4305_v36 }
 0x825   :  { %v4445_v2 = vclamps-f32 %v4328_v40, 1.0 }
 0x827   :  { %v4332_v5 = vmul.f32 %v4445_v2, %v4302_v1 }
 0x829   :  { %v4333_v27 = vsub.f32 0.0, %v4332_v5 }
 0x82b   :  { %v4334_v6 = vadd.f32 %v4333_v27, %v4303_v62 }
 0x82d   :  { %v4335_v41 = vadd.f32 %v4445_v2, %v4334_v6 }
 0x82f   :  { %4446 = vmatmul.msk.f32.vlgmr.msra.gmra.mxu3 %vm4084_vm1, %v4335_v41 }
 0x8b2   :  { %v4360_v58 = vpop.f32.mrf.mxu3 }
 0x8b3   :  { %v4447_v26 = vclamps-f32 %v4360_v58, 1.0 }
 0x8b5   :  { %4366 = vst.msk [vmem:[#allocation16] sm:$0x3] %vm4365_vm2, %v4447_v26 }
 0x8b6   :  { %4377 = dma.vmem_to_hbm [thread:$0]  %s4373_s17, 32, %s4375_s20, [#allocation7]  }
 0x8b7   :  { %4963 = dma.done.wait [#allocation7], 32  }
 0x8b8   :  { %4964 = vsyncadd [#allocation7], 4294967264 }
 0x8b9   :  { %4382 = vsyncpa [#allocation6], 1 }
 0x8ba   :  { %4383 = vsyncpa [#allocation9], 1 }
 0x8bb   :  { %4384 = vsyncpa [#allocation12], 1 }
 0x8bc   :  { %4385 = vsyncpa [#allocation15], 1 }
 0x8bd   :  { %4386 = vsyncpa [#allocation7], 1 }

</bundles_post_ra>
